<compile_context>
chip_gen: v7x
topology: tpu7x:2x2x1
jax: 0.10.0
libtpu: 0.0.40
codegen_flags: <defaults>
</compile_context>

<pallas_src>
import math

import jax
import jax.numpy as jnp
import numpy as np
from jax import lax
from jax.experimental import pallas as pl
from jax.experimental.pallas import tpu as pltpu

C_MID = 64    # l0/l1 output channels (== l2's *effective* input channels)
C_OUT = 128   # l2 output channels


def _testnet_fused_kernel(p0_ref, w0_ref, w1_ref, w2_ref, b2_ref,
                          o_ref, apad_ref, patch_ref):
    """One image per grid step: l0 -> l1 -> l2(+bias), fully VMEM-resident.

    p0_ref   : (1, H*W, 27)        layer-0 im2col patches (built in wrapper)
    w0_ref   : (27, 64)            l0 weight folded (kh, kw, cin) -> K
    w1_ref   : (576, 64)           l1 weight folded
    w2_ref   : (576, 128)          l2 weight (first 64 in-channels) folded
    b2_ref   : (1, 128)            l2 bias
    o_ref    : (1, H*W, 128)       output
    apad_ref : (H+2, W+2, 64)      VMEM scratch: zero-halo padded activations
    patch_ref: (H*W, 9*64)         VMEM scratch: im2col patches for l1 / l2
    """
    Hp2, Wp2, C = apad_ref.shape
    H, W = Hp2 - 2, Wp2 - 2
    HW = H * W

    # Zero the halo buffer every step (cheap at this size, and stays correct if
    # the parallel grid axis is split across TensorCores with per-core scratch).
    apad_ref[...] = jnp.zeros_like(apad_ref)

    # ---- layer 0: single K=27 matmul over pre-built im2col patches ----------
    a = jnp.dot(p0_ref[0], w0_ref[...], preferred_element_type=jnp.float32)

    # ---- layers 1 & 2: in-VMEM halo pad + full im2col, one K=576 matmul -----
    def conv3x3(a_prev, w_ref):
        # Write the interior; the 1-pixel halo stays zero ("same" padding).
        apad_ref[1:H + 1, 1:W + 1, :] = a_prev.reshape(H, W, C)
        # Build the (HW, 9*C) im2col patch in VMEM scratch.  kh slices ride the
        # cheap outer axis; column order (kh, kw, c) matches the weight fold.
        for kh in range(3):
            for kw in range(3):
                p = kh * 3 + kw
                patch_ref[:, p * C:(p + 1) * C] = (
                    apad_ref[kh:kh + H, kw:kw + W, :].reshape(HW, C))
        # One deep-K MXU matmul per layer (instead of nine shallow ones).
        return jnp.dot(patch_ref[...], w_ref[...],
                       preferred_element_type=jnp.float32)

    a = conv3x3(a, w1_ref)                        # (HW, 64)
    out = conv3x3(a, w2_ref) + b2_ref[...]        # (HW, 128), lane-dense
    o_ref[0] = out.astype(o_ref.dtype)


def _im2col_3x3_same(x_nhwc):
    """(N,H,W,C) -> (N, H*W, 9*C) patches; column order (kh, kw, c)."""
    N, H, W, C = x_nhwc.shape
    xp = jnp.pad(x_nhwc, ((0, 0), (1, 1), (1, 1), (0, 0)))
    cols = [xp[:, kh:kh + H, kw:kw + W, :]
            for kh in range(3) for kw in range(3)]
    return jnp.concatenate(cols, axis=-1).reshape(N, H * W, 9 * C)


def _fold_weight(w_oihw):
    """OIHW (O, I, 3, 3) -> (9*I, O); row order (kh, kw, cin) matches im2col."""
    w_hwio = jnp.transpose(w_oihw, (2, 3, 1, 0))     # (3, 3, I, O)
    kh, kw, ci, co = w_hwio.shape
    return w_hwio.reshape(kh * kw * ci, co)


def testnet_forward(x_nchw, params):
    """TestNet.forward: x -> l0 -> l1 -> l2.  NCHW in / NCHW out like PyTorch."""
    w0, w1, w2, b2 = params
    N, _, H, W = x_nchw.shape

    x = jnp.transpose(x_nchw, (0, 2, 3, 1)).astype(jnp.float32)   # NHWC
    p0 = _im2col_3x3_same(x)                                      # (N, H*W, 27)

    w0f = _fold_weight(w0)                                        # (27, 64)
    w1f = _fold_weight(w1)                                        # (576, 64)
    # TODO(synk): the PyTorch module feeds l1's 64-channel output into l2
    # (declared in_channels=128), which would raise in torch.  We define the
    # semantics as "zero-pad channels 64->128", implemented by using only the
    # first 64 input-channel slices of l2.weight (numerically identical).
    w2f = _fold_weight(w2[:, :C_MID])                             # (576, 128)
    b2r = b2.reshape(1, C_OUT).astype(jnp.float32)

    out = pl.pallas_call(
        _testnet_fused_kernel,
        out_shape=jax.ShapeDtypeStruct((N, H * W, C_OUT), jnp.float32),
        grid=(N,),
        in_specs=[
            pl.BlockSpec((1, H * W, 27), lambda n: (n, 0, 0)),
            pl.BlockSpec((27, C_MID), lambda n: (0, 0)),
            pl.BlockSpec((9 * C_MID, C_MID), lambda n: (0, 0)),
            pl.BlockSpec((9 * C_MID, C_OUT), lambda n: (0, 0)),
            pl.BlockSpec((1, C_OUT), lambda n: (0, 0)),
        ],
        out_specs=pl.BlockSpec((1, H * W, C_OUT), lambda n: (n, 0, 0)),
        scratch_shapes=[
            pltpu.VMEM((H + 2, W + 2, C_MID), jnp.float32),   # padded activations
            pltpu.VMEM((H * W, 9 * C_MID), jnp.float32),      # im2col patches
        ],
        compiler_params=pltpu.CompilerParams(
            dimension_semantics=("parallel",)),
    )(p0, w0f, w1f, w2f, b2r)

    out = out.reshape(N, H, W, C_OUT)
    return jnp.transpose(out, (0, 3, 1, 2))                       # NHWC -> NCHW


def init_params(key):
    """Deterministic init matching PyTorch Conv2d default (U(+-1/sqrt(fan_in))).

    Shapes exactly as declared in TestNet.__init__ (OIHW):
      l0.weight (64,   3, 3, 3)  bias=False
      l1.weight (64,  64, 3, 3)  bias=False
      l2.weight (128,128, 3, 3)  l2.bias (128,)
    """
    k0, k1, k2, k2b = jax.random.split(key, 4)

    def uinit(k, shape, fan_in):
        bound = 1.0 / math.sqrt(fan_in)
        return jax.random.uniform(k, shape, jnp.float32, -bound, bound)

    w0 = uinit(k0, (64, 3, 3, 3), 3 * 3 * 3)
    w1 = uinit(k1, (64, 64, 3, 3), 64 * 3 * 3)
    w2 = uinit(k2, (128, 128, 3, 3), 128 * 3 * 3)
    b2 = uinit(k2b, (128,), 128 * 3 * 3)
    return w0, w1, w2, b2


def _ref_forward(x_nchw, params):
    """Pure-JAX reference with identical semantics (l2 uses first 64 in-ch)."""
    w0, w1, w2, b2 = params
    dn = ("NCHW", "OIHW", "NCHW")
    pad = ((1, 1), (1, 1))
    y = lax.conv_general_dilated(x_nchw, w0, (1, 1), pad, dimension_numbers=dn)
    y = lax.conv_general_dilated(y, w1, (1, 1), pad, dimension_numbers=dn)
    y = lax.conv_general_dilated(y, w2[:, :C_MID], (1, 1), pad,
                                 dimension_numbers=dn)
    return y + b2.reshape(1, C_OUT, 1, 1)


if __name__ == "__main__":
    key = jax.random.PRNGKey(0)
    kx, kp = jax.random.split(key)

    # Small, module-consistent shapes: batch=2, in_channels=3, spatial=16.
    x = jax.random.normal(kx, (2, 3, 16, 16), dtype=jnp.float32)
    params = init_params(kp)

    fwd = jax.jit(testnet_forward)
    out = fwd(x, params)
    jax.block_until_ready(out)

    assert out.shape == (2, 128, 16, 16), out.shape
    assert bool(jnp.all(jnp.isfinite(out)))

    ref = _ref_forward(x, params)
    np.testing.assert_allclose(np.asarray(out), np.asarray(ref),
                               atol=3e-2, rtol=3e-2)
    print("KERNEL_OK")
</pallas_src>

<mosaic_0001>
module attributes {stable_mosaic.version = 11 : i64} {
  func.func @_testnet_fused_kernel(%arg0: i32, %arg1: memref<1x256x27xf32, #tpu.memory_space<vmem>>, %arg2: memref<27x64xf32, #tpu.memory_space<vmem>>, %arg3: memref<576x64xf32, #tpu.memory_space<vmem>>, %arg4: memref<576x128xf32, #tpu.memory_space<vmem>>, %arg5: memref<1x128xf32, #tpu.memory_space<vmem>>, %arg6: memref<1x256x128xf32, #tpu.memory_space<vmem>>, %arg7: memref<18x18x64xf32, #tpu.memory_space<vmem>>, %arg8: memref<256x576xf32, #tpu.memory_space<vmem>>) attributes {dimension_semantics = [#tpu.dimension_semantics<parallel>], iteration_bounds = array<i64: 2>, scalar_prefetch = 0 : i64, scratch_operands = 2 : i64, tpu.core_type = #tpu.core_type<tc>, window_params = [{transform_indices = @transform_0, window_bounds = array<i64: 1, 256, 27>}, {pipeline_mode = #tpu.pipeline_mode<synchronous>, transform_indices = @transform_1, window_bounds = array<i64: 27, 64>}, {pipeline_mode = #tpu.pipeline_mode<synchronous>, transform_indices = @transform_2, window_bounds = array<i64: 576, 64>}, {pipeline_mode = #tpu.pipeline_mode<synchronous>, transform_indices = @transform_3, window_bounds = array<i64: 576, 128>}, {pipeline_mode = #tpu.pipeline_mode<synchronous>, transform_indices = @transform_4, window_bounds = array<i64: 1, 128>}, {transform_indices = @transform_5, window_bounds = array<i64: 1, 256, 128>}]} {
    %cst = arith.constant 0.000000e+00 : f32
    %0 = vector.broadcast %cst : f32 to vector<18x18x64xf32>
    %c0 = arith.constant 0 : index
    %c0_0 = arith.constant 0 : index
    %c0_1 = arith.constant 0 : index
    %1 = vector.load %arg7[%c0, %c0_0, %c0_1] : memref<18x18x64xf32, #tpu.memory_space<vmem>>, vector<18x18x64xf32>
    tpu.vector_store %arg7[%c0, %c0_0, %c0_1], %0 {strides = array<i32>} : memref<18x18x64xf32, #tpu.memory_space<vmem>>, vector<18x18x64xf32>,
    %c0_2 = arith.constant 0 : index
    %c0_3 = arith.constant 0 : index
    %c0_4 = arith.constant 0 : index
    %2 = vector.load %arg1[%c0_2, %c0_3, %c0_4] : memref<1x256x27xf32, #tpu.memory_space<vmem>>, vector<1x256x27xf32>
    %3 = vector.shape_cast %2 : vector<1x256x27xf32> to vector<256x27xf32>
    %c0_5 = arith.constant 0 : index
    %c0_6 = arith.constant 0 : index
    %4 = vector.load %arg2[%c0_5, %c0_6] : memref<27x64xf32, #tpu.memory_space<vmem>>, vector<27x64xf32>
    %cst_7 = arith.constant dense<0.000000e+00> : vector<256x64xf32>
    %5 = tpu.matmul %3, %4, %cst_7 {dimension_numbers = #tpu.dot_dimension_numbers<[1], [0], [0], [1], [0, 0, 1, 1], [], []>} : vector<256x27xf32>, vector<27x64xf32>, vector<256x64xf32> -> vector<256x64xf32>
    %6 = vector.shape_cast %5 : vector<256x64xf32> to vector<16x16x64xf32>
    %c1 = arith.constant 1 : index
    %c1_8 = arith.constant 1 : index
    %c0_9 = arith.constant 0 : index
    %7 = vector.load %arg7[%c1, %c1_8, %c0_9] : memref<18x18x64xf32, #tpu.memory_space<vmem>>, vector<16x16x64xf32>
    tpu.vector_store %arg7[%c1, %c1_8, %c0_9], %6 {strides = array<i32>} : memref<18x18x64xf32, #tpu.memory_space<vmem>>, vector<16x16x64xf32>,
    %c0_10 = arith.constant 0 : index
    %c0_11 = arith.constant 0 : index
    %c0_12 = arith.constant 0 : index
    %8 = vector.load %arg7[%c0_10, %c0_11, %c0_12] : memref<18x18x64xf32, #tpu.memory_space<vmem>>, vector<16x16x64xf32>
    %9 = vector.shape_cast %8 : vector<16x16x64xf32> to vector<256x64xf32>
    %c0_13 = arith.constant 0 : index
    %c0_14 = arith.constant 0 : index
    %10 = vector.load %arg8[%c0_13, %c0_14] : memref<256x576xf32, #tpu.memory_space<vmem>>, vector<256x64xf32>
    tpu.vector_store %arg8[%c0_13, %c0_14], %9 {strides = array<i32>} : memref<256x576xf32, #tpu.memory_space<vmem>>, vector<256x64xf32>,
    %c0_15 = arith.constant 0 : index
    %c1_16 = arith.constant 1 : index
    %c0_17 = arith.constant 0 : index
    %11 = vector.load %arg7[%c0_15, %c1_16, %c0_17] : memref<18x18x64xf32, #tpu.memory_space<vmem>>, vector<16x16x64xf32>
    %12 = vector.shape_cast %11 : vector<16x16x64xf32> to vector<256x64xf32>
    %c0_18 = arith.constant 0 : index
    %c64 = arith.constant 64 : index
    %13 = vector.load %arg8[%c0_18, %c64] : memref<256x576xf32, #tpu.memory_space<vmem>>, vector<256x64xf32>
    tpu.vector_store %arg8[%c0_18, %c64], %12 {strides = array<i32>} : memref<256x576xf32, #tpu.memory_space<vmem>>, vector<256x64xf32>,
    %c0_19 = arith.constant 0 : index
    %c2 = arith.constant 2 : index
    %c0_20 = arith.constant 0 : index
    %14 = vector.load %arg7[%c0_19, %c2, %c0_20] : memref<18x18x64xf32, #tpu.memory_space<vmem>>, vector<16x16x64xf32>
    %15 = vector.shape_cast %14 : vector<16x16x64xf32> to vector<256x64xf32>
    %c0_21 = arith.constant 0 : index
    %c128 = arith.constant 128 : index
    %16 = vector.load %arg8[%c0_21, %c128] : memref<256x576xf32, #tpu.memory_space<vmem>>, vector<256x64xf32>
    tpu.vector_store %arg8[%c0_21, %c128], %15 {strides = array<i32>} : memref<256x576xf32, #tpu.memory_space<vmem>>, vector<256x64xf32>,
    %c1_22 = arith.constant 1 : index
    %c0_23 = arith.constant 0 : index
    %c0_24 = arith.constant 0 : index
    %17 = vector.load %arg7[%c1_22, %c0_23, %c0_24] : memref<18x18x64xf32, #tpu.memory_space<vmem>>, vector<16x16x64xf32>
    %18 = vector.shape_cast %17 : vector<16x16x64xf32> to vector<256x64xf32>
    %c0_25 = arith.constant 0 : index
    %c192 = arith.constant 192 : index
    %19 = vector.load %arg8[%c0_25, %c192] : memref<256x576xf32, #tpu.memory_space<vmem>>, vector<256x64xf32>
    tpu.vector_store %arg8[%c0_25, %c192], %18 {strides = array<i32>} : memref<256x576xf32, #tpu.memory_space<vmem>>, vector<256x64xf32>,
    %c1_26 = arith.constant 1 : index
    %c1_27 = arith.constant 1 : index
    %c0_28 = arith.constant 0 : index
    %20 = vector.load %arg7[%c1_26, %c1_27, %c0_28] : memref<18x18x64xf32, #tpu.memory_space<vmem>>, vector<16x16x64xf32>
    %21 = vector.shape_cast %20 : vector<16x16x64xf32> to vector<256x64xf32>
    %c0_29 = arith.constant 0 : index
    %c256 = arith.constant 256 : index
    %22 = vector.load %arg8[%c0_29, %c256] : memref<256x576xf32, #tpu.memory_space<vmem>>, vector<256x64xf32>
    tpu.vector_store %arg8[%c0_29, %c256], %21 {strides = array<i32>} : memref<256x576xf32, #tpu.memory_space<vmem>>, vector<256x64xf32>,
    %c1_30 = arith.constant 1 : index
    %c2_31 = arith.constant 2 : index
    %c0_32 = arith.constant 0 : index
    %23 = vector.load %arg7[%c1_30, %c2_31, %c0_32] : memref<18x18x64xf32, #tpu.memory_space<vmem>>, vector<16x16x64xf32>
    %24 = vector.shape_cast %23 : vector<16x16x64xf32> to vector<256x64xf32>
    %c0_33 = arith.constant 0 : index
    %c320 = arith.constant 320 : index
    %25 = vector.load %arg8[%c0_33, %c320] : memref<256x576xf32, #tpu.memory_space<vmem>>, vector<256x64xf32>
    tpu.vector_store %arg8[%c0_33, %c320], %24 {strides = array<i32>} : memref<256x576xf32, #tpu.memory_space<vmem>>, vector<256x64xf32>,
    %c2_34 = arith.constant 2 : index
    %c0_35 = arith.constant 0 : index
    %c0_36 = arith.constant 0 : index
    %26 = vector.load %arg7[%c2_34, %c0_35, %c0_36] : memref<18x18x64xf32, #tpu.memory_space<vmem>>, vector<16x16x64xf32>
    %27 = vector.shape_cast %26 : vector<16x16x64xf32> to vector<256x64xf32>
    %c0_37 = arith.constant 0 : index
    %c384 = arith.constant 384 : index
    %28 = vector.load %arg8[%c0_37, %c384] : memref<256x576xf32, #tpu.memory_space<vmem>>, vector<256x64xf32>
    tpu.vector_store %arg8[%c0_37, %c384], %27 {strides = array<i32>} : memref<256x576xf32, #tpu.memory_space<vmem>>, vector<256x64xf32>,
    %c2_38 = arith.constant 2 : index
    %c1_39 = arith.constant 1 : index
    %c0_40 = arith.constant 0 : index
    %29 = vector.load %arg7[%c2_38, %c1_39, %c0_40] : memref<18x18x64xf32, #tpu.memory_space<vmem>>, vector<16x16x64xf32>
    %30 = vector.shape_cast %29 : vector<16x16x64xf32> to vector<256x64xf32>
    %c0_41 = arith.constant 0 : index
    %c448 = arith.constant 448 : index
    %31 = vector.load %arg8[%c0_41, %c448] : memref<256x576xf32, #tpu.memory_space<vmem>>, vector<256x64xf32>
    tpu.vector_store %arg8[%c0_41, %c448], %30 {strides = array<i32>} : memref<256x576xf32, #tpu.memory_space<vmem>>, vector<256x64xf32>,
    %c2_42 = arith.constant 2 : index
    %c2_43 = arith.constant 2 : index
    %c0_44 = arith.constant 0 : index
    %32 = vector.load %arg7[%c2_42, %c2_43, %c0_44] : memref<18x18x64xf32, #tpu.memory_space<vmem>>, vector<16x16x64xf32>
    %33 = vector.shape_cast %32 : vector<16x16x64xf32> to vector<256x64xf32>
    %c0_45 = arith.constant 0 : index
    %c512 = arith.constant 512 : index
    %34 = vector.load %arg8[%c0_45, %c512] : memref<256x576xf32, #tpu.memory_space<vmem>>, vector<256x64xf32>
    tpu.vector_store %arg8[%c0_45, %c512], %33 {strides = array<i32>} : memref<256x576xf32, #tpu.memory_space<vmem>>, vector<256x64xf32>,
    %c0_46 = arith.constant 0 : index
    %c0_47 = arith.constant 0 : index
    %35 = vector.load %arg8[%c0_46, %c0_47] : memref<256x576xf32, #tpu.memory_space<vmem>>, vector<256x576xf32>
    %c0_48 = arith.constant 0 : index
    %c0_49 = arith.constant 0 : index
    %36 = vector.load %arg3[%c0_48, %c0_49] : memref<576x64xf32, #tpu.memory_space<vmem>>, vector<576x64xf32>
    %cst_50 = arith.constant dense<0.000000e+00> : vector<256x64xf32>
    %37 = tpu.matmul %35, %36, %cst_50 {dimension_numbers = #tpu.dot_dimension_numbers<[1], [0], [0], [1], [0, 0, 1, 1], [], []>} : vector<256x576xf32>, vector<576x64xf32>, vector<256x64xf32> -> vector<256x64xf32>
    %38 = vector.shape_cast %37 : vector<256x64xf32> to vector<16x16x64xf32>
    %c1_51 = arith.constant 1 : index
    %c1_52 = arith.constant 1 : index
    %c0_53 = arith.constant 0 : index
    %39 = vector.load %arg7[%c1_51, %c1_52, %c0_53] : memref<18x18x64xf32, #tpu.memory_space<vmem>>, vector<16x16x64xf32>
    tpu.vector_store %arg7[%c1_51, %c1_52, %c0_53], %38 {strides = array<i32>} : memref<18x18x64xf32, #tpu.memory_space<vmem>>, vector<16x16x64xf32>,
    %c0_54 = arith.constant 0 : index
    %c0_55 = arith.constant 0 : index
    %c0_56 = arith.constant 0 : index
    %40 = vector.load %arg7[%c0_54, %c0_55, %c0_56] : memref<18x18x64xf32, #tpu.memory_space<vmem>>, vector<16x16x64xf32>
    %41 = vector.shape_cast %40 : vector<16x16x64xf32> to vector<256x64xf32>
    %c0_57 = arith.constant 0 : index
    %c0_58 = arith.constant 0 : index
    %42 = vector.load %arg8[%c0_57, %c0_58] : memref<256x576xf32, #tpu.memory_space<vmem>>, vector<256x64xf32>
    tpu.vector_store %arg8[%c0_57, %c0_58], %41 {strides = array<i32>} : memref<256x576xf32, #tpu.memory_space<vmem>>, vector<256x64xf32>,
    %c0_59 = arith.constant 0 : index
    %c1_60 = arith.constant 1 : index
    %c0_61 = arith.constant 0 : index
    %43 = vector.load %arg7[%c0_59, %c1_60, %c0_61] : memref<18x18x64xf32, #tpu.memory_space<vmem>>, vector<16x16x64xf32>
    %44 = vector.shape_cast %43 : vector<16x16x64xf32> to vector<256x64xf32>
    %c0_62 = arith.constant 0 : index
    %c64_63 = arith.constant 64 : index
    %45 = vector.load %arg8[%c0_62, %c64_63] : memref<256x576xf32, #tpu.memory_space<vmem>>, vector<256x64xf32>
    tpu.vector_store %arg8[%c0_62, %c64_63], %44 {strides = array<i32>} : memref<256x576xf32, #tpu.memory_space<vmem>>, vector<256x64xf32>,
    %c0_64 = arith.constant 0 : index
    %c2_65 = arith.constant 2 : index
    %c0_66 = arith.constant 0 : index
    %46 = vector.load %arg7[%c0_64, %c2_65, %c0_66] : memref<18x18x64xf32, #tpu.memory_space<vmem>>, vector<16x16x64xf32>
    %47 = vector.shape_cast %46 : vector<16x16x64xf32> to vector<256x64xf32>
    %c0_67 = arith.constant 0 : index
    %c128_68 = arith.constant 128 : index
    %48 = vector.load %arg8[%c0_67, %c128_68] : memref<256x576xf32, #tpu.memory_space<vmem>>, vector<256x64xf32>
    tpu.vector_store %arg8[%c0_67, %c128_68], %47 {strides = array<i32>} : memref<256x576xf32, #tpu.memory_space<vmem>>, vector<256x64xf32>,
    %c1_69 = arith.constant 1 : index
    %c0_70 = arith.constant 0 : index
    %c0_71 = arith.constant 0 : index
    %49 = vector.load %arg7[%c1_69, %c0_70, %c0_71] : memref<18x18x64xf32, #tpu.memory_space<vmem>>, vector<16x16x64xf32>
    %50 = vector.shape_cast %49 : vector<16x16x64xf32> to vector<256x64xf32>
    %c0_72 = arith.constant 0 : index
    %c192_73 = arith.constant 192 : index
    %51 = vector.load %arg8[%c0_72, %c192_73] : memref<256x576xf32, #tpu.memory_space<vmem>>, vector<256x64xf32>
    tpu.vector_store %arg8[%c0_72, %c192_73], %50 {strides = array<i32>} : memref<256x576xf32, #tpu.memory_space<vmem>>, vector<256x64xf32>,
    %c1_74 = arith.constant 1 : index
    %c1_75 = arith.constant 1 : index
    %c0_76 = arith.constant 0 : index
    %52 = vector.load %arg7[%c1_74, %c1_75, %c0_76] : memref<18x18x64xf32, #tpu.memory_space<vmem>>, vector<16x16x64xf32>
    %53 = vector.shape_cast %52 : vector<16x16x64xf32> to vector<256x64xf32>
    %c0_77 = arith.constant 0 : index
    %c256_78 = arith.constant 256 : index
    %54 = vector.load %arg8[%c0_77, %c256_78] : memref<256x576xf32, #tpu.memory_space<vmem>>, vector<256x64xf32>
    tpu.vector_store %arg8[%c0_77, %c256_78], %53 {strides = array<i32>} : memref<256x576xf32, #tpu.memory_space<vmem>>, vector<256x64xf32>,
    %c1_79 = arith.constant 1 : index
    %c2_80 = arith.constant 2 : index
    %c0_81 = arith.constant 0 : index
    %55 = vector.load %arg7[%c1_79, %c2_80, %c0_81] : memref<18x18x64xf32, #tpu.memory_space<vmem>>, vector<16x16x64xf32>
    %56 = vector.shape_cast %55 : vector<16x16x64xf32> to vector<256x64xf32>
    %c0_82 = arith.constant 0 : index
    %c320_83 = arith.constant 320 : index
    %57 = vector.load %arg8[%c0_82, %c320_83] : memref<256x576xf32, #tpu.memory_space<vmem>>, vector<256x64xf32>
    tpu.vector_store %arg8[%c0_82, %c320_83], %56 {strides = array<i32>} : memref<256x576xf32, #tpu.memory_space<vmem>>, vector<256x64xf32>,
    %c2_84 = arith.constant 2 : index
    %c0_85 = arith.constant 0 : index
    %c0_86 = arith.constant 0 : index
    %58 = vector.load %arg7[%c2_84, %c0_85, %c0_86] : memref<18x18x64xf32, #tpu.memory_space<vmem>>, vector<16x16x64xf32>
    %59 = vector.shape_cast %58 : vector<16x16x64xf32> to vector<256x64xf32>
    %c0_87 = arith.constant 0 : index
    %c384_88 = arith.constant 384 : index
    %60 = vector.load %arg8[%c0_87, %c384_88] : memref<256x576xf32, #tpu.memory_space<vmem>>, vector<256x64xf32>
    tpu.vector_store %arg8[%c0_87, %c384_88], %59 {strides = array<i32>} : memref<256x576xf32, #tpu.memory_space<vmem>>, vector<256x64xf32>,
    %c2_89 = arith.constant 2 : index
    %c1_90 = arith.constant 1 : index
    %c0_91 = arith.constant 0 : index
    %61 = vector.load %arg7[%c2_89, %c1_90, %c0_91] : memref<18x18x64xf32, #tpu.memory_space<vmem>>, vector<16x16x64xf32>
    %62 = vector.shape_cast %61 : vector<16x16x64xf32> to vector<256x64xf32>
    %c0_92 = arith.constant 0 : index
    %c448_93 = arith.constant 448 : index
    %63 = vector.load %arg8[%c0_92, %c448_93] : memref<256x576xf32, #tpu.memory_space<vmem>>, vector<256x64xf32>
    tpu.vector_store %arg8[%c0_92, %c448_93], %62 {strides = array<i32>} : memref<256x576xf32, #tpu.memory_space<vmem>>, vector<256x64xf32>,
    %c2_94 = arith.constant 2 : index
    %c2_95 = arith.constant 2 : index
    %c0_96 = arith.constant 0 : index
    %64 = vector.load %arg7[%c2_94, %c2_95, %c0_96] : memref<18x18x64xf32, #tpu.memory_space<vmem>>, vector<16x16x64xf32>
    %65 = vector.shape_cast %64 : vector<16x16x64xf32> to vector<256x64xf32>
    %c0_97 = arith.constant 0 : index
    %c512_98 = arith.constant 512 : index
    %66 = vector.load %arg8[%c0_97, %c512_98] : memref<256x576xf32, #tpu.memory_space<vmem>>, vector<256x64xf32>
    tpu.vector_store %arg8[%c0_97, %c512_98], %65 {strides = array<i32>} : memref<256x576xf32, #tpu.memory_space<vmem>>, vector<256x64xf32>,
    %c0_99 = arith.constant 0 : index
    %c0_100 = arith.constant 0 : index
    %67 = vector.load %arg8[%c0_99, %c0_100] : memref<256x576xf32, #tpu.memory_space<vmem>>, vector<256x576xf32>
    %c0_101 = arith.constant 0 : index
    %c0_102 = arith.constant 0 : index
    %68 = vector.load %arg4[%c0_101, %c0_102] : memref<576x128xf32, #tpu.memory_space<vmem>>, vector<576x128xf32>
    %cst_103 = arith.constant dense<0.000000e+00> : vector<256x128xf32>
    %69 = tpu.matmul %67, %68, %cst_103 {dimension_numbers = #tpu.dot_dimension_numbers<[1], [0], [0], [1], [0, 0, 1, 1], [], []>} : vector<256x576xf32>, vector<576x128xf32>, vector<256x128xf32> -> vector<256x128xf32>
    %c0_104 = arith.constant 0 : index
    %c0_105 = arith.constant 0 : index
    %70 = vector.load %arg5[%c0_104, %c0_105] : memref<1x128xf32, #tpu.memory_space<vmem>>, vector<1x128xf32>
    %71 = vector.broadcast %70 : vector<1x128xf32> to vector<256x128xf32>
    %72 = arith.addf %69, %71 : vector<256x128xf32>
    %c0_106 = arith.constant 0 : index
    %c0_107 = arith.constant 0 : index
    %c0_108 = arith.constant 0 : index
    %73 = vector.load %arg6[%c0_106, %c0_107, %c0_108] : memref<1x256x128xf32, #tpu.memory_space<vmem>>, vector<1x256x128xf32>
    %74 = vector.shape_cast %73 : vector<1x256x128xf32> to vector<256x128xf32>
    %75 = vector.shape_cast %72 : vector<256x128xf32> to vector<1x256x128xf32>
    tpu.vector_store %arg6[%c0_106, %c0_107, %c0_108], %75 {strides = array<i32>} : memref<1x256x128xf32, #tpu.memory_space<vmem>>, vector<1x256x128xf32>,
    return
  }
  func.func @transform_0(%arg0: i32) -> (i32, i32, i32) {
    %c0_i32 = arith.constant 0 : i32
    %c0_i32_0 = arith.constant 0 : i32
    %c0_i32_1 = arith.constant 0 : i32
    return %arg0, %c0_i32, %c0_i32_0 : i32, i32, i32
  }
  func.func @transform_1(%arg0: i32) -> (i32, i32) {
    %c0_i32 = arith.constant 0 : i32
    %c0_i32_0 = arith.constant 0 : i32
    %c0_i32_1 = arith.constant 0 : i32
    return %c0_i32, %c0_i32_0 : i32, i32
  }
  func.func @transform_2(%arg0: i32) -> (i32, i32) {
    %c0_i32 = arith.constant 0 : i32
    %c0_i32_0 = arith.constant 0 : i32
    %c0_i32_1 = arith.constant 0 : i32
    return %c0_i32, %c0_i32_0 : i32, i32
  }
  func.func @transform_3(%arg0: i32) -> (i32, i32) {
    %c0_i32 = arith.constant 0 : i32
    %c0_i32_0 = arith.constant 0 : i32
    %c0_i32_1 = arith.constant 0 : i32
    return %c0_i32, %c0_i32_0 : i32, i32
  }
  func.func @transform_4(%arg0: i32) -> (i32, i32) {
    %c0_i32 = arith.constant 0 : i32
    %c0_i32_0 = arith.constant 0 : i32
    %c0_i32_1 = arith.constant 0 : i32
    return %c0_i32, %c0_i32_0 : i32, i32
  }
  func.func @transform_5(%arg0: i32) -> (i32, i32, i32) {
    %c0_i32 = arith.constant 0 : i32
    %c0_i32_0 = arith.constant 0 : i32
    %c0_i32_1 = arith.constant 0 : i32
    return %arg0, %c0_i32, %c0_i32_0 : i32, i32, i32
  }
}

</mosaic_0001>

<bundles_post_ra>
// kernel: testnet_forward.1
= control target key start
LH: loop header
LB: loop body
LE: loop exit
PB: predicated region body
PF: predicated region fallthrough
CT: control target
= control target key end

     0   :  { %10 = vsyncpa [#allocation5], 0  ;;  %s8434_s0 = inlined_call_operand.vmem [shape: f32[2,256,27], index: 0, kind: input, shape index: {}]   ;;  %s8435_s1 = inlined_call_operand.vmem [shape: f32[27,64], index: 1, kind: input, shape index: {}]   ;;  %s8436_s2 = inlined_call_operand.vmem [shape: f32[576,64], index: 2, kind: input, shape index: {}]   ;;  %s8437_s3 = inlined_call_operand.vmem [shape: f32[576,128], index: 3, kind: input, shape index: {}]   ;;  %s8438_s4 = inlined_call_operand.vmem [shape: f32[1,128], index: 4, kind: input, shape index: {}]   ;;  %s8439_s5 = inlined_call_operand.hbm [shape: f32[2,256,128], index: 5, kind: output, shape index: {}]  }
   0x1   :  { %12 = vsyncpa [#allocation5 + $0x1], 0  ;;  %s5961_s18 = smov 0   ;;  %s5963_s19 = smov 0  }
   0x2   :  { %s5965_s20 = smov 0   ;;  %s5967_s21 = smov 0  }
   0x3 LB: > { %s5982_s22 = sadd.s32 4294967295, %s5922_s21   ;;  %s5005_s23 = sadd.s32 4294967294, %s5922_s21   ;;  %s5922_s21 = sphi %s5967_s21, %s8474_s21   ;;  %s5918_s20 = sphi %s5965_s20, %s8473_s20   ;;  %s5914_s19 = sphi %s5963_s19, %s8472_s19   ;;  %s5910_s18 = sphi %s5961_s18, %s8471_s18  }
   0x4   : > { %s5986_s24 = sadd.s32 1, %s5922_s21   ;;  %s135_s25 = sadd.s32 1, %s5918_s20 }
   0x5   : > { %s132_s26 = ssub.s32 %s5922_s21, %s5986_s24  ;;  %p145_p0 = scmp.ne.s32.totalorder %s5918_s20, %s5914_s19 }
   0x6   : > { %p133_p1 = scmp.eq.s32.totalorder %s132_s26, 0  ;;  %p146_p2 = scmp.eq.s32.totalorder %s5982_s22, 1 }
   0x7   : > { %p151_p3 = scmp.ne.s32.totalorder %s5914_s19, %s5910_s18  ;;  %p152_p4 = scmp.eq.s32.totalorder %s5005_s23, 1 }
   0x8   : > { %s5997_s27 = scalar_select %p133_p1, %s5918_s20, %s135_s25  }
   0x9   : > { %p5999_p5 = por %p146_p2, %p145_p0  ;;  %p6003_p6 = por %p152_p4, %p151_p3 }
   0xa   : > { %p5008_p7 = scmp.ge.s32.totalorder %s5922_s21, 1  ;;  %p190_p8 = scmp.lt.s32.totalorder %s5922_s21, 3 }
   0xc   : > { %p191_p9 = pnand %p5008_p7, %p190_p8 }
   0xe   : > { %194 = sbr.rel (%p191_p9) target bundleno = 1354 (0x54a), region = 40 }
  0x15   : > { %v311_v0 = vld [vmem:[%s8435_s1] sm:$0xff]  ;;  %v312_v1 = vld [vmem:[%s8435_s1 + $0x8] sm:$0xff]  ;;  %v313_v2 = vld [vmem:[%s8435_s1 + $0x10] sm:$0xff]  ;;  %vm412_vm0 = vcmask 1042432   ;;  %p218_p10 = scmp.lt.s32.totalorder %s5982_s22, 1  ;;  %vm223_vm1 = vcmask 523264  }
  0x16   : > { %v6019_v3 = vpack.c.bf16 %v312_v1, %v311_v0  ;;  %v314_v4 = vld [vmem:[%s8435_s1 + $0x18] sm:$0x7]  ;;  %vm5924_vm2 = vmmov 1   ;;  %vm226_vm4 = vcmask 517120   ;;  %v5925_v7 = vmov 0.0   ;;  %v1988_v40 = vld [vmem:[%s8436_s2 + $0x200] sm:$0xff] }
  0x17   : > { %v6024_v5 = vpack.c.bf16 %v314_v4, %v313_v2  ;;  %vm6026_vm3 = vmpackc.low %vm412_vm0, %vm5924_vm2  ;;  %s6031_s13 = scalar_select %p218_p10, %s5982_s22, 1  ;;  %229 = vst.msk [vmem:[#allocation2 + $0x20] sm:$0xff] %vm223_vm1, %v5925_v7  ;;  %vm315_vm5 = vcmask 220160   ;;  %v1989_v41 = vld [vmem:[%s8436_s2 + $0x208] sm:$0xff]  ;;  %v1990_v43 = vld [vmem:[%s8436_s2 + $0x210] sm:$0xff]  ;;  %v8440_v54 = vmov 0.0|0.0  }
  0x18   : > { %224 = vst.msk [vmem:[#allocation2] sm:$0xff] %vm223_vm1, %v5925_v7  ;;  %225 = vst.msk [vmem:[#allocation2 + $0x8] sm:$0xff] %vm223_vm1, %v5925_v7  ;;  %5418 = vmatprep.subr.bf16.mxu0 %v6019_v3  ;;  %v5523_v42 = vpack.c.bf16 %v1989_v41, %v1988_v40  ;;  %v1991_v44 = vld [vmem:[%s8436_s2 + $0x218] sm:$0xff]  ;;  %v1992_v46 = vld [vmem:[%s8436_s2 + $0x220] sm:$0xff]  ;;  %5427 = vmatprep.subr.bf16.mxu1 %v8440_v54  ;;  %s5927_s23 = smov 64   ;;  %vm898_vm6 = vcmask 1048064  }
  0x19   : > { %228 = vst.msk [vmem:[#allocation2 + $0x18] sm:$0xff] %vm223_vm1, %v5925_v7  ;;  %231 = vst.msk [vmem:[#allocation2 + $0x30] sm:$0xff] %vm223_vm1, %v5925_v7  ;;  %5420 = vmatpush3.bf16.msra.mxu0 %v6019_v3  ;;  %s5115_s14 = sshll.u32 %s6031_s13, 8  ;;  %v5527_v45 = vpack.c.bf16 %v1991_v44, %v1990_v43  ;;  %v1993_v47 = vld [vmem:[%s8436_s2 + $0x228] sm:$0xff]  ;;  %v1994_v49 = vld [vmem:[%s8436_s2 + $0x230] sm:$0xff]  ;;  %s5116_s30 = sshll.u32 %s5982_s22, 12 }
  0x1a   : > { %232 = vst.msk [vmem:[#allocation2 + $0x38] sm:$0xff] %vm223_vm1, %v5925_v7  ;;  %234 = vst.msk [vmem:[#allocation2 + $0x48] sm:$0xff] %vm223_vm1, %v5925_v7  ;;  %5423 = vmatprep.subr.msk.bf16.mxu0 %vm6026_vm3, %v6024_v5  ;;  %s6096_s17 = scalar_lea.vmem %s8434_s0, %s5115_s14  ;;  %v5531_v48 = vpack.c.bf16 %v1993_v47, %v1992_v46  ;;  %v1995_v50 = vld [vmem:[%s8436_s2 + $0x238] sm:$0xff]  ;;  %v1924_v52 = vld [vmem:[%s8436_s2] sm:$0xff]  ;;  %s8385_s9 = scalar_lea.hbm %s8439_s5, %s5116_s30 }
  0x1b   : > { %235 = vst.msk [vmem:[#allocation2 + $0x50] sm:$0xff] %vm223_vm1, %v5925_v7  ;;  %237 = vst.msk [vmem:[#allocation2 + $0x60] sm:$0xff] %vm223_vm1, %v5925_v7  ;;  %v279_v8 = vld [vmem:[%s6096_s17] sm:$0xff]  ;;  %v280_v9 = vld [vmem:[%s6096_s17 + $0x8] sm:$0xff]  ;;  %v5535_v51 = vpack.c.bf16 %v1995_v50, %v1994_v49  ;;  %s5928_s11 = smov [#allocation4]  }
  0x1c   : > { %238 = vst.msk [vmem:[#allocation2 + $0x68] sm:$0xff] %vm223_vm1, %v5925_v7  ;;  %240 = vst.msk [vmem:[#allocation2 + $0x78] sm:$0xff] %vm223_vm1, %v5925_v7  ;;  %5241 = vmatprep.mubr.msk.f32.mxu0 %vm315_vm5, %v279_v8  ;;  %v281_v10 = vld [vmem:[%s6096_s17 + $0x10] sm:$0xff]  ;;  %v282_v11 = vld [vmem:[%s6096_s17 + $0x18] sm:$0xff]  ;;  %s5864_s12 = sshll.u32 %s5928_s11, 4  ;;  %s5865_s12 = int_to_ptr.vmem [resolvable:$false] %s5864_s12 }
  0x1d   : > { %241 = vst.msk [vmem:[#allocation2 + $0x80] sm:$0xff] %vm223_vm1, %v5925_v7  ;;  %243 = vst.msk [vmem:[#allocation2 + $0x90] sm:$0xff] %vm223_vm1, %v5925_v7  ;;  %5426 = vmatpush3.bf16.msk.msra.mxu0 %vm6026_vm3, %v6024_v5  ;;  %v283_v12 = vld [vmem:[%s6096_s17 + $0x20] sm:$0xff]  ;;  %v284_v13 = vld [vmem:[%s6096_s17 + $0x28] sm:$0xff]  ;;  %s5866_s13 = scalar_lea.vmem %s5865_s12, 8192 }
  0x1e   : > { %244 = vst.msk [vmem:[#allocation2 + $0x98] sm:$0xff] %vm223_vm1, %v5925_v7  ;;  %246 = vst.msk [vmem:[#allocation2 + $0xa8] sm:$0xff] %vm223_vm1, %v5925_v7  ;;  %v285_v14 = vld [vmem:[%s6096_s17 + $0x30] sm:$0xff]  ;;  %v286_v15 = vld [vmem:[%s6096_s17 + $0x38] sm:$0xff]  ;;  %5524 = vmatprep.subr.bf16.mxu0 %v5523_v42 }
  0x1f   : > { %247 = vst.msk [vmem:[#allocation2 + $0xb0] sm:$0xff] %vm223_vm1, %v5925_v7  ;;  %249 = vst.msk [vmem:[#allocation2 + $0xc0] sm:$0xff] %vm223_vm1, %v5925_v7  ;;  %v287_v16 = vld [vmem:[%s6096_s17 + $0x40] sm:$0xff]  ;;  %v288_v17 = vld [vmem:[%s6096_s17 + $0x48] sm:$0xff] }
  0x20   : > { %250 = vst.msk [vmem:[#allocation2 + $0xc8] sm:$0xff] %vm223_vm1, %v5925_v7  ;;  %252 = vst.msk [vmem:[#allocation2 + $0xd8] sm:$0xff] %vm223_vm1, %v5925_v7  ;;  %5242 = vmatmul.mubr.msk.f32.vlgmr.msra.gmra.mrb[0].mxu0 %vm315_vm5, %v280_v9  ;;  %v289_v18 = vld [vmem:[%s6096_s17 + $0x50] sm:$0xff]  ;;  %v290_v19 = vld [vmem:[%s6096_s17 + $0x58] sm:$0xff] }
  0x21   : > { %253 = vst.msk [vmem:[#allocation2 + $0xe0] sm:$0xff] %vm223_vm1, %v5925_v7  ;;  %255 = vst.msk [vmem:[#allocation2 + $0xf0] sm:$0xff] %vm223_vm1, %v5925_v7  ;;  %5244 = vmatprep.mubr.msk.f32.mxu0 %vm315_vm5, %v281_v10  ;;  %v291_v20 = vld [vmem:[%s6096_s17 + $0x60] sm:$0xff]  ;;  %v292_v21 = vld [vmem:[%s6096_s17 + $0x68] sm:$0xff]  ;;  %5526 = vmatpush3.bf16.msra.mxu0 %v5523_v42 }
  0x22   : > { %256 = vst.msk [vmem:[#allocation2 + $0xf8] sm:$0xff] %vm223_vm1, %v5925_v7  ;;  %258 = vst.msk [vmem:[#allocation2 + $0x108] sm:$0xff] %vm223_vm1, %v5925_v7  ;;  %v293_v22 = vld [vmem:[%s6096_s17 + $0x70] sm:$0xff]  ;;  %v294_v23 = vld [vmem:[%s6096_s17 + $0x78] sm:$0xff]  ;;  %5528 = vmatprep.subr.bf16.mxu0 %v5527_v45 }
  0x23   : > { %259 = vst.msk [vmem:[#allocation2 + $0x110] sm:$0xff] %vm223_vm1, %v5925_v7  ;;  %261 = vst.msk [vmem:[#allocation2 + $0x120] sm:$0xff] %vm223_vm1, %v5925_v7  ;;  %v295_v24 = vld [vmem:[%s6096_s17 + $0x80] sm:$0xff]  ;;  %v296_v25 = vld [vmem:[%s6096_s17 + $0x88] sm:$0xff] }
  0x24   : > { %262 = vst.msk [vmem:[#allocation2 + $0x128] sm:$0xff] %vm223_vm1, %v5925_v7  ;;  %264 = vst.msk [vmem:[#allocation2 + $0x138] sm:$0xff] %vm223_vm1, %v5925_v7  ;;  %5245 = vmatmul.mubr.msk.f32.gmra.mrb[2].mxu0 %vm315_vm5, %v282_v11  ;;  %v297_v26 = vld [vmem:[%s6096_s17 + $0x90] sm:$0xff]  ;;  %v298_v27 = vld [vmem:[%s6096_s17 + $0x98] sm:$0xff] }
  0x25   : > { %265 = vst.msk [vmem:[#allocation2 + $0x140] sm:$0xff] %vm223_vm1, %v5925_v7  ;;  %267 = vst.msk [vmem:[#allocation2 + $0x150] sm:$0xff] %vm223_vm1, %v5925_v7  ;;  %5247 = vmatprep.mubr.msk.f32.mxu0 %vm315_vm5, %v283_v12  ;;  %v299_v28 = vld [vmem:[%s6096_s17 + $0xa0] sm:$0xff]  ;;  %v300_v29 = vld [vmem:[%s6096_s17 + $0xa8] sm:$0xff]  ;;  %5530 = vmatpush3.bf16.msra.mxu0 %v5527_v45 }
  0x26   : > { %268 = vst.msk [vmem:[#allocation2 + $0x158] sm:$0xff] %vm223_vm1, %v5925_v7  ;;  %270 = vst.msk [vmem:[#allocation2 + $0x168] sm:$0xff] %vm223_vm1, %v5925_v7  ;;  %v301_v30 = vld [vmem:[%s6096_s17 + $0xb0] sm:$0xff]  ;;  %v302_v31 = vld [vmem:[%s6096_s17 + $0xb8] sm:$0xff]  ;;  %5532 = vmatprep.subr.bf16.mxu0 %v5531_v48 }
  0x27   : > { %271 = vst.msk [vmem:[#allocation2 + $0x170] sm:$0xff] %vm223_vm1, %v5925_v7  ;;  %273 = vst.msk [vmem:[#allocation2 + $0x180] sm:$0xff] %vm223_vm1, %v5925_v7  ;;  %v303_v32 = vld [vmem:[%s6096_s17 + $0xc0] sm:$0xff]  ;;  %v304_v33 = vld [vmem:[%s6096_s17 + $0xc8] sm:$0xff] }
  0x28   : > { %274 = vst.msk [vmem:[#allocation2 + $0x188] sm:$0xff] %vm223_vm1, %v5925_v7  ;;  %276 = vst.msk [vmem:[#allocation2 + $0x198] sm:$0xff] %vm223_vm1, %v5925_v7  ;;  %5248 = vmatmul.mubr.msk.f32.gmra.mrb[4].mxu0 %vm315_vm5, %v284_v13  ;;  %v305_v34 = vld [vmem:[%s6096_s17 + $0xd0] sm:$0xff]  ;;  %v306_v35 = vld [vmem:[%s6096_s17 + $0xd8] sm:$0xff] }
  0x29   : > { %277 = vst.msk [vmem:[#allocation2 + $0x1a0] sm:$0xff] %vm223_vm1, %v5925_v7  ;;  %5250 = vmatprep.mubr.msk.f32.mxu0 %vm315_vm5, %v285_v14  ;;  %v307_v36 = vld [vmem:[%s6096_s17 + $0xe0] sm:$0xff]  ;;  %v308_v37 = vld [vmem:[%s6096_s17 + $0xe8] sm:$0xff]  ;;  %v309_v38 = vld [vmem:[%s6096_s17 + $0xf0] sm:$0xff]  ;;  %5534 = vmatpush3.bf16.msra.mxu0 %v5531_v48 }
  0x2a   : > { %230 = vst.msk [vmem:[#allocation2 + $0x28] sm:$0x3] %vm226_vm4, %v5925_v7  ;;  %227 = vst.msk [vmem:[#allocation2 + $0x10] sm:$0x3] %vm226_vm4, %v5925_v7  ;;  %v310_v39 = vld [vmem:[%s6096_s17 + $0xf8] sm:$0xff]  ;;  %5536 = vmatprep.subr.bf16.mxu0 %v5535_v51  ;;  %v1925_v53 = vld [vmem:[%s8436_s2 + $0x8] sm:$0xff] }
  0x2b   : > { %233 = vst.msk [vmem:[#allocation2 + $0x40] sm:$0x3] %vm226_vm4, %v5925_v7  ;;  %236 = vst.msk [vmem:[#allocation2 + $0x58] sm:$0x3] %vm226_vm4, %v5925_v7  ;;  %v5428_v55 = vpack.c.bf16 %v1925_v53, %v1924_v52  ;;  %v1926_v56 = vld [vmem:[%s8436_s2 + $0x10] sm:$0xff]  ;;  %v1927_v57 = vld [vmem:[%s8436_s2 + $0x18] sm:$0xff] }
  0x2c   : > { %239 = vst.msk [vmem:[#allocation2 + $0x70] sm:$0x3] %vm226_vm4, %v5925_v7  ;;  %242 = vst.msk [vmem:[#allocation2 + $0x88] sm:$0x3] %vm226_vm4, %v5925_v7  ;;  %5251 = vmatmul.mubr.msk.f32.gmra.mrb[6].mxu0 %vm315_vm5, %v286_v15  ;;  %v5431_v58 = vpack.c.bf16 %v1927_v57, %v1926_v56  ;;  %v1928_v59 = vld [vmem:[%s8436_s2 + $0x20] sm:$0xff]  ;;  %v1929_v60 = vld [vmem:[%s8436_s2 + $0x28] sm:$0xff] }
  0x2d   : > { %245 = vst.msk [vmem:[#allocation2 + $0xa0] sm:$0x3] %vm226_vm4, %v5925_v7  ;;  %248 = vst.msk [vmem:[#allocation2 + $0xb8] sm:$0x3] %vm226_vm4, %v5925_v7  ;;  %5253 = vmatprep.mubr.msk.f32.mxu0 %vm315_vm5, %v287_v16  ;;  %5538 = vmatpush3.bf16.msra.mxu0 %v5535_v51  ;;  %v5434_v61 = vpack.c.bf16 %v1929_v60, %v1928_v59  ;;  %v1930_v62 = vld [vmem:[%s8436_s2 + $0x30] sm:$0xff]  ;;  %v1931_v63 = vld [vmem:[%s8436_s2 + $0x38] sm:$0xff] }
  0x2e   : > { %251 = vst.msk [vmem:[#allocation2 + $0xd0] sm:$0x3] %vm226_vm4, %v5925_v7  ;;  %254 = vst.msk [vmem:[#allocation2 + $0xe8] sm:$0x3] %vm226_vm4, %v5925_v7  ;;  %5539 = vmatprep.subr.bf16.mxu0 %v8440_v54  ;;  %5429 = vmatpush1.bf16.msra.mxu1 %v5428_v55  ;;  %v5437_v0 = vpack.c.bf16 %v1931_v63, %v1930_v62  ;;  %v1932_v1 = vld [vmem:[%s8436_s2 + $0x40] sm:$0xff]  ;;  %v1933_v2 = vld [vmem:[%s8436_s2 + $0x48] sm:$0xff] }
  0x2f   : > { %257 = vst.msk [vmem:[#allocation2 + $0x100] sm:$0x3] %vm226_vm4, %v5925_v7  ;;  %260 = vst.msk [vmem:[#allocation2 + $0x118] sm:$0x3] %vm226_vm4, %v5925_v7  ;;  %5430 = vmatprep.subr.bf16.mxu1 %v8440_v54  ;;  %v5440_v3 = vpack.c.bf16 %v1933_v2, %v1932_v1  ;;  %v1934_v4 = vld [vmem:[%s8436_s2 + $0x50] sm:$0xff]  ;;  %v1935_v5 = vld [vmem:[%s8436_s2 + $0x58] sm:$0xff] }
  0x30   : > { %263 = vst.msk [vmem:[#allocation2 + $0x130] sm:$0x3] %vm226_vm4, %v5925_v7  ;;  %266 = vst.msk [vmem:[#allocation2 + $0x148] sm:$0x3] %vm226_vm4, %v5925_v7  ;;  %5254 = vmatmul.mubr.msk.f32.gmra.mrb[8].mxu0 %vm315_vm5, %v288_v17  ;;  %v5443_v6 = vpack.c.bf16 %v1935_v5, %v1934_v4  ;;  %v1937_v8 = vld [vmem:[%s8436_s2 + $0x68] sm:$0xff]  ;;  %v1938_v10 = vld [vmem:[%s8436_s2 + $0x70] sm:$0xff] }
  0x31   : > { %269 = vst.msk [vmem:[#allocation2 + $0x160] sm:$0x3] %vm226_vm4, %v5925_v7  ;;  %272 = vst.msk [vmem:[#allocation2 + $0x178] sm:$0x3] %vm226_vm4, %v5925_v7  ;;  %5256 = vmatprep.mubr.msk.f32.mxu0 %vm315_vm5, %v289_v18  ;;  %v1939_v11 = vld [vmem:[%s8436_s2 + $0x78] sm:$0xff]  ;;  %v1940_v13 = vld [vmem:[%s8436_s2 + $0x80] sm:$0xff] }
  0x32   : > { %275 = vst.msk [vmem:[#allocation2 + $0x190] sm:$0x3] %vm226_vm4, %v5925_v7  ;;  %278 = vst.msk [vmem:[#allocation2 + $0x1a8] sm:$0x3] %vm226_vm4, %v5925_v7  ;;  %5432 = vmatpush1.bf16.msra.mxu1 %v5431_v58  ;;  %v1936_v7 = vld [vmem:[%s8436_s2 + $0x60] sm:$0xff]  ;;  %v5449_v12 = vpack.c.bf16 %v1939_v11, %v1938_v10  ;;  %v1941_v14 = vld [vmem:[%s8436_s2 + $0x88] sm:$0xff] }
  0x33   : > { %5433 = vmatprep.subr.bf16.mxu1 %v8440_v54  ;;  %v5446_v9 = vpack.c.bf16 %v1937_v8, %v1936_v7  ;;  %v5452_v15 = vpack.c.bf16 %v1941_v14, %v1940_v13  ;;  %v1942_v16 = vld [vmem:[%s8436_s2 + $0x90] sm:$0xff]  ;;  %v1943_v17 = vld [vmem:[%s8436_s2 + $0x98] sm:$0xff]  ;;  %v738_v53 = vld [vmem:[#allocation2 + $0x1] sm:$0xff] }
  0x34   : > { %5257 = vmatmul.mubr.msk.f32.gmra.mrb[10].mxu0 %vm315_vm5, %v290_v19  ;;  %v5455_v18 = vpack.c.bf16 %v1943_v17, %v1942_v16  ;;  %v1944_v19 = vld [vmem:[%s8436_s2 + $0xa0] sm:$0xff]  ;;  %v1954_v41 = vld [vmem:[%s8436_s2 + $0xf0] sm:$0xff]  ;;  %v1955_v42 = vld [vmem:[%s8436_s2 + $0xf8] sm:$0xff] }
  0x35   : > { %5259 = vmatprep.mubr.msk.f32.mxu0 %vm315_vm5, %v291_v20  ;;  %v1945_v20 = vld [vmem:[%s8436_s2 + $0xa8] sm:$0xff]  ;;  %v5473_v44 = vpack.c.bf16 %v1955_v42, %v1954_v41 }
  0x36   : > { %5435 = vmatpush1.bf16.msra.mxu1 %v5434_v61  ;;  %v739_v52 = vld [vmem:[#allocation2 + $0x9] sm:$0xff] }
  0x37   : > { %5436 = vmatprep.subr.bf16.mxu1 %v8440_v54 }
  0x38   : > { %5260 = vmatmul.mubr.msk.f32.gmra.mrb[12].mxu0 %vm315_vm5, %v292_v21  ;;  %v5458_v21 = vpack.c.bf16 %v1945_v20, %v1944_v19 }
  0x39   : > { %5262 = vmatprep.mubr.msk.f32.mxu0 %vm315_vm5, %v293_v22  ;;  %v1946_v22 = vld [vmem:[%s8436_s2 + $0xb0] sm:$0xff] }
  0x3a   : > { %5438 = vmatpush1.bf16.msra.mxu1 %v5437_v0 }
  0x3b   : > { %5439 = vmatprep.subr.bf16.mxu1 %v8440_v54 }
  0x3c   : > { %5263 = vmatmul.mubr.msk.f32.gmra.mrb[14].mxu0 %vm315_vm5, %v294_v23  ;;  %v1947_v23 = vld [vmem:[%s8436_s2 + $0xb8] sm:$0xff] }
  0x3d   : > { %5265 = vmatprep.mubr.msk.f32.mxu0 %vm315_vm5, %v295_v24  ;;  %v5461_v24 = vpack.c.bf16 %v1947_v23, %v1946_v22 }
  0x3e   : > { %5441 = vmatpush1.bf16.msra.mxu1 %v5440_v3 }
  0x3f   : > { %5442 = vmatprep.subr.bf16.mxu1 %v8440_v54 }
  0x40   : > { %5266 = vmatmul.mubr.msk.f32.gmra.mrb[16].mxu0 %vm315_vm5, %v296_v25  ;;  %v1948_v25 = vld [vmem:[%s8436_s2 + $0xc0] sm:$0xff] }
  0x41   : > { %5268 = vmatprep.mubr.msk.f32.mxu0 %vm315_vm5, %v297_v26  ;;  %v1949_v26 = vld [vmem:[%s8436_s2 + $0xc8] sm:$0xff] }
  0x42   : > { %5444 = vmatpush1.bf16.msra.mxu1 %v5443_v6 }
  0x43   : > { %5445 = vmatprep.subr.bf16.mxu1 %v8440_v54 }
  0x44   : > { %5269 = vmatmul.mubr.msk.f32.gmra.mrb[18].mxu0 %vm315_vm5, %v298_v27  ;;  %v5464_v27 = vpack.c.bf16 %v1949_v26, %v1948_v25 }
  0x45   : > { %5271 = vmatprep.mubr.msk.f32.mxu0 %vm315_vm5, %v299_v28  ;;  %v932_v28 = vld [vmem:[#allocation2 + $0xa] sm:$0xff] }
  0x46   : > { %5447 = vmatpush1.bf16.msra.mxu1 %v5446_v9  ;;  %964 = vst.msk [vmem:[#allocation3 + $0x30] sm:$0xff] %vm223_vm1, %v932_v28 }
  0x47   : > { %5448 = vmatprep.subr.bf16.mxu1 %v8440_v54 }
  0x48   : > { %5272 = vmatmul.mubr.msk.f32.gmra.mrb[20].mxu0 %vm315_vm5, %v300_v29  ;;  %v931_v29 = vld [vmem:[#allocation2 + $0x2] sm:$0xff] }
  0x49   : > { %5274 = vmatprep.mubr.msk.f32.mxu0 %vm315_vm5, %v301_v30  ;;  %v1950_v30 = vld [vmem:[%s8436_s2 + $0xd0] sm:$0xff]  ;;  %963 = vst.msk [vmem:[#allocation3 + $0x8] sm:$0xff] %vm223_vm1, %v931_v29 }
  0x4a   : > { %5450 = vmatpush1.bf16.msra.mxu1 %v5449_v12 }
  0x4b   : > { %5451 = vmatprep.subr.bf16.mxu1 %v8440_v54 }
  0x4c   : > { %5275 = vmatmul.mubr.msk.f32.gmra.mrb[22].mxu0 %vm315_vm5, %v302_v31  ;;  %v1951_v31 = vld [vmem:[%s8436_s2 + $0xd8] sm:$0xff] }
  0x4d   : > { %5277 = vmatprep.mubr.msk.f32.mxu0 %vm315_vm5, %v303_v32  ;;  %v5467_v32 = vpack.c.bf16 %v1951_v31, %v1950_v30 }
  0x4e   : > { %5453 = vmatpush1.bf16.msra.mxu1 %v5452_v15 }
  0x4f   : > { %5454 = vmatprep.subr.bf16.mxu1 %v8440_v54 }
  0x50   : > { %5278 = vmatmul.mubr.msk.f32.gmra.mrb[24].mxu0 %vm315_vm5, %v304_v33  ;;  %v675_v33 = vld [vmem:[#allocation2 + $0x8] sm:$0xff] }
  0x51   : > { %5280 = vmatprep.mubr.msk.f32.mxu0 %vm315_vm5, %v305_v34  ;;  %707 = vst.msk [vmem:[#allocation3 + $0x28] sm:$0xff] %vm223_vm1, %v675_v33  ;;  %v674_v34 = vld [vmem:[#allocation2] sm:$0xff] }
  0x52   : > { %5456 = vmatpush1.bf16.msra.mxu1 %v5455_v18  ;;  %706 = vst.msk [vmem:[#allocation3] sm:$0xff] %vm223_vm1, %v674_v34 }
  0x53   : > { %5457 = vmatprep.subr.bf16.mxu1 %v8440_v54 }
  0x54   : > { %5281 = vmatmul.mubr.msk.f32.gmra.mrb[26].mxu0 %vm315_vm5, %v306_v35  ;;  %v1952_v35 = vld [vmem:[%s8436_s2 + $0xe0] sm:$0xff] }
  0x55   : > { %5283 = vmatprep.mubr.msk.f32.mxu0 %vm315_vm5, %v307_v36  ;;  %v1953_v36 = vld [vmem:[%s8436_s2 + $0xe8] sm:$0xff] }
  0x56   : > { %5459 = vmatpush1.bf16.msra.mxu1 %v5458_v21 }
  0x57   : > { %5460 = vmatprep.subr.bf16.mxu1 %v8440_v54 }
  0x58   : > { %5284 = vmatmul.mubr.msk.f32.gmra.mrb[28].mxu0 %vm315_vm5, %v308_v37 }
  0x59   : > { %5286 = vmatprep.mubr.msk.f32.mxu0 %vm315_vm5, %v309_v38  ;;  %v5470_v38 = vpack.c.bf16 %v1953_v36, %v1952_v35 }
  0x5a   : > { %5462 = vmatpush1.bf16.msra.mxu1 %v5461_v24 }
  0x5b   : > { %5463 = vmatprep.subr.bf16.mxu1 %v8440_v54 }
  0x5c   : > { %5287 = vmatmul.mubr.msk.f32.gmra.mrb[30].mxu0 %vm315_vm5, %v310_v39 }
  0x5e   : > { %5465 = vmatpush1.bf16.msra.mxu1 %v5464_v27 }
  0x5f   : > { %5466 = vmatprep.subr.bf16.mxu1 %v8440_v54 }
  0x62   : > { %5468 = vmatpush1.bf16.msra.mxu1 %v5467_v32 }
  0x63   : > { %5469 = vmatprep.subr.bf16.mxu1 %v8440_v54 }
  0x66   : > { %5471 = vmatpush1.bf16.msra.mxu1 %v5470_v38 }
  0x67   : > { %5472 = vmatprep.subr.bf16.mxu1 %v8440_v54 }
  0x6a   : > { %5474 = vmatpush1.bf16.msra.mxu1 %v5473_v44 }
  0x6b   : > { %5475 = vmatprep.subr.bf16.mxu1 %v8440_v54 }
  0xf3   : > { %v5243_v37 = vpop.f32.mrb[0].mxu0 }
  0xf4   : > { %643 = vst.msk [vmem:[#allocation2 + $0x21] sm:$0xff] %vm223_vm1, %v5243_v37  ;;  %v482_v39 = vpop.f32.mrb[1].mxu0 }
  0xf5   : > { %642 = vst.msk [vmem:[#allocation2 + $0x19] sm:$0xff] %vm223_vm1, %v482_v39 }
  0xf7   : > { %v5246_v40 = vpop.f32.mrb[2].mxu0 }
  0xf8   : > { %645 = vst.msk [vmem:[#allocation2 + $0x39] sm:$0xff] %vm223_vm1, %v5246_v40  ;;  %v492_v43 = vpop.f32.mrb[3].mxu0 }
  0xf9   : > { %644 = vst.msk [vmem:[#allocation2 + $0x31] sm:$0xff] %vm223_vm1, %v492_v43 }
  0xfb   : > { %v5249_v45 = vpop.f32.mrb[4].mxu0  ;;  %v6311_v46 = vld [vmem:[#allocation2 + $0x22] sm:$0xff] }
  0xfc   : > { %v1188_v47 = vld [vmem:[#allocation2 + $0x21] sm:$0xff]  ;;  %v995_v49 = vld [vmem:[#allocation2 + $0x18] sm:$0xff]  ;;  %647 = vst.msk [vmem:[#allocation2 + $0x51] sm:$0xff] %vm223_vm1, %v5249_v45  ;;  %v502_v50 = vpop.f32.mrb[5].mxu0  ;;  %966 = vst.msk [vmem:[#allocation3 + $0x80] sm:$0xff] %vm223_vm1, %v6311_v46 }
  0xfd   : > { %v996_v48 = vld [vmem:[#allocation2 + $0x20] sm:$0xff]  ;;  %1220 = vst.msk [vmem:[#allocation3 + $0x38] sm:$0xff] %vm223_vm1, %v1188_v47  ;;  %1059 = vrot.lane.b32.xlu0 %v995_v49, %s5927_s23  ;;  %646 = vst.msk [vmem:[#allocation2 + $0x49] sm:$0xff] %vm223_vm1, %v502_v50 }
  0xfe   : > { %1061 = vrot.lane.b32.xlu1 %v996_v48, %s5927_s23  ;;  %708 = vst.msk [vmem:[#allocation3 + $0x50] sm:$0xff] %vm223_vm1, %v995_v49  ;;  %v6321_v51 = vld [vmem:[#allocation2 + $0x1a] sm:$0xff]  ;;  %709 = vst.msk [vmem:[#allocation3 + $0x78] sm:$0xff] %vm223_vm1, %v996_v48 }
  0xff   : > { %965 = vst.msk [vmem:[#allocation3 + $0x58] sm:$0xff] %vm223_vm1, %v6321_v51  ;;  %v1187_v55 = vld [vmem:[#allocation2 + $0x19] sm:$0xff]  ;;  %v5252_v57 = vpop.f32.mrb[6].mxu0  ;;  %v741_v12 = vld [vmem:[#allocation2 + $0x21] sm:$0xff] }
 0x100   : > { %v6326_v56 = vld [vmem:[#allocation2 + $0x3a] sm:$0xff]  ;;  %1219 = vst.msk [vmem:[#allocation3 + $0x10] sm:$0xff] %vm223_vm1, %v1187_v55  ;;  %v6331_v59 = vld [vmem:[#allocation2 + $0x32] sm:$0xff]  ;;  %649 = vst.msk [vmem:[#allocation2 + $0x69] sm:$0xff] %vm223_vm1, %v5252_v57  ;;  %v512_v62 = vpop.f32.mrb[7].mxu0 }
 0x101   : > { %v1190_v58 = vld [vmem:[#allocation2 + $0x39] sm:$0xff]  ;;  %1733 = vst.msk [vmem:[#allocation3 + $0x48] sm:$0xff] %vm223_vm1, %v6326_v56  ;;  %v997_v60 = vld [vmem:[#allocation2 + $0x30] sm:$0xff]  ;;  %968 = vst.msk [vmem:[#allocation3 + $0xd0] sm:$0xff] %vm223_vm1, %v6326_v56  ;;  %802 = vrot.lane.b32.xlu0 %v738_v53, %s5927_s23 }
 0x102   : > { %v998_v61 = vld [vmem:[#allocation2 + $0x38] sm:$0xff]  ;;  %1222 = vst.msk [vmem:[#allocation3 + $0x88] sm:$0xff] %vm223_vm1, %v1190_v58  ;;  %1732 = vst.msk [vmem:[#allocation3 + $0x20] sm:$0xff] %vm223_vm1, %v6331_v59  ;;  %804 = vrot.lane.b32.xlu1 %v739_v52, %s5927_s23  ;;  %v1444_v63 = vld [vmem:[#allocation2 + $0x30] sm:$0xff] }
 0x103   : > { %648 = vst.msk [vmem:[#allocation2 + $0x61] sm:$0xff] %vm223_vm1, %v512_v62  ;;  %710 = vst.msk [vmem:[#allocation3 + $0xa0] sm:$0xff] %vm223_vm1, %v997_v60  ;;  %v1445_v0 = vld [vmem:[#allocation2 + $0x38] sm:$0xff]  ;;  %v5255_v4 = vpop.f32.mrb[8].mxu0 }
 0x104   : > { %967 = vst.msk [vmem:[#allocation3 + $0xa8] sm:$0xff] %vm223_vm1, %v6331_v59  ;;  %711 = vst.msk [vmem:[#allocation3 + $0xc8] sm:$0xff] %vm223_vm1, %v998_v61  ;;  %v1189_v1 = vld [vmem:[#allocation2 + $0x31] sm:$0xff]  ;;  %v740_v3 = vld [vmem:[#allocation2 + $0x19] sm:$0xff]  ;;  %v522_v8 = vpop.f32.mrb[9].mxu0 }
 0x105   : > { %1476 = vst.msk [vmem:[#allocation3 + $0x18] sm:$0xff] %vm223_vm1, %v1444_v63  ;;  %1477 = vst.msk [vmem:[#allocation3 + $0x40] sm:$0xff] %vm223_vm1, %v1445_v0  ;;  %v1703_v2 = vld [vmem:[#allocation2 + $0x52] sm:$0xff]  ;;  %v6350_v5 = vld [vmem:[#allocation2 + $0x4a] sm:$0xff]  ;;  %1063 = vrot.lane.b32.xlu0 %v997_v60, %s5927_s23 }
 0x106   : > { %1221 = vst.msk [vmem:[#allocation3 + $0x60] sm:$0xff] %vm223_vm1, %v1189_v1  ;;  %1735 = vst.msk [vmem:[#allocation3 + $0x98] sm:$0xff] %vm223_vm1, %v1703_v2  ;;  %v999_v6 = vld [vmem:[#allocation2 + $0x48] sm:$0xff]  ;;  %v6352_v7 = vld [vmem:[#allocation2 + $0x50] sm:$0xff]  ;;  %806 = vrot.lane.b32.xlu1 %v740_v3, %s5927_s23 }
 0x107   : > { %651 = vst.msk [vmem:[#allocation2 + $0x81] sm:$0xff] %vm223_vm1, %v5255_v4  ;;  %970 = vst.msk [vmem:[#allocation3 + $0x120] sm:$0xff] %vm223_vm1, %v1703_v2  ;;  %v1446_v9 = vld [vmem:[#allocation2 + $0x48] sm:$0xff]  ;;  %v1447_v10 = vld [vmem:[#allocation2 + $0x50] sm:$0xff]  ;;  %v5258_v15 = vpop.f32.mrb[10].mxu0 }
 0x108   : > { %1734 = vst.msk [vmem:[#allocation3 + $0x70] sm:$0xff] %vm223_vm1, %v6350_v5  ;;  %650 = vst.msk [vmem:[#allocation2 + $0x79] sm:$0xff] %vm223_vm1, %v522_v8  ;;  %v1191_v11 = vld [vmem:[#allocation2 + $0x49] sm:$0xff]  ;;  %v1773_v14 = vld [vmem:[#allocation3 + $0x48] sm:$0xff]  ;;  %v532_v19 = vpop.f32.mrb[11].mxu0 }
 0x109   : > { %712 = vst.msk [vmem:[#allocation3 + $0xf0] sm:$0xff] %vm223_vm1, %v999_v6  ;;  %969 = vst.msk [vmem:[#allocation3 + $0xf8] sm:$0xff] %vm223_vm1, %v6350_v5  ;;  %v1705_v13 = vld [vmem:[#allocation2 + $0x6a] sm:$0xff]  ;;  %1065 = vrot.lane.b32.xlu0 %v998_v61, %s5927_s23  ;;  %v6415_v34 = vld [vmem:[#allocation2 + $0x39] sm:$0xff] }
 0x10a   : > { %713 = vst.msk [vmem:[#allocation3 + $0x118] sm:$0xff] %vm223_vm1, %v6352_v7  ;;  %1478 = vst.msk [vmem:[#allocation3 + $0x68] sm:$0xff] %vm223_vm1, %v1446_v9  ;;  %v6370_v16 = vld [vmem:[#allocation2 + $0x62] sm:$0xff]  ;;  %v1768_v17 = vld [vmem:[#allocation3 + $0x20] sm:$0xff]  ;;  %808 = vrot.lane.b32.xlu1 %v741_v12, %s5927_s23 }
 0x10b   : > { %1479 = vst.msk [vmem:[#allocation3 + $0x90] sm:$0xff] %vm223_vm1, %v1447_v10  ;;  %1223 = vst.msk [vmem:[#allocation3 + $0xb0] sm:$0xff] %vm223_vm1, %v1191_v11  ;;  %v6372_v18 = vld [vmem:[#allocation2 + $0x60] sm:$0xff]  ;;  %v6380_v20 = vld [vmem:[#allocation2 + $0x68] sm:$0xff]  ;;  %5305 = vmatprep.mubr.msk.f32.mxu0 %vm223_vm1, %v1768_v17  ;;  %v5261_v27 = vpop.f32.mrb[12].mxu0 }
 0x10c   : > { %1737 = vst.msk [vmem:[#allocation3 + $0xe8] sm:$0xff] %vm223_vm1, %v1705_v13  ;;  %653 = vst.msk [vmem:[#allocation2 + $0x99] sm:$0xff] %vm223_vm1, %v5258_v15  ;;  %v1448_v21 = vld [vmem:[#allocation2 + $0x60] sm:$0xff]  ;;  %v1192_v22 = vld [vmem:[#allocation2 + $0x51] sm:$0xff]  ;;  %5306 = vmatmul.mubr.msk.f32.vlgmr.msra.gmra.mrb[32].mxu0 %vm223_vm1, %v1773_v14  ;;  %v542_v31 = vpop.f32.mrb[13].mxu0 }
 0x10d   : > { %972 = vst.msk [vmem:[#allocation3 + $0x170] sm:$0xff] %vm223_vm1, %v1705_v13  ;;  %1736 = vst.msk [vmem:[#allocation3 + $0xc0] sm:$0xff] %vm223_vm1, %v6370_v16  ;;  %v1449_v23 = vld [vmem:[#allocation2 + $0x68] sm:$0xff]  ;;  %v6390_v24 = vld [vmem:[#allocation2 + $0x31] sm:$0xff]  ;;  %1067 = vrot.lane.b32.xlu0 %v999_v6, %s5927_s23 }
 0x10e   : > { %652 = vst.msk [vmem:[#allocation2 + $0x91] sm:$0xff] %vm223_vm1, %v532_v19  ;;  %714 = vst.msk [vmem:[#allocation3 + $0x140] sm:$0xff] %vm223_vm1, %v6372_v18  ;;  %v1707_v25 = vld [vmem:[#allocation2 + $0x82] sm:$0xff]  ;;  %810 = vrot.lane.b32.xlu1 %v6390_v24, %s5927_s23  ;;  %v6468_v62 = vld [vmem:[#allocation2 + $0x51] sm:$0xff] }
 0x10f   : > { %971 = vst.msk [vmem:[#allocation3 + $0x148] sm:$0xff] %vm223_vm1, %v6370_v16  ;;  %715 = vst.msk [vmem:[#allocation3 + $0x168] sm:$0xff] %vm223_vm1, %v6380_v20  ;;  %v1783_v26 = vld [vmem:[#allocation3 + $0x98] sm:$0xff]  ;;  %v1706_v28 = vld [vmem:[#allocation2 + $0x7a] sm:$0xff]  ;;  %v5264_v37 = vpop.f32.mrb[14].mxu0 }
 0x110   : > { %1480 = vst.msk [vmem:[#allocation3 + $0xb8] sm:$0xff] %vm223_vm1, %v1448_v21  ;;  %1224 = vst.msk [vmem:[#allocation3 + $0xd8] sm:$0xff] %vm223_vm1, %v1192_v22  ;;  %v1778_v29 = vld [vmem:[#allocation3 + $0x70] sm:$0xff]  ;;  %v6397_v30 = vld [vmem:[#allocation2 + $0x78] sm:$0xff]  ;;  %v552_v41 = vpop.f32.mrb[15].mxu0 }
 0x111   : > { %1481 = vst.msk [vmem:[#allocation3 + $0xe0] sm:$0xff] %vm223_vm1, %v1449_v23  ;;  %1739 = vst.msk [vmem:[#allocation3 + $0x138] sm:$0xff] %vm223_vm1, %v1707_v25  ;;  %v6404_v32 = vld [vmem:[#allocation2 + $0x80] sm:$0xff]  ;;  %5308 = vmatprep.mubr.msk.f32.mxu0 %vm223_vm1, %v1778_v29  ;;  %1069 = vrot.lane.b32.xlu0 %v6352_v7, %s5927_s23  ;;  %v1450_v45 = vld [vmem:[#allocation2 + $0x78] sm:$0xff] }
 0x112   : > { %655 = vst.msk [vmem:[#allocation2 + $0xb1] sm:$0xff] %vm223_vm1, %v5261_v27  ;;  %1738 = vst.msk [vmem:[#allocation3 + $0x110] sm:$0xff] %vm223_vm1, %v1706_v28  ;;  %v6413_v33 = vld [vmem:[#allocation2 + $0x82] sm:$0xff]  ;;  %5309 = vmatmul.mubr.msk.f32.gmra.mrb[34].mxu0 %vm223_vm1, %v1783_v26  ;;  %812 = vrot.lane.b32.xlu1 %v6415_v34, %s5927_s23 }
 0x113   : > { %654 = vst.msk [vmem:[#allocation2 + $0xa9] sm:$0xff] %vm223_vm1, %v542_v31  ;;  %716 = vst.msk [vmem:[#allocation3 + $0x190] sm:$0xff] %vm223_vm1, %v6397_v30  ;;  %v1709_v35 = vld [vmem:[#allocation2 + $0x9a] sm:$0xff]  ;;  %v6442_v47 = vld [vmem:[#allocation2 + $0x49] sm:$0xff]  ;;  %v5267_v50 = vpop.f32.mrb[16].mxu0 }
 0x114   : > { %973 = vst.msk [vmem:[#allocation3 + $0x198] sm:$0xff] %vm223_vm1, %v1706_v28  ;;  %717 = vst.msk [vmem:[#allocation3 + $0x1b8] sm:$0xff] %vm223_vm1, %v6404_v32  ;;  %v1793_v36 = vld [vmem:[#allocation3 + $0xe8] sm:$0xff]  ;;  %v1788_v39 = vld [vmem:[#allocation3 + $0xc0] sm:$0xff]  ;;  %v562_v57 = vpop.f32.mrb[17].mxu0 }
 0x115   : > { %974 = vst.msk [vmem:[#allocation3 + $0x1c0] sm:$0xff] %vm223_vm1, %v6413_v33  ;;  %1741 = vst.msk [vmem:[#allocation3 + $0x188] sm:$0xff] %vm223_vm1, %v1709_v35  ;;  %v1708_v38 = vld [vmem:[#allocation2 + $0x92] sm:$0xff]  ;;  %v6435_v43 = vld [vmem:[#allocation2 + $0x9a] sm:$0xff]  ;;  %5311 = vmatprep.mubr.msk.f32.mxu0 %vm223_vm1, %v1788_v39  ;;  %1071 = vrot.lane.b32.xlu0 %v6372_v18, %s5927_s23 }
 0x116   : > { %v6421_v40 = vld [vmem:[#allocation2 + $0x90] sm:$0xff]  ;;  %657 = vst.msk [vmem:[#allocation2 + $0xc9] sm:$0xff] %vm223_vm1, %v5264_v37  ;;  %1740 = vst.msk [vmem:[#allocation3 + $0x160] sm:$0xff] %vm223_vm1, %v1708_v38  ;;  %v6429_v42 = vld [vmem:[#allocation2 + $0x98] sm:$0xff]  ;;  %5312 = vmatmul.mubr.msk.f32.gmra.mrb[36].mxu0 %vm223_vm1, %v1793_v36  ;;  %814 = vrot.lane.b32.xlu1 %v6442_v47, %s5927_s23 }
 0x117   : > { %656 = vst.msk [vmem:[#allocation2 + $0xc1] sm:$0xff] %vm223_vm1, %v552_v41  ;;  %718 = vst.msk [vmem:[#allocation3 + $0x1e0] sm:$0xff] %vm223_vm1, %v6421_v40  ;;  %v1193_v44 = vld [vmem:[#allocation2 + $0x61] sm:$0xff]  ;;  %v5270_v0 = vpop.f32.mrb[18].mxu0  ;;  %v6532_v35 = vld [vmem:[#allocation2 + $0x79] sm:$0xff] }
 0x118   : > { %975 = vst.msk [vmem:[#allocation3 + $0x1e8] sm:$0xff] %vm223_vm1, %v1708_v38  ;;  %719 = vst.msk [vmem:[#allocation3 + $0x208] sm:$0xff] %vm223_vm1, %v6429_v42  ;;  %v1803_v49 = vld [vmem:[#allocation3 + $0x138] sm:$0xff]  ;;  %v572_v4 = vpop.f32.mrb[19].mxu0 }
 0x119   : > { %976 = vst.msk [vmem:[#allocation3 + $0x210] sm:$0xff] %vm223_vm1, %v6435_v43  ;;  %v1711_v48 = vld [vmem:[#allocation2 + $0xb2] sm:$0xff]  ;;  %1225 = vst.msk [vmem:[#allocation3 + $0x100] sm:$0xff] %vm223_vm1, %v1193_v44  ;;  %v1798_v53 = vld [vmem:[#allocation3 + $0x110] sm:$0xff]  ;;  %1073 = vrot.lane.b32.xlu0 %v6380_v20, %s5927_s23 }
 0x11a   : > { %1482 = vst.msk [vmem:[#allocation3 + $0x108] sm:$0xff] %vm223_vm1, %v1450_v45  ;;  %1743 = vst.msk [vmem:[#allocation3 + $0x1d8] sm:$0xff] %vm223_vm1, %v1711_v48  ;;  %v1710_v52 = vld [vmem:[#allocation2 + $0xaa] sm:$0xff]  ;;  %5314 = vmatprep.mubr.msk.f32.mxu0 %vm223_vm1, %v1798_v53  ;;  %v6466_v61 = vld [vmem:[#allocation2 + $0xb2] sm:$0xff]  ;;  %816 = vrot.lane.b32.xlu1 %v6468_v62, %s5927_s23 }
 0x11b   : > { %v6448_v55 = vld [vmem:[#allocation2 + $0xa8] sm:$0xff]  ;;  %659 = vst.msk [vmem:[#allocation2 + $0xe1] sm:$0xff] %vm223_vm1, %v5267_v50  ;;  %1742 = vst.msk [vmem:[#allocation3 + $0x1b0] sm:$0xff] %vm223_vm1, %v1710_v52  ;;  %v6456_v58 = vld [vmem:[#allocation2 + $0xb0] sm:$0xff]  ;;  %5315 = vmatmul.mubr.msk.f32.gmra.mrb[38].mxu0 %vm223_vm1, %v1803_v49  ;;  %v5273_v12 = vpop.f32.mrb[20].mxu0 }
 0x11c   : > { %658 = vst.msk [vmem:[#allocation2 + $0xd9] sm:$0xff] %vm223_vm1, %v562_v57  ;;  %720 = vst.msk [vmem:[#allocation3 + $0x230] sm:$0xff] %vm223_vm1, %v6448_v55  ;;  %v6462_v60 = vld [vmem:[#allocation2 + $0xaa] sm:$0xff]  ;;  %v1813_v3 = vld [vmem:[#allocation3 + $0x188] sm:$0xff]  ;;  %v582_v17 = vpop.f32.mrb[21].mxu0 }
 0x11d   : > { %721 = vst.msk [vmem:[#allocation3 + $0x258] sm:$0xff] %vm223_vm1, %v6456_v58  ;;  %v1713_v63 = vld [vmem:[#allocation2 + $0xca] sm:$0xff]  ;;  %977 = vst.msk [vmem:[#allocation3 + $0x238] sm:$0xff] %vm223_vm1, %v6462_v60  ;;  %v6490_v10 = vld [vmem:[#allocation2 + $0x61] sm:$0xff]  ;;  %1075 = vrot.lane.b32.xlu0 %v6397_v30, %s5927_s23 }
 0x11e   : > { %978 = vst.msk [vmem:[#allocation3 + $0x260] sm:$0xff] %vm223_vm1, %v6466_v61  ;;  %1745 = vst.msk [vmem:[#allocation3 + $0x228] sm:$0xff] %vm223_vm1, %v1713_v63  ;;  %v1712_v1 = vld [vmem:[#allocation2 + $0xc2] sm:$0xff]  ;;  %v1808_v2 = vld [vmem:[#allocation3 + $0x160] sm:$0xff]  ;;  %818 = vrot.lane.b32.xlu1 %v6490_v10, %s5927_s23 }
 0x11f   : > { %661 = vst.msk [vmem:[#allocation2 + $0xf9] sm:$0xff] %vm223_vm1, %v5270_v0  ;;  %1744 = vst.msk [vmem:[#allocation3 + $0x200] sm:$0xff] %vm223_vm1, %v1712_v1  ;;  %v690_v6 = vld [vmem:[#allocation2 + $0xc0] sm:$0xff]  ;;  %5317 = vmatprep.mubr.msk.f32.mxu0 %vm223_vm1, %v1808_v2  ;;  %v691_v8 = vld [vmem:[#allocation2 + $0xc8] sm:$0xff]  ;;  %v5276_v22 = vpop.f32.mrb[22].mxu0 }
 0x120   : > { %660 = vst.msk [vmem:[#allocation2 + $0xf1] sm:$0xff] %vm223_vm1, %v572_v4  ;;  %722 = vst.msk [vmem:[#allocation3 + $0x280] sm:$0xff] %vm223_vm1, %v690_v6  ;;  %v6485_v7 = vld [vmem:[#allocation2 + $0xc2] sm:$0xff]  ;;  %v6487_v9 = vld [vmem:[#allocation2 + $0xca] sm:$0xff]  ;;  %5318 = vmatmul.mubr.msk.f32.gmra.mrb[40].mxu0 %vm223_vm1, %v1813_v3  ;;  %v592_v27 = vpop.f32.mrb[23].mxu0 }
 0x121   : > { %1488 = vst.msk [vmem:[#allocation3 + $0x1f8] sm:$0xff] %vm223_vm1, %v690_v6  ;;  %979 = vst.msk [vmem:[#allocation3 + $0x288] sm:$0xff] %vm223_vm1, %v6485_v7  ;;  %v1823_v15 = vld [vmem:[#allocation3 + $0x1d8] sm:$0xff]  ;;  %1077 = vrot.lane.b32.xlu0 %v6404_v32, %s5927_s23  ;;  %v6574_v3 = vld [vmem:[#allocation2 + $0x91] sm:$0xff] }
 0x122   : > { %v1715_v11 = vld [vmem:[#allocation2 + $0xe2] sm:$0xff]  ;;  %723 = vst.msk [vmem:[#allocation3 + $0x2a8] sm:$0xff] %vm223_vm1, %v691_v8  ;;  %980 = vst.msk [vmem:[#allocation3 + $0x2b0] sm:$0xff] %vm223_vm1, %v6487_v9 }
 0x123   : > { %1489 = vst.msk [vmem:[#allocation3 + $0x220] sm:$0xff] %vm223_vm1, %v691_v8  ;;  %1747 = vst.msk [vmem:[#allocation3 + $0x278] sm:$0xff] %vm223_vm1, %v1715_v11  ;;  %v1714_v13 = vld [vmem:[#allocation2 + $0xda] sm:$0xff]  ;;  %v6510_v20 = vld [vmem:[#allocation2 + $0x69] sm:$0xff]  ;;  %v5279_v36 = vpop.f32.mrb[24].mxu0 }
 0x124   : > { %v1818_v14 = vld [vmem:[#allocation3 + $0x1b0] sm:$0xff]  ;;  %663 = vst.msk [vmem:[#allocation2 + $0x111] sm:$0xff] %vm223_vm1, %v5273_v12  ;;  %1746 = vst.msk [vmem:[#allocation3 + $0x250] sm:$0xff] %vm223_vm1, %v1714_v13  ;;  %v692_v18 = vld [vmem:[#allocation2 + $0xd8] sm:$0xff]  ;;  %820 = vrot.lane.b32.xlu1 %v6510_v20, %s5927_s23  ;;  %v602_v41 = vpop.f32.mrb[25].mxu0 }
 0x125   : > { %662 = vst.msk [vmem:[#allocation2 + $0x109] sm:$0xff] %vm223_vm1, %v582_v17  ;;  %5320 = vmatprep.mubr.msk.f32.mxu0 %vm223_vm1, %v1818_v14  ;;  %v6508_v19 = vld [vmem:[#allocation2 + $0xda] sm:$0xff]  ;;  %724 = vst.msk [vmem:[#allocation3 + $0x2d0] sm:$0xff] %vm223_vm1, %v692_v18  ;;  %v6527_v29 = vld [vmem:[#allocation2 + $0xe2] sm:$0xff]  ;;  %1079 = vrot.lane.b32.xlu0 %v6421_v40, %s5927_s23 }
 0x126   : > { %5321 = vmatmul.mubr.msk.f32.gmra.mrb[42].mxu0 %vm223_vm1, %v1823_v15  ;;  %v1717_v21 = vld [vmem:[#allocation2 + $0xfa] sm:$0xff]  ;;  %981 = vst.msk [vmem:[#allocation3 + $0x2d8] sm:$0xff] %vm223_vm1, %v6508_v19  ;;  %1490 = vst.msk [vmem:[#allocation3 + $0x248] sm:$0xff] %vm223_vm1, %v692_v18  ;;  %v1828_v25 = vld [vmem:[#allocation3 + $0x200] sm:$0xff] }
 0x127   : > { %1749 = vst.msk [vmem:[#allocation3 + $0x2c8] sm:$0xff] %vm223_vm1, %v1717_v21  ;;  %v1716_v23 = vld [vmem:[#allocation2 + $0xf2] sm:$0xff]  ;;  %665 = vst.msk [vmem:[#allocation2 + $0x129] sm:$0xff] %vm223_vm1, %v5276_v22  ;;  %v693_v28 = vld [vmem:[#allocation2 + $0xe0] sm:$0xff]  ;;  %5323 = vmatprep.mubr.msk.f32.mxu0 %vm223_vm1, %v1828_v25  ;;  %v5282_v50 = vpop.f32.mrb[26].mxu0 }
 0x128   : > { %v1833_v26 = vld [vmem:[#allocation3 + $0x228] sm:$0xff]  ;;  %1748 = vst.msk [vmem:[#allocation3 + $0x2a0] sm:$0xff] %vm223_vm1, %v1716_v23  ;;  %664 = vst.msk [vmem:[#allocation2 + $0x121] sm:$0xff] %vm223_vm1, %v592_v27  ;;  %v694_v30 = vld [vmem:[#allocation2 + $0xf0] sm:$0xff]  ;;  %822 = vrot.lane.b32.xlu1 %v6532_v35, %s5927_s23  ;;  %v612_v57 = vpop.f32.mrb[27].mxu0 }
 0x129   : > { %725 = vst.msk [vmem:[#allocation3 + $0x2f8] sm:$0xff] %vm223_vm1, %v693_v28  ;;  %v6529_v31 = vld [vmem:[#allocation2 + $0xf2] sm:$0xff]  ;;  %1491 = vst.msk [vmem:[#allocation3 + $0x270] sm:$0xff] %vm223_vm1, %v693_v28  ;;  %v6550_v45 = vld [vmem:[#allocation2 + $0xfa] sm:$0xff]  ;;  %1081 = vrot.lane.b32.xlu0 %v6429_v42, %s5927_s23 }
 0x12a   : > { %5324 = vmatmul.mubr.msk.f32.gmra.mrb[44].mxu0 %vm223_vm1, %v1833_v26  ;;  %982 = vst.msk [vmem:[#allocation3 + $0x300] sm:$0xff] %vm223_vm1, %v6527_v29  ;;  %726 = vst.msk [vmem:[#allocation3 + $0x320] sm:$0xff] %vm223_vm1, %v694_v30  ;;  %v1843_v39 = vld [vmem:[#allocation3 + $0x278] sm:$0xff]  ;;  %v695_v44 = vld [vmem:[#allocation2 + $0xf8] sm:$0xff] }
 0x12b   : > { %v1719_v32 = vld [vmem:[#allocation2 + $0x112] sm:$0xff]  ;;  %983 = vst.msk [vmem:[#allocation3 + $0x328] sm:$0xff] %vm223_vm1, %v6529_v31  ;;  %1492 = vst.msk [vmem:[#allocation3 + $0x298] sm:$0xff] %vm223_vm1, %v694_v30  ;;  %v1838_v38 = vld [vmem:[#allocation3 + $0x250] sm:$0xff]  ;;  %v5285_v4 = vpop.f32.mrb[28].mxu0 }
 0x12c   : > { %1751 = vst.msk [vmem:[#allocation3 + $0x318] sm:$0xff] %vm223_vm1, %v1719_v32  ;;  %v1718_v37 = vld [vmem:[#allocation2 + $0x10a] sm:$0xff]  ;;  %667 = vst.msk [vmem:[#allocation2 + $0x141] sm:$0xff] %vm223_vm1, %v5279_v36  ;;  %5326 = vmatprep.mubr.msk.f32.mxu0 %vm223_vm1, %v1838_v38  ;;  %v6552_v48 = vld [vmem:[#allocation2 + $0x81] sm:$0xff]  ;;  %v622_v12 = vpop.f32.mrb[29].mxu0 }
 0x12d   : > { %1750 = vst.msk [vmem:[#allocation3 + $0x2f0] sm:$0xff] %vm223_vm1, %v1718_v37  ;;  %666 = vst.msk [vmem:[#allocation2 + $0x139] sm:$0xff] %vm223_vm1, %v602_v41  ;;  %824 = vrot.lane.b32.xlu1 %v6552_v48, %s5927_s23  ;;  %v696_v63 = vld [vmem:[#allocation2 + $0x108] sm:$0xff]  ;;  %v6571_v1 = vld [vmem:[#allocation2 + $0x111] sm:$0xff]  ;;  %1083 = vrot.lane.b32.xlu0 %v6448_v55, %s5927_s23 }
 0x12e   : > { %5327 = vmatmul.mubr.msk.f32.gmra.mrb[46].mxu0 %vm223_vm1, %v1843_v39  ;;  %v1721_v49 = vld [vmem:[#allocation2 + $0x12a] sm:$0xff]  ;;  %727 = vst.msk [vmem:[#allocation3 + $0x348] sm:$0xff] %vm223_vm1, %v695_v44  ;;  %984 = vst.msk [vmem:[#allocation3 + $0x350] sm:$0xff] %vm223_vm1, %v6550_v45  ;;  %v1853_v53 = vld [vmem:[#allocation3 + $0x2c8] sm:$0xff] }
 0x12f   : > { %1493 = vst.msk [vmem:[#allocation3 + $0x2c0] sm:$0xff] %vm223_vm1, %v695_v44  ;;  %1753 = vst.msk [vmem:[#allocation3 + $0x368] sm:$0xff] %vm223_vm1, %v1721_v49  ;;  %v1720_v40 = vld [vmem:[#allocation2 + $0x122] sm:$0xff]  ;;  %v1848_v52 = vld [vmem:[#allocation3 + $0x2a0] sm:$0xff]  ;;  %v5288_v18 = vpop.f32.mrb[30].mxu0 }
 0x130   : > { %669 = vst.msk [vmem:[#allocation2 + $0x159] sm:$0xff] %vm223_vm1, %v5282_v50  ;;  %1752 = vst.msk [vmem:[#allocation3 + $0x340] sm:$0xff] %vm223_vm1, %v1720_v40  ;;  %5329 = vmatprep.mubr.msk.f32.mxu0 %vm223_vm1, %v1848_v52  ;;  %v6569_v0 = vld [vmem:[#allocation2 + $0x10a] sm:$0xff]  ;;  %v6592_v13 = vld [vmem:[#allocation2 + $0x112] sm:$0xff]  ;;  %v632_v23 = vpop.f32.mrb[31].mxu0 }
 0x131   : > { %668 = vst.msk [vmem:[#allocation2 + $0x151] sm:$0xff] %vm223_vm1, %v612_v57  ;;  %728 = vst.msk [vmem:[#allocation3 + $0x370] sm:$0xff] %vm223_vm1, %v696_v63  ;;  %v697_v2 = vld [vmem:[#allocation2 + $0x110] sm:$0xff]  ;;  %826 = vrot.lane.b32.xlu1 %v6574_v3, %s5927_s23  ;;  %v6594_v14 = vld [vmem:[#allocation2 + $0x121] sm:$0xff]  ;;  %1085 = vrot.lane.b32.xlu0 %v6456_v58, %s5927_s23 }
 0x132   : > { %1494 = vst.msk [vmem:[#allocation3 + $0x2e8] sm:$0xff] %vm223_vm1, %v696_v63  ;;  %5330 = vmatmul.mubr.msk.f32.gmra.mrb[48].mxu0 %vm223_vm1, %v1853_v53  ;;  %985 = vst.msk [vmem:[#allocation3 + $0x378] sm:$0xff] %vm223_vm1, %v6569_v0  ;;  %v6596_v15 = vld [vmem:[#allocation2 + $0x99] sm:$0xff]  ;;  %v6613_v27 = vld [vmem:[#allocation2 + $0x122] sm:$0xff] }
 0x133   : > { %v1723_v42 = vld [vmem:[#allocation2 + $0x142] sm:$0xff]  ;;  %729 = vst.msk [vmem:[#allocation3 + $0x398] sm:$0xff] %vm223_vm1, %v697_v2  ;;  %1495 = vst.msk [vmem:[#allocation3 + $0x310] sm:$0xff] %vm223_vm1, %v697_v2  ;;  %v6632_v39 = vld [vmem:[#allocation2 + $0xb1] sm:$0xff] }
 0x134   : > { %1240 = vst.msk [vmem:[#allocation3 + $0x358] sm:$0xff] %vm223_vm1, %v6571_v1  ;;  %1755 = vst.msk [vmem:[#allocation3 + $0x3b8] sm:$0xff] %vm223_vm1, %v1723_v42  ;;  %v1722_v6 = vld [vmem:[#allocation2 + $0x13a] sm:$0xff]  ;;  %v1863_v11 = vld [vmem:[#allocation3 + $0x318] sm:$0xff] }
 0x135   : > { %v1858_v8 = vld [vmem:[#allocation3 + $0x2f0] sm:$0xff]  ;;  %671 = vst.msk [vmem:[#allocation2 + $0x171] sm:$0xff] %vm223_vm1, %v5285_v4  ;;  %1754 = vst.msk [vmem:[#allocation3 + $0x390] sm:$0xff] %vm223_vm1, %v1722_v6  ;;  %828 = vrot.lane.b32.xlu1 %v6596_v15, %s5927_s23  ;;  %v6615_v28 = vld [vmem:[#allocation2 + $0x129] sm:$0xff] }
 0x136   : > { %670 = vst.msk [vmem:[#allocation2 + $0x169] sm:$0xff] %vm223_vm1, %v622_v12  ;;  %5332 = vmatprep.mubr.msk.f32.mxu0 %vm223_vm1, %v1858_v8  ;;  %986 = vst.msk [vmem:[#allocation3 + $0x3a0] sm:$0xff] %vm223_vm1, %v6592_v13  ;;  %v1873_v22 = vld [vmem:[#allocation3 + $0x368] sm:$0xff]  ;;  %v1009_v25 = vld [vmem:[#allocation2 + $0xc0] sm:$0xff] }
 0x137   : > { %5333 = vmatmul.mubr.msk.f32.gmra.mrb[50].mxu0 %vm223_vm1, %v1863_v11  ;;  %v1725_v17 = vld [vmem:[#allocation2 + $0x15a] sm:$0xff]  ;;  %1241 = vst.msk [vmem:[#allocation3 + $0x380] sm:$0xff] %vm223_vm1, %v6594_v14  ;;  %v1868_v21 = vld [vmem:[#allocation3 + $0x340] sm:$0xff]  ;;  %673 = vst.msk [vmem:[#allocation2 + $0x189] sm:$0xff] %vm223_vm1, %v5288_v18  ;;  %1087 = vrot.lane.b32.xlu0 %v1009_v25, %s5927_s23 }
 0x138   : > { %1757 = vst.msk [vmem:[#allocation3 + $0x408] sm:$0xff] %vm223_vm1, %v1725_v17  ;;  %v1724_v55 = vld [vmem:[#allocation2 + $0x152] sm:$0xff]  ;;  %672 = vst.msk [vmem:[#allocation2 + $0x181] sm:$0xff] %vm223_vm1, %v632_v23  ;;  %v698_v26 = vld [vmem:[#allocation2 + $0x120] sm:$0xff]  ;;  %5335 = vmatprep.mubr.msk.f32.mxu0 %vm223_vm1, %v1868_v21 }
 0x139   : > { %1756 = vst.msk [vmem:[#allocation3 + $0x3e0] sm:$0xff] %vm223_vm1, %v1724_v55  ;;  %730 = vst.msk [vmem:[#allocation3 + $0x3c0] sm:$0xff] %vm223_vm1, %v698_v26  ;;  %v699_v30 = vld [vmem:[#allocation2 + $0x128] sm:$0xff]  ;;  %v6637_v44 = vld [vmem:[#allocation2 + $0x139] sm:$0xff] }
 0x13a   : > { %1496 = vst.msk [vmem:[#allocation3 + $0x338] sm:$0xff] %vm223_vm1, %v698_v26  ;;  %v6618_v32 = vld [vmem:[#allocation2 + $0xa9] sm:$0xff]  ;;  %987 = vst.msk [vmem:[#allocation3 + $0x3c8] sm:$0xff] %vm223_vm1, %v6613_v27  ;;  %v700_v40 = vld [vmem:[#allocation2 + $0x138] sm:$0xff] }
 0x13b   : > { %5336 = vmatmul.mubr.msk.f32.gmra.mrb[52].mxu0 %vm223_vm1, %v1873_v22  ;;  %731 = vst.msk [vmem:[#allocation3 + $0x3e8] sm:$0xff] %vm223_vm1, %v699_v30  ;;  %1497 = vst.msk [vmem:[#allocation3 + $0x360] sm:$0xff] %vm223_vm1, %v699_v30  ;;  %v1883_v38 = vld [vmem:[#allocation3 + $0x3b8] sm:$0xff]  ;;  %830 = vrot.lane.b32.xlu1 %v6618_v32, %s5927_s23  ;;  %v1011_v63 = vld [vmem:[#allocation2 + $0xd8] sm:$0xff] }
 0x13c   : > { %v1727_v58 = vld [vmem:[#allocation2 + $0x172] sm:$0xff]  ;;  %1242 = vst.msk [vmem:[#allocation3 + $0x3a8] sm:$0xff] %vm223_vm1, %v6615_v28  ;;  %v1878_v37 = vld [vmem:[#allocation3 + $0x390] sm:$0xff]  ;;  %v6635_v41 = vld [vmem:[#allocation2 + $0x12a] sm:$0xff] }
 0x13d   : > { %1759 = vst.msk [vmem:[#allocation3 + $0x458] sm:$0xff] %vm223_vm1, %v1727_v58  ;;  %v1726_v36 = vld [vmem:[#allocation2 + $0x16a] sm:$0xff]  ;;  %5338 = vmatprep.mubr.msk.f32.mxu0 %vm223_vm1, %v1878_v37  ;;  %988 = vst.msk [vmem:[#allocation3 + $0x3f0] sm:$0xff] %vm223_vm1, %v6635_v41  ;;  %v6651_v2 = vld [vmem:[#allocation2 + $0x13a] sm:$0xff] }
 0x13e   : > { %1758 = vst.msk [vmem:[#allocation3 + $0x430] sm:$0xff] %vm223_vm1, %v1726_v36  ;;  %v1010_v49 = vld [vmem:[#allocation2 + $0xc8] sm:$0xff]  ;;  %1243 = vst.msk [vmem:[#allocation3 + $0x3d0] sm:$0xff] %vm223_vm1, %v6637_v44  ;;  %v701_v4 = vld [vmem:[#allocation2 + $0x140] sm:$0xff] }
 0x13f   : > { %5339 = vmatmul.mubr.msk.f32.gmra.mrb[54].mxu0 %vm223_vm1, %v1883_v38  ;;  %v1729_v50 = vld [vmem:[#allocation2 + $0x18a] sm:$0xff]  ;;  %v1728_v52 = vld [vmem:[#allocation2 + $0x182] sm:$0xff]  ;;  %v1893_v57 = vld [vmem:[#allocation3 + $0x408] sm:$0xff]  ;;  %732 = vst.msk [vmem:[#allocation3 + $0x410] sm:$0xff] %vm223_vm1, %v700_v40  ;;  %832 = vrot.lane.b32.xlu1 %v6632_v39, %s5927_s23 }
 0x140   : > { %1761 = vst.msk [vmem:[#allocation3 + $0x4a8] sm:$0xff] %vm223_vm1, %v1729_v50  ;;  %v1888_v53 = vld [vmem:[#allocation3 + $0x3e0] sm:$0xff]  ;;  %1498 = vst.msk [vmem:[#allocation3 + $0x388] sm:$0xff] %vm223_vm1, %v700_v40  ;;  %1089 = vrot.lane.b32.xlu0 %v1010_v49, %s5927_s23  ;;  %v6653_v42 = vld [vmem:[#allocation2 + $0x141] sm:$0xff] }
 0x141   : > { %1760 = vst.msk [vmem:[#allocation3 + $0x480] sm:$0xff] %vm223_vm1, %v1728_v52  ;;  %5341 = vmatprep.mubr.msk.f32.mxu0 %vm223_vm1, %v1888_v53  ;;  %989 = vst.msk [vmem:[#allocation3 + $0x418] sm:$0xff] %vm223_vm1, %v6651_v2  ;;  %v6658_v6 = vld [vmem:[#allocation2 + $0x142] sm:$0xff]  ;;  %v6660_v8 = vld [vmem:[#allocation2 + $0x151] sm:$0xff] }
 0x142   : > { %1244 = vst.msk [vmem:[#allocation3 + $0x3f8] sm:$0xff] %vm223_vm1, %v6653_v42  ;;  %733 = vst.msk [vmem:[#allocation3 + $0x438] sm:$0xff] %vm223_vm1, %v701_v4  ;;  %v702_v11 = vld [vmem:[#allocation2 + $0x150] sm:$0xff]  ;;  %v6673_v17 = vld [vmem:[#allocation2 + $0xc1] sm:$0xff] }
 0x143   : > { %5342 = vmatmul.mubr.msk.f32.gmra.mrb[56].mxu0 %vm223_vm1, %v1893_v57  ;;  %990 = vst.msk [vmem:[#allocation3 + $0x440] sm:$0xff] %vm223_vm1, %v6658_v6  ;;  %v6668_v12 = vld [vmem:[#allocation2 + $0x152] sm:$0xff]  ;;  %1499 = vst.msk [vmem:[#allocation3 + $0x3b0] sm:$0xff] %vm223_vm1, %v701_v4  ;;  %834 = vrot.lane.b32.xlu1 %v6673_v17, %s5927_s23  ;;  %v6684_v23 = vld [vmem:[#allocation2 + $0x15a] sm:$0xff] }
 0x144   : > { %1245 = vst.msk [vmem:[#allocation3 + $0x420] sm:$0xff] %vm223_vm1, %v6660_v8  ;;  %v1903_v55 = vld [vmem:[#allocation3 + $0x458] sm:$0xff]  ;;  %734 = vst.msk [vmem:[#allocation3 + $0x460] sm:$0xff] %vm223_vm1, %v702_v11  ;;  %1091 = vrot.lane.b32.xlu0 %v1011_v63, %s5927_s23  ;;  %v6682_v21 = vld [vmem:[#allocation2 + $0x159] sm:$0xff] }
 0x145   : > { %v1898_v18 = vld [vmem:[#allocation3 + $0x430] sm:$0xff]  ;;  %991 = vst.msk [vmem:[#allocation3 + $0x468] sm:$0xff] %vm223_vm1, %v6668_v12  ;;  %1500 = vst.msk [vmem:[#allocation3 + $0x3d8] sm:$0xff] %vm223_vm1, %v702_v11  ;;  %v703_v22 = vld [vmem:[#allocation2 + $0x158] sm:$0xff] }
 0x146   : > { %v6686_v25 = vld [vmem:[#allocation2 + $0xc9] sm:$0xff]  ;;  %v1012_v26 = vld [vmem:[#allocation2 + $0xe0] sm:$0xff]  ;;  %5344 = vmatprep.mubr.msk.f32.mxu0 %vm223_vm1, %v1898_v18  ;;  %735 = vst.msk [vmem:[#allocation3 + $0x488] sm:$0xff] %vm223_vm1, %v703_v22  ;;  %992 = vst.msk [vmem:[#allocation3 + $0x490] sm:$0xff] %vm223_vm1, %v6684_v23 }
 0x147   : > { %v6692_v30 = vld [vmem:[#allocation2 + $0x169] sm:$0xff]  ;;  %1501 = vst.msk [vmem:[#allocation3 + $0x400] sm:$0xff] %vm223_vm1, %v703_v22  ;;  %1246 = vst.msk [vmem:[#allocation3 + $0x448] sm:$0xff] %vm223_vm1, %v6682_v21  ;;  %5345 = vmatmul.mubr.msk.f32.gmra.mrb[58].mxu0 %vm223_vm1, %v1903_v55  ;;  %v1913_v37 = vld [vmem:[#allocation3 + $0x4a8] sm:$0xff]  ;;  %836 = vrot.lane.b32.xlu1 %v6686_v25, %s5927_s23 }
 0x148   : > { %v704_v58 = vld [vmem:[#allocation2 + $0x168] sm:$0xff]  ;;  %v6703_v38 = vld [vmem:[#allocation2 + $0x171] sm:$0xff]  ;;  %1247 = vst.msk [vmem:[#allocation3 + $0x470] sm:$0xff] %vm223_vm1, %v6692_v30  ;;  %1093 = vrot.lane.b32.xlu0 %v1012_v26, %s5927_s23  ;;  %v1451_v4 = vld [vmem:[#allocation2 + $0x80] sm:$0xff] }
 0x149   : > { %v6694_v36 = vld [vmem:[#allocation2 + $0x16a] sm:$0xff]  ;;  %736 = vst.msk [vmem:[#allocation3 + $0x4b0] sm:$0xff] %vm223_vm1, %v704_v58  ;;  %1502 = vst.msk [vmem:[#allocation3 + $0x428] sm:$0xff] %vm223_vm1, %v704_v58  ;;  %v6709_v40 = vld [vmem:[#allocation2 + $0x172] sm:$0xff] }
 0x14a   : > { %8454 = vst [vmem:[#allocation7_spill] sm:$0xff] %v6694_v36  ;;  %993 = vst.msk [vmem:[#allocation3 + $0x4b8] sm:$0xff] %vm223_vm1, %v6694_v36  ;;  %v705_v49 = vld [vmem:[#allocation2 + $0x170] sm:$0xff]  ;;  %v6711_v52 = vld [vmem:[#allocation2 + $0x181] sm:$0xff] }
 0x14b   : > { %v1908_v50 = vld [vmem:[#allocation3 + $0x480] sm:$0xff]  ;;  %737 = vst.msk [vmem:[#allocation3 + $0x4d8] sm:$0xff] %vm223_vm1, %v705_v49  ;;  %8455 = vst [vmem:[#allocation8_spill] sm:$0xff] %v6709_v40  ;;  %v1195_v11 = vld [vmem:[#allocation2 + $0x79] sm:$0xff] }
 0x14c   : > { %8456 = vst [vmem:[#allocation9_spill] sm:$0xff] %v6711_v52  ;;  %1503 = vst.msk [vmem:[#allocation3 + $0x450] sm:$0xff] %vm223_vm1, %v705_v49  ;;  %v1013_v53 = vld [vmem:[#allocation2 + $0xf0] sm:$0xff]  ;;  %5347 = vmatprep.mubr.msk.f32.mxu0 %vm223_vm1, %v1908_v50  ;;  %v1196_v55 = vld [vmem:[#allocation2 + $0x81] sm:$0xff] }
 0x14d   : > { %1248 = vst.msk [vmem:[#allocation3 + $0x498] sm:$0xff] %vm223_vm1, %v6703_v38  ;;  %994 = vst.msk [vmem:[#allocation3 + $0x4e0] sm:$0xff] %vm223_vm1, %v6709_v40  ;;  %v6721_v57 = vld [vmem:[#allocation2 + $0x189] sm:$0xff]  ;;  %5348 = vmatmul.mubr.msk.f32.gmra.mrb[60].mxu0 %vm223_vm1, %v1913_v37  ;;  %v1453_v22 = vld [vmem:[#allocation2 + $0x98] sm:$0xff]  ;;  %1095 = vrot.lane.b32.xlu0 %v1013_v53, %s5927_s23 }
 0x14e   : > { %8457 = vst [vmem:[#allocation10_spill] sm:$0xff] %v6721_v57  ;;  %1249 = vst.msk [vmem:[#allocation3 + $0x4c0] sm:$0xff] %vm223_vm1, %v6711_v52  ;;  %v1194_v63 = vld [vmem:[#allocation2 + $0x69] sm:$0xff]  ;;  %v6732_v26 = vld [vmem:[#allocation2 + $0xd9] sm:$0xff] }
 0x14f   : > { %1250 = vst.msk [vmem:[#allocation3 + $0x4e8] sm:$0xff] %vm223_vm1, %v6721_v57  ;;  %1226 = vst.msk [vmem:[#allocation3 + $0x128] sm:$0xff] %vm223_vm1, %v1194_v63  ;;  %v1452_v18 = vld [vmem:[#allocation2 + $0x90] sm:$0xff]  ;;  %838 = vrot.lane.b32.xlu1 %v6732_v26, %s5927_s23  ;;  %v1454_v37 = vld [vmem:[#allocation2 + $0xa8] sm:$0xff] }
 0x150   : > { %1483 = vst.msk [vmem:[#allocation3 + $0x130] sm:$0xff] %vm223_vm1, %v1451_v4  ;;  %1227 = vst.msk [vmem:[#allocation3 + $0x150] sm:$0xff] %vm223_vm1, %v1195_v11  ;;  %v1197_v58 = vld [vmem:[#allocation2 + $0x91] sm:$0xff]  ;;  %v1198_v49 = vld [vmem:[#allocation2 + $0x99] sm:$0xff] }
 0x151   : > { %1484 = vst.msk [vmem:[#allocation3 + $0x158] sm:$0xff] %vm223_vm1, %v1452_v18  ;;  %1228 = vst.msk [vmem:[#allocation3 + $0x178] sm:$0xff] %vm223_vm1, %v1196_v55  ;;  %v1455_v50 = vld [vmem:[#allocation2 + $0xb0] sm:$0xff]  ;;  %v6741_v63 = vld [vmem:[#allocation2 + $0xe1] sm:$0xff] }
 0x152   : > { %1485 = vst.msk [vmem:[#allocation3 + $0x180] sm:$0xff] %vm223_vm1, %v1453_v22  ;;  %1229 = vst.msk [vmem:[#allocation3 + $0x1a0] sm:$0xff] %vm223_vm1, %v1197_v58  ;;  %v1014_v4 = vld [vmem:[#allocation2 + $0xf8] sm:$0xff]  ;;  %v1199_v11 = vld [vmem:[#allocation2 + $0xa9] sm:$0xff] }
 0x153   : > { %1486 = vst.msk [vmem:[#allocation3 + $0x1a8] sm:$0xff] %vm223_vm1, %v1454_v37  ;;  %1230 = vst.msk [vmem:[#allocation3 + $0x1c8] sm:$0xff] %vm223_vm1, %v1198_v49  ;;  %v1200_v18 = vld [vmem:[#allocation2 + $0xb1] sm:$0xff]  ;;  %v1201_v55 = vld [vmem:[#allocation2 + $0xc1] sm:$0xff]  ;;  %840 = vrot.lane.b32.xlu1 %v6741_v63, %s5927_s23  ;;  %1097 = vrot.lane.b32.xlu0 %v1014_v4, %s5927_s23 }
 0x154   : > { %1487 = vst.msk [vmem:[#allocation3 + $0x1d0] sm:$0xff] %vm223_vm1, %v1455_v50  ;;  %1231 = vst.msk [vmem:[#allocation3 + $0x1f0] sm:$0xff] %vm223_vm1, %v1199_v11  ;;  %v1202_v53 = vld [vmem:[#allocation2 + $0xc9] sm:$0xff]  ;;  %v1203_v22 = vld [vmem:[#allocation2 + $0xd9] sm:$0xff] }
 0x155   : > { %1232 = vst.msk [vmem:[#allocation3 + $0x218] sm:$0xff] %vm223_vm1, %v1200_v18  ;;  %1233 = vst.msk [vmem:[#allocation3 + $0x240] sm:$0xff] %vm223_vm1, %v1201_v55  ;;  %v1204_v58 = vld [vmem:[#allocation2 + $0xe1] sm:$0xff]  ;;  %v1205_v37 = vld [vmem:[#allocation2 + $0xf1] sm:$0xff] }
 0x156   : > { %1234 = vst.msk [vmem:[#allocation3 + $0x268] sm:$0xff] %vm223_vm1, %v1202_v53  ;;  %1235 = vst.msk [vmem:[#allocation3 + $0x290] sm:$0xff] %vm223_vm1, %v1203_v22  ;;  %v1206_v49 = vld [vmem:[#allocation2 + $0xf9] sm:$0xff]  ;;  %v1207_v50 = vld [vmem:[#allocation2 + $0x109] sm:$0xff] }
 0x157   : > { %1236 = vst.msk [vmem:[#allocation3 + $0x2b8] sm:$0xff] %vm223_vm1, %v1204_v58  ;;  %1237 = vst.msk [vmem:[#allocation3 + $0x2e0] sm:$0xff] %vm223_vm1, %v1205_v37  ;;  %v1472_v11 = vld [vmem:[#allocation2 + $0x180] sm:$0xff]  ;;  %v1473_v18 = vld [vmem:[#allocation2 + $0x188] sm:$0xff] }
 0x158   : > { %1238 = vst.msk [vmem:[#allocation3 + $0x308] sm:$0xff] %vm223_vm1, %v1206_v49  ;;  %1239 = vst.msk [vmem:[#allocation3 + $0x330] sm:$0xff] %vm223_vm1, %v1207_v50  ;;  %v1015_v55 = vld [vmem:[#allocation2 + $0x108] sm:$0xff]  ;;  %v6760_v53 = vld [vmem:[#allocation2 + $0xf1] sm:$0xff] }
 0x159   : > { %1504 = vst.msk [vmem:[#allocation3 + $0x478] sm:$0xff] %vm223_vm1, %v1472_v11  ;;  %1505 = vst.msk [vmem:[#allocation3 + $0x4a0] sm:$0xff] %vm223_vm1, %v1473_v18  ;;  %842 = vrot.lane.b32.xlu1 %v6760_v53, %s5927_s23  ;;  %1099 = vrot.lane.b32.xlu0 %v1015_v55, %s5927_s23  ;;  %v6765_v4 = vld [vmem:[#allocation2 + $0xf9] sm:$0xff]  ;;  %v1016_v22 = vld [vmem:[#allocation2 + $0x110] sm:$0xff] }
 0x15a   : > { %v1017_v58 = vld [vmem:[#allocation2 + $0x120] sm:$0xff]  ;;  %v6770_v37 = vld [vmem:[#allocation2 + $0x109] sm:$0xff]  ;;  %v761_v49 = vld [vmem:[#allocation2 + $0x111] sm:$0xff] }
 0x15b   : > { %v1018_v50 = vld [vmem:[#allocation2 + $0x128] sm:$0xff]  ;;  %v1019_v11 = vld [vmem:[#allocation2 + $0x138] sm:$0xff]  ;;  %v1021_v54 = vld [vmem:[#allocation2 + $0x150] sm:$0xff] }
 0x15c   : > { %v762_v18 = vld [vmem:[#allocation2 + $0x121] sm:$0xff]  ;;  %v763_v55 = vld [vmem:[#allocation2 + $0x129] sm:$0xff]  ;;  %v1959_v40 = vld [vmem:[%s8436_s2 + $0x118] sm:$0xff] }
 0x15d   : > { %844 = vrot.lane.b32.xlu1 %v6765_v4, %s5927_s23  ;;  %1101 = vrot.lane.b32.xlu0 %v1016_v22, %s5927_s23  ;;  %v1020_v22 = vld [vmem:[#allocation2 + $0x140] sm:$0xff] }
 0x161   : > { %846 = vrot.lane.b32.xlu1 %v6770_v37, %s5927_s23  ;;  %1103 = vrot.lane.b32.xlu0 %v1017_v58, %s5927_s23  ;;  %v764_v58 = vld [vmem:[#allocation2 + $0x139] sm:$0xff] }
 0x165   : > { %848 = vrot.lane.b32.xlu1 %v761_v49, %s5927_s23  ;;  %1105 = vrot.lane.b32.xlu0 %v1018_v50, %s5927_s23  ;;  %v765_v49 = vld [vmem:[#allocation2 + $0x141] sm:$0xff]  ;;  %v1022_v50 = vld [vmem:[#allocation2 + $0x158] sm:$0xff] }
 0x169   : > { %850 = vrot.lane.b32.xlu1 %v762_v18, %s5927_s23  ;;  %1107 = vrot.lane.b32.xlu0 %v1019_v11, %s5927_s23  ;;  %v1023_v18 = vld [vmem:[#allocation2 + $0x168] sm:$0xff]  ;;  %v766_v11 = vld [vmem:[#allocation2 + $0x151] sm:$0xff] }
 0x16d   : > { %852 = vrot.lane.b32.xlu1 %v763_v55, %s5927_s23  ;;  %1109 = vrot.lane.b32.xlu0 %v1020_v22, %s5927_s23 }
 0x16f   : > { %v1060_v22 = vpop.permute.xlu0 %1059 }
 0x170   : > { %v1062_v55 = vpop.permute.xlu1 %1061  ;;  %1155 = vst.msk [vmem:[#allocation3 + $0x8] sm:$0xff] %vm898_vm6, %v1060_v22 }
 0x171   : > { %854 = vrot.lane.b32.xlu1 %v764_v58, %s5927_s23  ;;  %1111 = vrot.lane.b32.xlu0 %v1021_v54, %s5927_s23  ;;  %1156 = vst.msk [vmem:[#allocation3 + $0x30] sm:$0xff] %vm898_vm6, %v1062_v55  ;;  %v767_v54 = vld [vmem:[#allocation2 + $0x159] sm:$0xff]  ;;  %v1024_v58 = vld [vmem:[#allocation2 + $0x170] sm:$0xff]  ;;  %v1957_v55 = vld [vmem:[%s8436_s2 + $0x108] sm:$0xff] }
 0x173   : > { %v803_v57 = vpop.permute.xlu0 %802 }
 0x174   : > { %899 = vst.msk [vmem:[#allocation3] sm:$0xff] %vm898_vm6, %v803_v57  ;;  %v769_v57 = vld [vmem:[#allocation2 + $0x171] sm:$0xff] }
 0x175   : > { %856 = vrot.lane.b32.xlu1 %v765_v49, %s5927_s23  ;;  %1113 = vrot.lane.b32.xlu0 %v1022_v50, %s5927_s23  ;;  %v1025_v49 = vld [vmem:[#allocation2 + $0x180] sm:$0xff]  ;;  %v805_v50 = vpop.permute.xlu1 %804 }
 0x176   : > { %900 = vst.msk [vmem:[#allocation3 + $0x28] sm:$0xff] %vm898_vm6, %v805_v50  ;;  %v1026_v50 = vld [vmem:[#allocation2 + $0x188] sm:$0xff] }
 0x179   : > { %858 = vrot.lane.b32.xlu1 %v766_v11, %s5927_s23  ;;  %1115 = vrot.lane.b32.xlu0 %v1023_v18, %s5927_s23  ;;  %v768_v18 = vld [vmem:[#allocation2 + $0x169] sm:$0xff]  ;;  %v1956_v11 = vld [vmem:[%s8436_s2 + $0x100] sm:$0xff]  ;;  %v807_v22 = vpop.permute.xlu1 %806 }
 0x17a   : > { %901 = vst.msk [vmem:[#allocation3 + $0x50] sm:$0xff] %vm898_vm6, %v807_v22 }
 0x17b   : > { %v1764_v36 = vld [vmem:[#allocation3] sm:$0xff] }
 0x17d   : > { %860 = vrot.lane.b32.xlu1 %v767_v54, %s5927_s23  ;;  %1117 = vrot.lane.b32.xlu0 %v1024_v58, %s5927_s23  ;;  %v1064_v54 = vpop.permute.xlu0 %1063  ;;  %v1765_v58 = vld [vmem:[#allocation3 + $0x8] sm:$0xff]  ;;  %v809_v52 = vpop.permute.xlu1 %808 }
 0x17e   : > { %1157 = vst.msk [vmem:[#allocation3 + $0x58] sm:$0xff] %vm898_vm6, %v1064_v54  ;;  %2156 = vmatprep.mubr.f32.mxu1 %v1765_v58  ;;  %902 = vst.msk [vmem:[#allocation3 + $0x78] sm:$0xff] %vm898_vm6, %v809_v52  ;;  %v1770_v54 = vld [vmem:[#allocation3 + $0x30] sm:$0xff]  ;;  %v1961_v52 = vld [vmem:[%s8436_s2 + $0x128] sm:$0xff] }
 0x17f   : > { %2157 = vmatmul.mubr.f32.vlgmr.msra.gmra.mrb[0].mxu1 %v1764_v36  ;;  %v1960_v58 = vld [vmem:[%s8436_s2 + $0x120] sm:$0xff] }
 0x180   : > { %2161 = vmatprep.mubr.f32.mxu1 %v1770_v54 }
 0x181   : > { %862 = vrot.lane.b32.xlu1 %v768_v18, %s5927_s23  ;;  %1119 = vrot.lane.b32.xlu0 %v1025_v49, %s5927_s23  ;;  %v5476_v49 = vpack.c.bf16 %v1957_v55, %v1956_v11  ;;  %v1958_v18 = vld [vmem:[%s8436_s2 + $0x110] sm:$0xff]  ;;  %v1066_v22 = vpop.permute.xlu0 %1065  ;;  %v1769_v11 = vld [vmem:[#allocation3 + $0x28] sm:$0xff]  ;;  %v811_v36 = vpop.permute.xlu1 %810  ;;  %v1774_v54 = vld [vmem:[#allocation3 + $0x50] sm:$0xff] }
 0x182   : > { %1158 = vst.msk [vmem:[#allocation3 + $0x80] sm:$0xff] %vm898_vm6, %v1066_v22  ;;  %v5479_v55 = vpack.c.bf16 %v1959_v40, %v1958_v18  ;;  %903 = vst.msk [vmem:[#allocation3 + $0xa0] sm:$0xff] %vm898_vm6, %v811_v36  ;;  %v1963_v40 = vld [vmem:[%s8436_s2 + $0x138] sm:$0xff] }
 0x183   : > { %5477 = vmatpush1.bf16.msra.mxu1 %v5476_v49  ;;  %v8458_v49 = vmov 0.0|0.0  }
 0x184   : > { %5478 = vmatprep.subr.bf16.mxu1 %v8458_v49  ;;  %2162 = vmatmul.mubr.f32.gmra.mrb[2].mxu1 %v1769_v11 }
 0x185   : > { %864 = vrot.lane.b32.xlu1 %v769_v57, %s5927_s23  ;;  %1121 = vrot.lane.b32.xlu0 %v1026_v50, %s5927_s23  ;;  %v1068_v57 = vpop.permute.xlu0 %1067  ;;  %v1775_v50 = vld [vmem:[#allocation3 + $0x58] sm:$0xff]  ;;  %v813_v18 = vpop.permute.xlu1 %812 }
 0x186   : > { %1159 = vst.msk [vmem:[#allocation3 + $0xa8] sm:$0xff] %vm898_vm6, %v1068_v57  ;;  %2166 = vmatprep.mubr.f32.mxu1 %v1775_v50  ;;  %904 = vst.msk [vmem:[#allocation3 + $0xc8] sm:$0xff] %vm898_vm6, %v813_v18  ;;  %v1779_v36 = vld [vmem:[#allocation3 + $0x78] sm:$0xff]  ;;  %v1967_v50 = vld [vmem:[%s8436_s2 + $0x158] sm:$0xff] }
 0x187   : > { %5480 = vmatpush1.bf16.msra.mxu1 %v5479_v55  ;;  %v1965_v55 = vld [vmem:[%s8436_s2 + $0x148] sm:$0xff] }
 0x188   : > { %5481 = vmatprep.subr.bf16.mxu1 %v8458_v49  ;;  %2167 = vmatmul.mubr.f32.gmra.mrb[4].mxu1 %v1774_v54 }
 0x189   : > { %1315 = vrot.lane.b32.xlu1 %v6321_v51, %s5927_s23  ;;  %1572 = vrot.lane.b32.xlu0 %v6390_v24, %s5927_s23  ;;  %v5482_v51 = vpack.c.bf16 %v1961_v52, %v1960_v58  ;;  %v1962_v24 = vld [vmem:[%s8436_s2 + $0x130] sm:$0xff]  ;;  %v1070_v22 = vpop.permute.xlu0 %1069  ;;  %v815_v58 = vpop.permute.xlu1 %814 }
 0x18a   : > { %v1780_v11 = vld [vmem:[#allocation3 + $0x80] sm:$0xff]  ;;  %1160 = vst.msk [vmem:[#allocation3 + $0xd0] sm:$0xff] %vm898_vm6, %v1070_v22  ;;  %905 = vst.msk [vmem:[#allocation3 + $0xf0] sm:$0xff] %vm898_vm6, %v815_v58  ;;  %v1969_v22 = vld [vmem:[%s8436_s2 + $0x168] sm:$0xff] }
 0x18b   : > { %2171 = vmatprep.mubr.f32.mxu1 %v1780_v11  ;;  %5483 = vmatpush1.bf16.msra.mxu1 %v5482_v51  ;;  %v1971_v58 = vld [vmem:[%s8436_s2 + $0x178] sm:$0xff] }
 0x18c   : > { %5484 = vmatprep.subr.bf16.mxu1 %v8458_v49  ;;  %2172 = vmatmul.mubr.f32.gmra.mrb[6].mxu1 %v1779_v36 }
 0x18d   : > { %1317 = vrot.lane.b32.xlu1 %v6311_v46, %s5927_s23  ;;  %1574 = vrot.lane.b32.xlu0 %v6415_v34, %s5927_s23  ;;  %v5485_v46 = vpack.c.bf16 %v1963_v40, %v1962_v24  ;;  %v1964_v34 = vld [vmem:[%s8436_s2 + $0x140] sm:$0xff]  ;;  %v1072_v52 = vpop.permute.xlu0 %1071  ;;  %v1785_v57 = vld [vmem:[#allocation3 + $0xa8] sm:$0xff]  ;;  %v817_v51 = vpop.permute.xlu1 %816  ;;  %v1784_v40 = vld [vmem:[#allocation3 + $0xa0] sm:$0xff] }
 0x18e   : > { %1161 = vst.msk [vmem:[#allocation3 + $0xf8] sm:$0xff] %vm898_vm6, %v1072_v52  ;;  %2176 = vmatprep.mubr.f32.mxu1 %v1785_v57  ;;  %906 = vst.msk [vmem:[#allocation3 + $0x118] sm:$0xff] %vm898_vm6, %v817_v51 }
 0x18f   : > { %5486 = vmatpush1.bf16.msra.mxu1 %v5485_v46  ;;  %v1789_v46 = vld [vmem:[#allocation3 + $0xc8] sm:$0xff] }
 0x190   : > { %5487 = vmatprep.subr.bf16.mxu1 %v8458_v49  ;;  %2177 = vmatmul.mubr.f32.gmra.mrb[8].mxu1 %v1784_v40 }
 0x191   : > { %1319 = vrot.lane.b32.xlu1 %v6331_v59, %s5927_s23  ;;  %1576 = vrot.lane.b32.xlu0 %v6442_v47, %s5927_s23  ;;  %v5488_v59 = vpack.c.bf16 %v1965_v55, %v1964_v34  ;;  %v1966_v47 = vld [vmem:[%s8436_s2 + $0x150] sm:$0xff]  ;;  %v1074_v24 = vpop.permute.xlu0 %1073  ;;  %v1790_v18 = vld [vmem:[#allocation3 + $0xd0] sm:$0xff]  ;;  %v819_v54 = vpop.permute.xlu1 %818 }
 0x192   : > { %1162 = vst.msk [vmem:[#allocation3 + $0x120] sm:$0xff] %vm898_vm6, %v1074_v24  ;;  %2181 = vmatprep.mubr.f32.mxu1 %v1790_v18  ;;  %907 = vst.msk [vmem:[#allocation3 + $0x140] sm:$0xff] %vm898_vm6, %v819_v54  ;;  %v1970_v55 = vld [vmem:[%s8436_s2 + $0x170] sm:$0xff]  ;;  %v1794_v57 = vld [vmem:[#allocation3 + $0xf0] sm:$0xff] }
 0x193   : > { %5489 = vmatpush1.bf16.msra.mxu1 %v5488_v59 }
 0x194   : > { %5490 = vmatprep.subr.bf16.mxu1 %v8458_v49  ;;  %2182 = vmatmul.mubr.f32.gmra.mrb[10].mxu1 %v1789_v46 }
 0x195   : > { %1321 = vrot.lane.b32.xlu1 %v6326_v56, %s5927_s23  ;;  %1578 = vrot.lane.b32.xlu0 %v6468_v62, %s5927_s23  ;;  %v5491_v56 = vpack.c.bf16 %v1967_v50, %v1966_v47  ;;  %v1968_v62 = vld [vmem:[%s8436_s2 + $0x160] sm:$0xff]  ;;  %v1076_v11 = vpop.permute.xlu0 %1075  ;;  %v1795_v34 = vld [vmem:[#allocation3 + $0xf8] sm:$0xff] }
 0x196   : > { %1163 = vst.msk [vmem:[#allocation3 + $0x148] sm:$0xff] %vm898_vm6, %v1076_v11  ;;  %2186 = vmatprep.mubr.f32.mxu1 %v1795_v34  ;;  %v821_v52 = vpop.permute.xlu1 %820  ;;  %v1972_v47 = vld [vmem:[%s8436_s2 + $0x180] sm:$0xff]  ;;  %v1973_v50 = vld [vmem:[%s8436_s2 + $0x188] sm:$0xff] }
 0x197   : > { %5492 = vmatpush1.bf16.msra.mxu1 %v5491_v56  ;;  %908 = vst.msk [vmem:[#allocation3 + $0x168] sm:$0xff] %vm898_vm6, %v821_v52  ;;  %v1799_v40 = vld [vmem:[#allocation3 + $0x118] sm:$0xff]  ;;  %v1974_v56 = vld [vmem:[%s8436_s2 + $0x190] sm:$0xff] }
 0x198   : > { %5493 = vmatprep.subr.bf16.mxu1 %v8458_v49  ;;  %2187 = vmatmul.mubr.f32.gmra.mrb[12].mxu1 %v1794_v57  ;;  %v1978_v57 = vld [vmem:[%s8436_s2 + $0x1b0] sm:$0xff] }
 0x199   : > { %1323 = vrot.lane.b32.xlu1 %v6350_v5, %s5927_s23  ;;  %1580 = vrot.lane.b32.xlu0 %v6490_v10, %s5927_s23  ;;  %v1256_v5 = vld [vmem:[#allocation2 + $0x52] sm:$0xff]  ;;  %v5494_v10 = vpack.c.bf16 %v1969_v22, %v1968_v62  ;;  %v1078_v36 = vpop.permute.xlu0 %1077 }
 0x19a   : > { %v1800_v59 = vld [vmem:[#allocation3 + $0x120] sm:$0xff]  ;;  %1164 = vst.msk [vmem:[#allocation3 + $0x170] sm:$0xff] %vm898_vm6, %v1078_v36  ;;  %v823_v51 = vpop.permute.xlu1 %822  ;;  %v1975_v62 = vld [vmem:[%s8436_s2 + $0x198] sm:$0xff] }
 0x19b   : > { %2191 = vmatprep.mubr.f32.mxu1 %v1800_v59  ;;  %5495 = vmatpush1.bf16.msra.mxu1 %v5494_v10  ;;  %909 = vst.msk [vmem:[#allocation3 + $0x190] sm:$0xff] %vm898_vm6, %v823_v51  ;;  %v1804_v11 = vld [vmem:[#allocation3 + $0x140] sm:$0xff]  ;;  %v5503_v34 = vpack.c.bf16 %v1975_v62, %v1974_v56  ;;  %v1977_v10 = vld [vmem:[%s8436_s2 + $0x1a8] sm:$0xff]  ;;  %v1979_v59 = vld [vmem:[%s8436_s2 + $0x1b8] sm:$0xff] }
 0x19c   : > { %5496 = vmatprep.subr.bf16.mxu1 %v8458_v49  ;;  %2192 = vmatmul.mubr.f32.gmra.mrb[14].mxu1 %v1799_v40  ;;  %v1981_v40 = vld [vmem:[%s8436_s2 + $0x1c8] sm:$0xff]  ;;  %v1982_v62 = vld [vmem:[%s8436_s2 + $0x1d0] sm:$0xff] }
 0x19d   : > { %1325 = vrot.lane.b32.xlu1 %v1256_v5, %s5927_s23  ;;  %1582 = vrot.lane.b32.xlu0 %v6510_v20, %s5927_s23  ;;  %v5497_v20 = vpack.c.bf16 %v1971_v58, %v1970_v55  ;;  %v1080_v24 = vpop.permute.xlu0 %1079  ;;  %v1805_v18 = vld [vmem:[#allocation3 + $0x148] sm:$0xff]  ;;  %v1976_v5 = vld [vmem:[%s8436_s2 + $0x1a0] sm:$0xff] }
 0x19e   : > { %1165 = vst.msk [vmem:[#allocation3 + $0x198] sm:$0xff] %vm898_vm6, %v1080_v24  ;;  %2196 = vmatprep.mubr.f32.mxu1 %v1805_v18  ;;  %v1809_v52 = vld [vmem:[#allocation3 + $0x168] sm:$0xff]  ;;  %v1980_v24 = vld [vmem:[%s8436_s2 + $0x1c0] sm:$0xff] }
 0x19f   : > { %5498 = vmatpush1.bf16.msra.mxu1 %v5497_v20  ;;  %v825_v22 = vpop.permute.xlu1 %824 }
 0x1a0   : > { %5499 = vmatprep.subr.bf16.mxu1 %v8458_v49  ;;  %910 = vst.msk [vmem:[#allocation3 + $0x1b8] sm:$0xff] %vm898_vm6, %v825_v22  ;;  %2197 = vmatmul.mubr.f32.gmra.mrb[16].mxu1 %v1804_v11  ;;  %v1983_v22 = vld [vmem:[%s8436_s2 + $0x1d8] sm:$0xff] }
 0x1a1   : > { %1327 = vrot.lane.b32.xlu1 %v6370_v16, %s5927_s23  ;;  %1584 = vrot.lane.b32.xlu0 %v6532_v35, %s5927_s23  ;;  %v1258_v16 = vld [vmem:[#allocation2 + $0x6a] sm:$0xff]  ;;  %v5500_v35 = vpack.c.bf16 %v1973_v50, %v1972_v47  ;;  %v1082_v54 = vpop.permute.xlu0 %1081  ;;  %v1810_v46 = vld [vmem:[#allocation3 + $0x170] sm:$0xff] }
 0x1a2   : > { %1166 = vst.msk [vmem:[#allocation3 + $0x1c0] sm:$0xff] %vm898_vm6, %v1082_v54  ;;  %2201 = vmatprep.mubr.f32.mxu1 %v1810_v46  ;;  %v1814_v50 = vld [vmem:[#allocation3 + $0x190] sm:$0xff] }
 0x1a3   : > { %5501 = vmatpush1.bf16.msra.mxu1 %v5500_v35  ;;  %v827_v55 = vpop.permute.xlu1 %826 }
 0x1a4   : > { %5502 = vmatprep.subr.bf16.mxu1 %v8458_v49  ;;  %911 = vst.msk [vmem:[#allocation3 + $0x1e0] sm:$0xff] %vm898_vm6, %v827_v55  ;;  %2202 = vmatmul.mubr.f32.gmra.mrb[18].mxu1 %v1809_v52  ;;  %v1987_v52 = vld [vmem:[%s8436_s2 + $0x1f8] sm:$0xff] }
 0x1a5   : > { %1329 = vrot.lane.b32.xlu1 %v1258_v16, %s5927_s23  ;;  %1586 = vrot.lane.b32.xlu0 %v6552_v48, %s5927_s23  ;;  %v1259_v48 = vld [vmem:[#allocation2 + $0x7a] sm:$0xff]  ;;  %v1084_v58 = vpop.permute.xlu0 %1083  ;;  %v1815_v36 = vld [vmem:[#allocation3 + $0x198] sm:$0xff] }
 0x1a6   : > { %1167 = vst.msk [vmem:[#allocation3 + $0x1e8] sm:$0xff] %vm898_vm6, %v1084_v58  ;;  %2206 = vmatprep.mubr.f32.mxu1 %v1815_v36 }
 0x1a7   : > { %5504 = vmatpush1.bf16.msra.mxu1 %v5503_v34  ;;  %v829_v20 = vpop.permute.xlu1 %828  ;;  %v1819_v35 = vld [vmem:[#allocation3 + $0x1b8] sm:$0xff] }
 0x1a8   : > { %5505 = vmatprep.subr.bf16.mxu1 %v8458_v49  ;;  %912 = vst.msk [vmem:[#allocation3 + $0x208] sm:$0xff] %vm898_vm6, %v829_v20  ;;  %2207 = vmatmul.mubr.f32.gmra.mrb[20].mxu1 %v1814_v50  ;;  %v1985_v34 = vld [vmem:[%s8436_s2 + $0x1e8] sm:$0xff] }
 0x1a9   : > { %1331 = vrot.lane.b32.xlu1 %v1259_v48, %s5927_s23  ;;  %1588 = vrot.lane.b32.xlu0 %v6574_v3, %s5927_s23  ;;  %v5506_v3 = vpack.c.bf16 %v1977_v10, %v1976_v5  ;;  %v1086_v47 = vpop.permute.xlu0 %1085  ;;  %v1820_v51 = vld [vmem:[#allocation3 + $0x1c0] sm:$0xff] }
 0x1aa   : > { %1168 = vst.msk [vmem:[#allocation3 + $0x210] sm:$0xff] %vm898_vm6, %v1086_v47  ;;  %2211 = vmatprep.mubr.f32.mxu1 %v1820_v51 }
 0x1ab   : > { %5507 = vmatpush1.bf16.msra.mxu1 %v5506_v3  ;;  %v1824_v46 = vld [vmem:[#allocation3 + $0x1e0] sm:$0xff] }
 0x1ac   : > { %5508 = vmatprep.subr.bf16.mxu1 %v8458_v49  ;;  %2212 = vmatmul.mubr.f32.gmra.mrb[22].mxu1 %v1819_v35 }
 0x1ad   : > { %1333 = vrot.lane.b32.xlu1 %v6413_v33, %s5927_s23  ;;  %1590 = vrot.lane.b32.xlu0 %v6596_v15, %s5927_s23  ;;  %v1261_v33 = vld [vmem:[#allocation2 + $0x92] sm:$0xff]  ;;  %v5509_v15 = vpack.c.bf16 %v1979_v59, %v1978_v57  ;;  %v831_v18 = vpop.permute.xlu1 %830  ;;  %v1088_v16 = vpop.permute.xlu0 %1087 }
 0x1ae   : > { %v1825_v56 = vld [vmem:[#allocation3 + $0x1e8] sm:$0xff]  ;;  %913 = vst.msk [vmem:[#allocation3 + $0x230] sm:$0xff] %vm898_vm6, %v831_v18  ;;  %1169 = vst.msk [vmem:[#allocation3 + $0x238] sm:$0xff] %vm898_vm6, %v1088_v16 }
 0x1af   : > { %2216 = vmatprep.mubr.f32.mxu1 %v1825_v56  ;;  %5510 = vmatpush1.bf16.msra.mxu1 %v5509_v15  ;;  %v1829_v55 = vld [vmem:[#allocation3 + $0x208] sm:$0xff] }
 0x1b0   : > { %5511 = vmatprep.subr.bf16.mxu1 %v8458_v49  ;;  %2217 = vmatmul.mubr.f32.gmra.mrb[24].mxu1 %v1824_v46 }
 0x1b1   : > { %1335 = vrot.lane.b32.xlu1 %v1261_v33, %s5927_s23  ;;  %1592 = vrot.lane.b32.xlu0 %v6618_v32, %s5927_s23  ;;  %v5512_v32 = vpack.c.bf16 %v1981_v40, %v1980_v24  ;;  %v833_v54 = vpop.permute.xlu1 %832  ;;  %v1830_v48 = vld [vmem:[#allocation3 + $0x210] sm:$0xff] }
 0x1b2   : > { %v1090_v11 = vpop.permute.xlu0 %1089  ;;  %914 = vst.msk [vmem:[#allocation3 + $0x258] sm:$0xff] %vm898_vm6, %v833_v54  ;;  %2221 = vmatprep.mubr.f32.mxu1 %v1830_v48 }
 0x1b3   : > { %1170 = vst.msk [vmem:[#allocation3 + $0x260] sm:$0xff] %vm898_vm6, %v1090_v11  ;;  %5513 = vmatpush1.bf16.msra.mxu1 %v5512_v32 }
 0x1b4   : > { %5514 = vmatprep.subr.bf16.mxu1 %v8458_v49  ;;  %2222 = vmatmul.mubr.f32.gmra.mrb[26].mxu1 %v1829_v55 }
 0x1b5   : > { %1337 = vrot.lane.b32.xlu1 %v6435_v43, %s5927_s23  ;;  %1594 = vrot.lane.b32.xlu0 %v6632_v39, %s5927_s23  ;;  %v5515_v43 = vpack.c.bf16 %v1983_v22, %v1982_v62  ;;  %v1984_v39 = vld [vmem:[%s8436_s2 + $0x1e0] sm:$0xff]  ;;  %v835_v5 = vpop.permute.xlu1 %834  ;;  %v1835_v58 = vld [vmem:[#allocation3 + $0x238] sm:$0xff] }
 0x1b6   : > { %v1092_v10 = vpop.permute.xlu0 %1091  ;;  %915 = vst.msk [vmem:[#allocation3 + $0x280] sm:$0xff] %vm898_vm6, %v835_v5  ;;  %2226 = vmatprep.mubr.f32.mxu1 %v1835_v58  ;;  %v1834_v57 = vld [vmem:[#allocation3 + $0x230] sm:$0xff] }
 0x1b7   : > { %1171 = vst.msk [vmem:[#allocation3 + $0x288] sm:$0xff] %vm898_vm6, %v1092_v10  ;;  %5516 = vmatpush1.bf16.msra.mxu1 %v5515_v43 }
 0x1b8   : > { %5517 = vmatprep.subr.bf16.mxu1 %v8458_v49  ;;  %2227 = vmatmul.mubr.f32.gmra.mrb[28].mxu1 %v1834_v57 }
 0x1b9   : > { %1339 = vrot.lane.b32.xlu1 %v6462_v60, %s5927_s23  ;;  %1596 = vrot.lane.b32.xlu0 %v6673_v17, %s5927_s23  ;;  %v5518_v60 = vpack.c.bf16 %v1985_v34, %v1984_v39  ;;  %v1986_v17 = vld [vmem:[%s8436_s2 + $0x1f0] sm:$0xff]  ;;  %v837_v36 = vpop.permute.xlu1 %836  ;;  %v1839_v47 = vld [vmem:[#allocation3 + $0x258] sm:$0xff] }
 0x1ba   : > { %v1094_v3 = vpop.permute.xlu0 %1093  ;;  %v1840_v59 = vld [vmem:[#allocation3 + $0x260] sm:$0xff]  ;;  %916 = vst.msk [vmem:[#allocation3 + $0x2a8] sm:$0xff] %vm898_vm6, %v837_v36 }
 0x1bb   : > { %1172 = vst.msk [vmem:[#allocation3 + $0x2b0] sm:$0xff] %vm898_vm6, %v1094_v3  ;;  %2231 = vmatprep.mubr.f32.mxu1 %v1840_v59  ;;  %5519 = vmatpush1.bf16.msra.mxu1 %v5518_v60 }
 0x1bc   : > { %5520 = vmatprep.subr.bf16.mxu1 %v8458_v49  ;;  %2232 = vmatmul.mubr.f32.gmra.mrb[30].mxu1 %v1839_v47 }
 0x1bd   : > { %1341 = vrot.lane.b32.xlu1 %v6466_v61, %s5927_s23  ;;  %1598 = vrot.lane.b32.xlu0 %v6686_v25, %s5927_s23  ;;  %v5521_v61 = vpack.c.bf16 %v1987_v52, %v1986_v17  ;;  %v1844_v51 = vld [vmem:[#allocation3 + $0x280] sm:$0xff] }
 0x1be   : > { %v1845_v50 = vld [vmem:[#allocation3 + $0x288] sm:$0xff] }
 0x1bf   : > { %v1096_v20 = vpop.permute.xlu0 %1095  ;;  %2236 = vmatprep.mubr.f32.mxu1 %v1845_v50  ;;  %5522 = vmatpush1.bf16.msra.mxu1 %v5521_v61  ;;  %v1474_v61 = vld [vmem:[#allocation2 + $0x198] sm:$0xff] }
 0x1c0   : > { %1173 = vst.msk [vmem:[#allocation3 + $0x2d8] sm:$0xff] %vm898_vm6, %v1096_v20  ;;  %2237 = vmatmul.mubr.f32.gmra.mrb[32].mxu1 %v1844_v51 }
 0x1c1   : > { %1343 = vrot.lane.b32.xlu1 %v6485_v7, %s5927_s23  ;;  %1600 = vrot.lane.b32.xlu0 %v6732_v26, %s5927_s23  ;;  %v839_v25 = vpop.permute.xlu1 %838  ;;  %v1849_v24 = vld [vmem:[#allocation3 + $0x2a8] sm:$0xff]  ;;  %1506 = vst.msk [vmem:[#allocation3 + $0x4c8] sm:$0xff] %vm223_vm1, %v1474_v61 }
 0x1c2   : > { %917 = vst.msk [vmem:[#allocation3 + $0x2d0] sm:$0xff] %vm898_vm6, %v839_v25  ;;  %v1850_v33 = vld [vmem:[#allocation3 + $0x2b0] sm:$0xff] }
 0x1c3   : > { %2241 = vmatprep.mubr.f32.mxu1 %v1850_v33 }
 0x1c4   : > { %2242 = vmatmul.mubr.f32.gmra.mrb[34].mxu1 %v1849_v24 }
 0x1c5   : > { %1345 = vrot.lane.b32.xlu1 %v6487_v9, %s5927_s23  ;;  %1602 = vrot.lane.b32.xlu0 %v6741_v63, %s5927_s23  ;;  %v841_v7 = vpop.permute.xlu1 %840  ;;  %v1098_v26 = vpop.permute.xlu0 %1097 }
 0x1c6   : > { %918 = vst.msk [vmem:[#allocation3 + $0x2f8] sm:$0xff] %vm898_vm6, %v841_v7  ;;  %1174 = vst.msk [vmem:[#allocation3 + $0x300] sm:$0xff] %vm898_vm6, %v1098_v26  ;;  %v8459_v7 = vld [vmem:[#allocation7_spill] sm:$0xff] }
 0x1c7   : > { %v1855_v63 = vld [vmem:[#allocation3 + $0x2d8] sm:$0xff] }
 0x1c8   : > { %2246 = vmatprep.mubr.f32.mxu1 %v1855_v63  ;;  %v1730_v63 = vld [vmem:[#allocation2 + $0x19a] sm:$0xff] }
 0x1c9   : > { %1347 = vrot.lane.b32.xlu1 %v6508_v19, %s5927_s23  ;;  %1604 = vrot.lane.b32.xlu0 %v6760_v53, %s5927_s23  ;;  %v1854_v18 = vld [vmem:[#allocation3 + $0x2d0] sm:$0xff]  ;;  %1762 = vst.msk [vmem:[#allocation3 + $0x4d0] sm:$0xff] %vm223_vm1, %v1730_v63 }
 0x1ca   : > { %2247 = vmatmul.mubr.f32.gmra.mrb[36].mxu1 %v1854_v18  ;;  %v8462_v18 = vld [vmem:[#allocation10_spill] sm:$0xff] }
 0x1cb   : > { %v843_v9 = vpop.permute.xlu1 %842  ;;  %v1100_v15 = vpop.permute.xlu0 %1099 }
 0x1cc   : > { %919 = vst.msk [vmem:[#allocation3 + $0x320] sm:$0xff] %vm898_vm6, %v843_v9  ;;  %1175 = vst.msk [vmem:[#allocation3 + $0x328] sm:$0xff] %vm898_vm6, %v1100_v15 }
 0x1cd   : > { %1349 = vrot.lane.b32.xlu1 %v6527_v29, %s5927_s23  ;;  %1606 = vrot.lane.b32.xlu0 %v6765_v4, %s5927_s23  ;;  %v1860_v53 = vld [vmem:[#allocation3 + $0x300] sm:$0xff]  ;;  %v1859_v35 = vld [vmem:[#allocation3 + $0x2f8] sm:$0xff] }
 0x1ce   : > { %2251 = vmatprep.mubr.f32.mxu1 %v1860_v53 }
 0x1cf   : > { %v845_v19 = vpop.permute.xlu1 %844  ;;  %v1102_v40 = vpop.permute.xlu0 %1101  ;;  %2252 = vmatmul.mubr.f32.gmra.mrb[38].mxu1 %v1859_v35  ;;  %v1538_v35 = vld [vmem:[#allocation2 + $0x199] sm:$0xff] }
 0x1d0   : > { %920 = vst.msk [vmem:[#allocation3 + $0x348] sm:$0xff] %vm898_vm6, %v845_v19  ;;  %1176 = vst.msk [vmem:[#allocation3 + $0x350] sm:$0xff] %vm898_vm6, %v1102_v40  ;;  %v1731_v19 = vld [vmem:[#allocation2 + $0x1a2] sm:$0xff]  ;;  %v8461_v40 = vld [vmem:[#allocation8_spill] sm:$0xff] }
 0x1d1   : > { %1351 = vrot.lane.b32.xlu1 %v6529_v31, %s5927_s23  ;;  %1608 = vrot.lane.b32.xlu0 %v6770_v37, %s5927_s23  ;;  %1763 = vst.msk [vmem:[#allocation3 + $0x4f8] sm:$0xff] %vm223_vm1, %v1731_v19 }
 0x1d3   : > { %v847_v29 = vpop.permute.xlu1 %846  ;;  %v1104_v16 = vpop.permute.xlu0 %1103  ;;  %v1865_v4 = vld [vmem:[#allocation3 + $0x328] sm:$0xff]  ;;  %v1864_v32 = vld [vmem:[#allocation3 + $0x320] sm:$0xff] }
 0x1d4   : > { %921 = vst.msk [vmem:[#allocation3 + $0x370] sm:$0xff] %vm898_vm6, %v847_v29  ;;  %1177 = vst.msk [vmem:[#allocation3 + $0x378] sm:$0xff] %vm898_vm6, %v1104_v16  ;;  %2256 = vmatprep.mubr.f32.mxu1 %v1865_v4 }
 0x1d5   : > { %1353 = vrot.lane.b32.xlu1 %v6550_v45, %s5927_s23  ;;  %1610 = vrot.lane.b32.xlu0 %v6571_v1, %s5927_s23 }
 0x1d6   : > { %2257 = vmatmul.mubr.f32.gmra.mrb[40].mxu1 %v1864_v32  ;;  %v1281_v32 = vld [vmem:[#allocation2 + $0x182] sm:$0xff] }
 0x1d7   : > { %v849_v31 = vpop.permute.xlu1 %848  ;;  %v1106_v56 = vpop.permute.xlu0 %1105  ;;  %v1870_v37 = vld [vmem:[#allocation3 + $0x350] sm:$0xff]  ;;  %v1869_v22 = vld [vmem:[#allocation3 + $0x348] sm:$0xff] }
 0x1d8   : > { %922 = vst.msk [vmem:[#allocation3 + $0x398] sm:$0xff] %vm898_vm6, %v849_v31  ;;  %1178 = vst.msk [vmem:[#allocation3 + $0x3a0] sm:$0xff] %vm898_vm6, %v1106_v56  ;;  %2261 = vmatprep.mubr.f32.mxu1 %v1870_v37 }
 0x1d9   : > { %1355 = vrot.lane.b32.xlu1 %v6569_v0, %s5927_s23  ;;  %1612 = vrot.lane.b32.xlu0 %v6594_v14, %s5927_s23 }
 0x1da   : > { %2262 = vmatmul.mubr.f32.gmra.mrb[42].mxu1 %v1869_v22 }
 0x1db   : > { %v851_v45 = vpop.permute.xlu1 %850  ;;  %v1108_v62 = vpop.permute.xlu0 %1107  ;;  %v1875_v1 = vld [vmem:[#allocation3 + $0x378] sm:$0xff]  ;;  %v1874_v11 = vld [vmem:[#allocation3 + $0x370] sm:$0xff] }
 0x1dc   : > { %923 = vst.msk [vmem:[#allocation3 + $0x3c0] sm:$0xff] %vm898_vm6, %v851_v45  ;;  %1179 = vst.msk [vmem:[#allocation3 + $0x3c8] sm:$0xff] %vm898_vm6, %v1108_v62  ;;  %2266 = vmatprep.mubr.f32.mxu1 %v1875_v1  ;;  %v1539_v62 = vld [vmem:[#allocation2 + $0x1a1] sm:$0xff] }
 0x1dd   : > { %1357 = vrot.lane.b32.xlu1 %v6592_v13, %s5927_s23  ;;  %1614 = vrot.lane.b32.xlu0 %v6615_v28, %s5927_s23 }
 0x1de   : > { %2267 = vmatmul.mubr.f32.gmra.mrb[44].mxu1 %v1874_v11  ;;  %v1918_v11 = vld [vmem:[#allocation3 + $0x4d0] sm:$0xff] }
 0x1df   : > { %v853_v0 = vpop.permute.xlu1 %852  ;;  %v1110_v54 = vpop.permute.xlu0 %1109  ;;  %v1880_v14 = vld [vmem:[#allocation3 + $0x3a0] sm:$0xff]  ;;  %v1879_v48 = vld [vmem:[#allocation3 + $0x398] sm:$0xff]  ;;  %5350 = vmatprep.mubr.msk.f32.mxu0 %vm223_vm1, %v1918_v11  ;;  %3885 = vst.msk [vmem:[#allocation3 + $0x4d0] sm:$0xff] %vm223_vm1, %v1730_v63 }
 0x1e0   : > { %924 = vst.msk [vmem:[#allocation3 + $0x3e8] sm:$0xff] %vm898_vm6, %v853_v0  ;;  %1180 = vst.msk [vmem:[#allocation3 + $0x3f0] sm:$0xff] %vm898_vm6, %v1110_v54  ;;  %2271 = vmatprep.mubr.f32.mxu1 %v1880_v14  ;;  %v1282_v14 = vld [vmem:[#allocation2 + $0x18a] sm:$0xff] }
 0x1e1   : > { %1359 = vrot.lane.b32.xlu1 %v6613_v27, %s5927_s23  ;;  %1616 = vrot.lane.b32.xlu0 %v6637_v44, %s5927_s23 }
 0x1e2   : > { %2272 = vmatmul.mubr.f32.gmra.mrb[46].mxu1 %v1879_v48 }
 0x1e3   : > { %v855_v13 = vpop.permute.xlu1 %854  ;;  %v1112_v46 = vpop.permute.xlu0 %1111  ;;  %v1885_v28 = vld [vmem:[#allocation3 + $0x3c8] sm:$0xff]  ;;  %v1884_v39 = vld [vmem:[#allocation3 + $0x3c0] sm:$0xff] }
 0x1e4   : > { %925 = vst.msk [vmem:[#allocation3 + $0x410] sm:$0xff] %vm898_vm6, %v855_v13  ;;  %1181 = vst.msk [vmem:[#allocation3 + $0x418] sm:$0xff] %vm898_vm6, %v1112_v46  ;;  %2276 = vmatprep.mubr.f32.mxu1 %v1885_v28  ;;  %v1923_v13 = vld [vmem:[#allocation3 + $0x4f8] sm:$0xff] }
 0x1e5   : > { %1361 = vrot.lane.b32.xlu1 %v6635_v41, %s5927_s23  ;;  %1618 = vrot.lane.b32.xlu0 %v6653_v42, %s5927_s23  ;;  %v7056_v41 = vpop.f32.mrb[32].mxu0  ;;  %3886 = vst.msk [vmem:[#allocation3 + $0x4f8] sm:$0xff] %vm223_vm1, %v1731_v19 }
 0x1e6   : > { %2277 = vmatmul.mubr.f32.gmra.mrb[48].mxu1 %v1884_v39  ;;  %v7060_v55 = vpop.f32.mrb[33].mxu0  ;;  %5351 = vmatmul.mubr.msk.f32.gmra.mrb[62].mxu0 %vm223_vm1, %v1923_v13 }
 0x1e7   : > { %v857_v27 = vpop.permute.xlu1 %856  ;;  %v1114_v43 = vpop.permute.xlu0 %1113  ;;  %v1890_v44 = vld [vmem:[#allocation3 + $0x3f0] sm:$0xff]  ;;  %v1889_v5 = vld [vmem:[#allocation3 + $0x3e8] sm:$0xff] }
 0x1e8   : > { %926 = vst.msk [vmem:[#allocation3 + $0x438] sm:$0xff] %vm898_vm6, %v857_v27  ;;  %1182 = vst.msk [vmem:[#allocation3 + $0x440] sm:$0xff] %vm898_vm6, %v1114_v43  ;;  %2281 = vmatprep.mubr.f32.mxu1 %v1890_v44 }
 0x1e9   : > { %1363 = vrot.lane.b32.xlu1 %v6651_v2, %s5927_s23  ;;  %1620 = vrot.lane.b32.xlu0 %v6660_v8, %s5927_s23  ;;  %v7066_v2 = vpop.f32.mrb[34].mxu0 }
 0x1ea   : > { %2282 = vmatmul.mubr.f32.gmra.mrb[50].mxu1 %v1889_v5  ;;  %v7070_v52 = vpop.f32.mrb[35].mxu0 }
 0x1eb   : > { %v859_v34 = vpop.permute.xlu1 %858  ;;  %v1116_v42 = vpop.permute.xlu0 %1115  ;;  %v1895_v10 = vld [vmem:[#allocation3 + $0x418] sm:$0xff]  ;;  %v1894_v60 = vld [vmem:[#allocation3 + $0x410] sm:$0xff] }
 0x1ec   : > { %927 = vst.msk [vmem:[#allocation3 + $0x460] sm:$0xff] %vm898_vm6, %v859_v34  ;;  %1183 = vst.msk [vmem:[#allocation3 + $0x468] sm:$0xff] %vm898_vm6, %v1116_v42  ;;  %2286 = vmatprep.mubr.f32.mxu1 %v1895_v10 }
 0x1ed   : > { %1365 = vrot.lane.b32.xlu1 %v6658_v6, %s5927_s23  ;;  %1622 = vrot.lane.b32.xlu0 %v6682_v21, %s5927_s23  ;;  %v7076_v6 = vpop.f32.mrb[36].mxu0 }
 0x1ee   : > { %2287 = vmatmul.mubr.f32.gmra.mrb[52].mxu1 %v1894_v60  ;;  %v7080_v59 = vpop.f32.mrb[37].mxu0 }
 0x1ef   : > { %v861_v8 = vpop.permute.xlu1 %860  ;;  %v1118_v58 = vpop.permute.xlu0 %1117  ;;  %v1900_v17 = vld [vmem:[#allocation3 + $0x440] sm:$0xff]  ;;  %v1899_v3 = vld [vmem:[#allocation3 + $0x438] sm:$0xff] }
 0x1f0   : > { %928 = vst.msk [vmem:[#allocation3 + $0x488] sm:$0xff] %vm898_vm6, %v861_v8  ;;  %1184 = vst.msk [vmem:[#allocation3 + $0x490] sm:$0xff] %vm898_vm6, %v1118_v58  ;;  %2291 = vmatprep.mubr.f32.mxu1 %v1900_v17 }
 0x1f1   : > { %1367 = vrot.lane.b32.xlu1 %v6668_v12, %s5927_s23  ;;  %1624 = vrot.lane.b32.xlu0 %v6692_v30, %s5927_s23  ;;  %v7086_v12 = vpop.f32.mrb[38].mxu0 }
 0x1f2   : > { %2292 = vmatmul.mubr.f32.gmra.mrb[54].mxu1 %v1899_v3  ;;  %v7091_v50 = vpop.f32.mrb[39].mxu0 }
 0x1f3   : > { %v863_v21 = vpop.permute.xlu1 %862  ;;  %v1120_v36 = vpop.permute.xlu0 %1119  ;;  %v1905_v57 = vld [vmem:[#allocation3 + $0x468] sm:$0xff]  ;;  %v1904_v20 = vld [vmem:[#allocation3 + $0x460] sm:$0xff] }
 0x1f4   : > { %929 = vst.msk [vmem:[#allocation3 + $0x4b0] sm:$0xff] %vm898_vm6, %v863_v21  ;;  %1185 = vst.msk [vmem:[#allocation3 + $0x4b8] sm:$0xff] %vm898_vm6, %v1120_v36  ;;  %2296 = vmatprep.mubr.f32.mxu1 %v1905_v57  ;;  %v7097_v26 = vpop.f32.mrb[40].mxu0 }
 0x1f5   : > { %1369 = vrot.lane.b32.xlu1 %v6684_v23, %s5927_s23  ;;  %1626 = vrot.lane.b32.xlu0 %v6703_v38, %s5927_s23  ;;  %v1475_v23 = vld [vmem:[#allocation2 + $0x1a0] sm:$0xff]  ;;  %v7100_v9 = vpop.f32.mrb[41].mxu0 }
 0x1f6   : > { %2297 = vmatmul.mubr.f32.gmra.mrb[56].mxu1 %v1904_v20  ;;  %v8460_v38 = vld [vmem:[#allocation9_spill] sm:$0xff]  ;;  %1507 = vst.msk [vmem:[#allocation3 + $0x4f0] sm:$0xff] %vm223_vm1, %v1475_v23 }
 0x1f7   : > { %v865_v30 = vpop.permute.xlu1 %864  ;;  %v1122_v25 = vpop.permute.xlu0 %1121  ;;  %v1910_v47 = vld [vmem:[#allocation3 + $0x490] sm:$0xff]  ;;  %v1909_v51 = vld [vmem:[#allocation3 + $0x488] sm:$0xff] }
 0x1f8   : > { %930 = vst.msk [vmem:[#allocation3 + $0x4d8] sm:$0xff] %vm898_vm6, %v865_v30  ;;  %1186 = vst.msk [vmem:[#allocation3 + $0x4e0] sm:$0xff] %vm898_vm6, %v1122_v25  ;;  %2301 = vmatprep.mubr.f32.mxu1 %v1910_v47 }
 0x1f9   : > { %1371 = vrot.lane.b32.xlu1 %v8459_v7, %s5927_s23  ;;  %1628 = vrot.lane.b32.xlu0 %v8460_v38, %s5927_s23  ;;  %v7110_v53 = vpop.f32.mrb[42].mxu0 }
 0x1fa   : > { %2302 = vmatmul.mubr.f32.gmra.mrb[58].mxu1 %v1909_v51  ;;  %v7112_v4 = vpop.f32.mrb[43].mxu0 }
 0x1fb   : > { %v1915_v33 = vld [vmem:[#allocation3 + $0x4b8] sm:$0xff]  ;;  %v1316_v15 = vpop.permute.xlu1 %1315  ;;  %v1573_v24 = vpop.permute.xlu0 %1572  ;;  %v1914_v29 = vld [vmem:[#allocation3 + $0x4b0] sm:$0xff] }
 0x1fc   : > { %1411 = vst.msk [vmem:[#allocation3 + $0x10] sm:$0xff] %vm898_vm6, %v1316_v15  ;;  %1668 = vst.msk [vmem:[#allocation3 + $0x18] sm:$0xff] %vm898_vm6, %v1573_v24  ;;  %2306 = vmatprep.mubr.f32.mxu1 %v1915_v33 }
 0x1fd   : > { %1373 = vrot.lane.b32.xlu1 %v8461_v40, %s5927_s23  ;;  %1630 = vrot.lane.b32.xlu0 %v8462_v18, %s5927_s23  ;;  %v7118_v37 = vpop.f32.mrb[44].mxu0 }
 0x1fe   : > { %2307 = vmatmul.mubr.f32.gmra.mrb[60].mxu1 %v1914_v29  ;;  %v7120_v22 = vpop.f32.mrb[45].mxu0 }
 0x1ff   : > { %v1920_v16 = vld [vmem:[#allocation3 + $0x4e0] sm:$0xff]  ;;  %v1318_v31 = vpop.permute.xlu1 %1317  ;;  %v1575_v56 = vpop.permute.xlu0 %1574  ;;  %v1919_v45 = vld [vmem:[#allocation3 + $0x4d8] sm:$0xff] }
 0x200   : > { %1412 = vst.msk [vmem:[#allocation3 + $0x38] sm:$0xff] %vm898_vm6, %v1318_v31  ;;  %1669 = vst.msk [vmem:[#allocation3 + $0x40] sm:$0xff] %vm898_vm6, %v1575_v56  ;;  %2311 = vmatprep.mubr.f32.mxu1 %v1920_v16 }
 0x201   : > { %1375 = vrot.lane.b32.xlu1 %v1281_v32, %s5927_s23  ;;  %1632 = vrot.lane.b32.xlu0 %v1538_v35, %s5927_s23  ;;  %v7128_v46 = vpop.f32.mrb[46].mxu0 }
 0x202   : > { %2312 = vmatmul.mubr.f32.gmra.mrb[62].mxu1 %v1919_v45  ;;  %v7131_v28 = vpop.f32.mrb[47].mxu0 }
 0x203   : > { %v1320_v1 = vpop.permute.xlu1 %1319  ;;  %v1577_v0 = vpop.permute.xlu0 %1576  ;;  %v1767_v54 = vld [vmem:[#allocation3 + $0x18] sm:$0xff]  ;;  %v1766_v48 = vld [vmem:[#allocation3 + $0x10] sm:$0xff] }
 0x204   : > { %1413 = vst.msk [vmem:[#allocation3 + $0x60] sm:$0xff] %vm898_vm6, %v1320_v1  ;;  %1670 = vst.msk [vmem:[#allocation3 + $0x68] sm:$0xff] %vm898_vm6, %v1577_v0  ;;  %2381 = vmatprep.mubr.f32.mxu1 %v1767_v54 }
 0x205   : > { %1377 = vrot.lane.b32.xlu1 %v1282_v14, %s5927_s23  ;;  %1634 = vrot.lane.b32.xlu0 %v1539_v62, %s5927_s23  ;;  %v7136_v44 = vpop.f32.mrb[48].mxu0 }
 0x206   : > { %2382 = vmatmul.mubr.f32.vlgmr.msra.gmra.mrb[0].mxu1 %v1766_v48  ;;  %v7138_v42 = vpop.f32.mrb[49].mxu0 }
 0x207   : > { %v1322_v27 = vpop.permute.xlu1 %1321  ;;  %v1579_v43 = vpop.permute.xlu0 %1578  ;;  %v1772_v39 = vld [vmem:[#allocation3 + $0x40] sm:$0xff]  ;;  %v1771_v34 = vld [vmem:[#allocation3 + $0x38] sm:$0xff] }
 0x208   : > { %1414 = vst.msk [vmem:[#allocation3 + $0x88] sm:$0xff] %vm898_vm6, %v1322_v27  ;;  %1671 = vst.msk [vmem:[#allocation3 + $0x90] sm:$0xff] %vm898_vm6, %v1579_v43  ;;  %2386 = vmatprep.mubr.f32.mxu1 %v1772_v39 }
 0x20a   : > { %2387 = vmatmul.mubr.f32.gmra.mrb[2].mxu1 %v1771_v34  ;;  %v7142_v58 = vpop.f32.mrb[50].mxu0 }
 0x20b   : > { %v1324_v5 = vpop.permute.xlu1 %1323  ;;  %v1581_v10 = vpop.permute.xlu0 %1580  ;;  %v1777_v8 = vld [vmem:[#allocation3 + $0x68] sm:$0xff]  ;;  %v1776_v60 = vld [vmem:[#allocation3 + $0x60] sm:$0xff] }
 0x20c   : > { %1415 = vst.msk [vmem:[#allocation3 + $0xb0] sm:$0xff] %vm898_vm6, %v1324_v5  ;;  %1672 = vst.msk [vmem:[#allocation3 + $0xb8] sm:$0xff] %vm898_vm6, %v1581_v10  ;;  %2391 = vmatprep.mubr.f32.mxu1 %v1777_v8  ;;  %v7144_v17 = vpop.f32.mrb[51].mxu0 }
 0x20e   : > { %2392 = vmatmul.mubr.f32.gmra.mrb[4].mxu1 %v1776_v60  ;;  %v7148_v57 = vpop.f32.mrb[52].mxu0 }
 0x20f   : > { %v1326_v21 = vpop.permute.xlu1 %1325  ;;  %v1583_v36 = vpop.permute.xlu0 %1582  ;;  %v1782_v3 = vld [vmem:[#allocation3 + $0x90] sm:$0xff]  ;;  %v1781_v61 = vld [vmem:[#allocation3 + $0x88] sm:$0xff] }
 0x210   : > { %1416 = vst.msk [vmem:[#allocation3 + $0xd8] sm:$0xff] %vm898_vm6, %v1326_v21  ;;  %1673 = vst.msk [vmem:[#allocation3 + $0xe0] sm:$0xff] %vm898_vm6, %v1583_v36  ;;  %2396 = vmatprep.mubr.f32.mxu1 %v1782_v3  ;;  %v7150_v30 = vpop.f32.mrb[53].mxu0 }
 0x212   : > { %2397 = vmatmul.mubr.f32.gmra.mrb[6].mxu1 %v1781_v61  ;;  %v7154_v23 = vpop.f32.mrb[54].mxu0 }
 0x213   : > { %v1328_v25 = vpop.permute.xlu1 %1327  ;;  %v1585_v20 = vpop.permute.xlu0 %1584  ;;  %v1787_v47 = vld [vmem:[#allocation3 + $0xb8] sm:$0xff]  ;;  %v1786_v7 = vld [vmem:[#allocation3 + $0xb0] sm:$0xff] }
 0x214   : > { %1417 = vst.msk [vmem:[#allocation3 + $0x100] sm:$0xff] %vm898_vm6, %v1328_v25  ;;  %1674 = vst.msk [vmem:[#allocation3 + $0x108] sm:$0xff] %vm898_vm6, %v1585_v20  ;;  %2401 = vmatprep.mubr.f32.mxu1 %v1787_v47  ;;  %v7156_v38 = vpop.f32.mrb[55].mxu0 }
 0x216   : > { %2402 = vmatmul.mubr.f32.gmra.mrb[8].mxu1 %v1786_v7  ;;  %v7160_v24 = vpop.f32.mrb[56].mxu0 }
 0x217   : > { %v1330_v51 = vpop.permute.xlu1 %1329  ;;  %v1587_v33 = vpop.permute.xlu0 %1586  ;;  %v1792_v15 = vld [vmem:[#allocation3 + $0xe0] sm:$0xff]  ;;  %v1791_v63 = vld [vmem:[#allocation3 + $0xd8] sm:$0xff] }
 0x218   : > { %1418 = vst.msk [vmem:[#allocation3 + $0x128] sm:$0xff] %vm898_vm6, %v1330_v51  ;;  %1675 = vst.msk [vmem:[#allocation3 + $0x130] sm:$0xff] %vm898_vm6, %v1587_v33  ;;  %2406 = vmatprep.mubr.f32.mxu1 %v1792_v15  ;;  %v7162_v19 = vpop.f32.mrb[57].mxu0 }
 0x21a   : > { %2407 = vmatmul.mubr.f32.gmra.mrb[10].mxu1 %v1791_v63  ;;  %v7166_v16 = vpop.f32.mrb[58].mxu0 }
 0x21b   : > { %v1332_v40 = vpop.permute.xlu1 %1331  ;;  %v1589_v18 = vpop.permute.xlu0 %1588  ;;  %v1797_v29 = vld [vmem:[#allocation3 + $0x108] sm:$0xff]  ;;  %v1796_v35 = vld [vmem:[#allocation3 + $0x100] sm:$0xff] }
 0x21c   : > { %1419 = vst.msk [vmem:[#allocation3 + $0x150] sm:$0xff] %vm898_vm6, %v1332_v40  ;;  %1676 = vst.msk [vmem:[#allocation3 + $0x158] sm:$0xff] %vm898_vm6, %v1589_v18  ;;  %2411 = vmatprep.mubr.f32.mxu1 %v1797_v29  ;;  %v7168_v31 = vpop.f32.mrb[59].mxu0 }
 0x21e   : > { %2412 = vmatmul.mubr.f32.gmra.mrb[12].mxu1 %v1796_v35 }
 0x21f   : > { %v1334_v56 = vpop.permute.xlu1 %1333  ;;  %v1591_v32 = vpop.permute.xlu0 %1590  ;;  %v1802_v45 = vld [vmem:[#allocation3 + $0x130] sm:$0xff]  ;;  %v1801_v1 = vld [vmem:[#allocation3 + $0x128] sm:$0xff] }
 0x220   : > { %1420 = vst.msk [vmem:[#allocation3 + $0x178] sm:$0xff] %vm898_vm6, %v1334_v56  ;;  %1677 = vst.msk [vmem:[#allocation3 + $0x180] sm:$0xff] %vm898_vm6, %v1591_v32  ;;  %2416 = vmatprep.mubr.f32.mxu1 %v1802_v45  ;;  %v7172_v62 = vpop.f32.mrb[60].mxu0 }
 0x221   : > { %v7174_v0 = vpop.f32.mrb[61].mxu0 }
 0x222   : > { %2417 = vmatmul.mubr.f32.gmra.mrb[14].mxu1 %v1801_v1 }
 0x223   : > { %v1336_v54 = vpop.permute.xlu1 %1335  ;;  %v1593_v11 = vpop.permute.xlu0 %1592  ;;  %v1807_v14 = vld [vmem:[#allocation3 + $0x158] sm:$0xff]  ;;  %v1806_v13 = vld [vmem:[#allocation3 + $0x150] sm:$0xff] }
 0x224   : > { %1421 = vst.msk [vmem:[#allocation3 + $0x1a0] sm:$0xff] %vm898_vm6, %v1336_v54  ;;  %1678 = vst.msk [vmem:[#allocation3 + $0x1a8] sm:$0xff] %vm898_vm6, %v1593_v11  ;;  %2421 = vmatprep.mubr.f32.mxu1 %v1807_v14 }
 0x226   : > { %2422 = vmatmul.mubr.f32.gmra.mrb[16].mxu1 %v1806_v13 }
 0x227   : > { %v1338_v48 = vpop.permute.xlu1 %1337  ;;  %v1595_v27 = vpop.permute.xlu0 %1594  ;;  %v1812_v43 = vld [vmem:[#allocation3 + $0x180] sm:$0xff]  ;;  %v1811_v39 = vld [vmem:[#allocation3 + $0x178] sm:$0xff] }
 0x228   : > { %1422 = vst.msk [vmem:[#allocation3 + $0x1c8] sm:$0xff] %vm898_vm6, %v1338_v48  ;;  %1679 = vst.msk [vmem:[#allocation3 + $0x1d0] sm:$0xff] %vm898_vm6, %v1595_v27  ;;  %2426 = vmatprep.mubr.f32.mxu1 %v1812_v43 }
 0x22a   : > { %2427 = vmatmul.mubr.f32.gmra.mrb[18].mxu1 %v1811_v39 }
 0x22b   : > { %v1340_v34 = vpop.permute.xlu1 %1339  ;;  %v1597_v5 = vpop.permute.xlu0 %1596  ;;  %v1817_v10 = vld [vmem:[#allocation3 + $0x1a8] sm:$0xff]  ;;  %v1816_v8 = vld [vmem:[#allocation3 + $0x1a0] sm:$0xff] }
 0x22c   : > { %1423 = vst.msk [vmem:[#allocation3 + $0x1f0] sm:$0xff] %vm898_vm6, %v1340_v34  ;;  %1680 = vst.msk [vmem:[#allocation3 + $0x1f8] sm:$0xff] %vm898_vm6, %v1597_v5  ;;  %2431 = vmatprep.mubr.f32.mxu1 %v1817_v10 }
 0x22e   : > { %2432 = vmatmul.mubr.f32.gmra.mrb[20].mxu1 %v1816_v8 }
 0x22f   : > { %v1342_v60 = vpop.permute.xlu1 %1341  ;;  %v1599_v21 = vpop.permute.xlu0 %1598  ;;  %v1822_v36 = vld [vmem:[#allocation3 + $0x1d0] sm:$0xff]  ;;  %v1821_v3 = vld [vmem:[#allocation3 + $0x1c8] sm:$0xff] }
 0x230   : > { %1424 = vst.msk [vmem:[#allocation3 + $0x218] sm:$0xff] %vm898_vm6, %v1342_v60  ;;  %1681 = vst.msk [vmem:[#allocation3 + $0x220] sm:$0xff] %vm898_vm6, %v1599_v21  ;;  %2436 = vmatprep.mubr.f32.mxu1 %v1822_v36 }
 0x232   : > { %2437 = vmatmul.mubr.f32.gmra.mrb[22].mxu1 %v1821_v3 }
 0x233   : > { %v1344_v61 = vpop.permute.xlu1 %1343  ;;  %v1601_v25 = vpop.permute.xlu0 %1600  ;;  %v1827_v20 = vld [vmem:[#allocation3 + $0x1f8] sm:$0xff]  ;;  %v1826_v47 = vld [vmem:[#allocation3 + $0x1f0] sm:$0xff] }
 0x234   : > { %1425 = vst.msk [vmem:[#allocation3 + $0x240] sm:$0xff] %vm898_vm6, %v1344_v61  ;;  %1682 = vst.msk [vmem:[#allocation3 + $0x248] sm:$0xff] %vm898_vm6, %v1601_v25  ;;  %2441 = vmatprep.mubr.f32.mxu1 %v1827_v20 }
 0x236   : > { %2442 = vmatmul.mubr.f32.gmra.mrb[24].mxu1 %v1826_v47 }
 0x237   : > { %v1346_v7 = vpop.permute.xlu1 %1345  ;;  %v1603_v51 = vpop.permute.xlu0 %1602  ;;  %v1832_v33 = vld [vmem:[#allocation3 + $0x220] sm:$0xff]  ;;  %v1831_v15 = vld [vmem:[#allocation3 + $0x218] sm:$0xff] }
 0x238   : > { %1426 = vst.msk [vmem:[#allocation3 + $0x268] sm:$0xff] %vm898_vm6, %v1346_v7  ;;  %1683 = vst.msk [vmem:[#allocation3 + $0x270] sm:$0xff] %vm898_vm6, %v1603_v51  ;;  %2446 = vmatprep.mubr.f32.mxu1 %v1832_v33 }
 0x23a   : > { %2447 = vmatmul.mubr.f32.gmra.mrb[26].mxu1 %v1831_v15 }
 0x23b   : > { %v1348_v63 = vpop.permute.xlu1 %1347  ;;  %v1605_v40 = vpop.permute.xlu0 %1604  ;;  %v1837_v18 = vld [vmem:[#allocation3 + $0x248] sm:$0xff]  ;;  %v1836_v29 = vld [vmem:[#allocation3 + $0x240] sm:$0xff] }
 0x23c   : > { %1427 = vst.msk [vmem:[#allocation3 + $0x290] sm:$0xff] %vm898_vm6, %v1348_v63  ;;  %1684 = vst.msk [vmem:[#allocation3 + $0x298] sm:$0xff] %vm898_vm6, %v1605_v40  ;;  %2451 = vmatprep.mubr.f32.mxu1 %v1837_v18  ;;  %v2863_v18 = vld [vmem:[#allocation2 + $0x1] sm:$0xff] }
 0x23d   : > { %2927 = vrot.lane.b32.xlu1 %v2863_v18, %s5927_s23  ;;  %v4116_v18 = vld [vmem:[%s8437_s3 + $0x228] sm:$0xff] }
 0x23e   : > { %2452 = vmatmul.mubr.f32.gmra.mrb[28].mxu1 %v1836_v29 }
 0x23f   : > { %v1350_v35 = vpop.permute.xlu1 %1349  ;;  %v1607_v56 = vpop.permute.xlu0 %1606  ;;  %v1842_v32 = vld [vmem:[#allocation3 + $0x270] sm:$0xff]  ;;  %v1841_v45 = vld [vmem:[#allocation3 + $0x268] sm:$0xff] }
 0x240   : > { %1428 = vst.msk [vmem:[#allocation3 + $0x2b8] sm:$0xff] %vm898_vm6, %v1350_v35  ;;  %1685 = vst.msk [vmem:[#allocation3 + $0x2c0] sm:$0xff] %vm898_vm6, %v1607_v56  ;;  %2456 = vmatprep.mubr.f32.mxu1 %v1842_v32 }
 0x242   : > { %2457 = vmatmul.mubr.f32.gmra.mrb[30].mxu1 %v1841_v45  ;;  %v2864_v45 = vld [vmem:[#allocation2 + $0x9] sm:$0xff] }
 0x243   : > { %v1352_v1 = vpop.permute.xlu1 %1351  ;;  %v1609_v54 = vpop.permute.xlu0 %1608  ;;  %v1847_v11 = vld [vmem:[#allocation3 + $0x298] sm:$0xff]  ;;  %v1846_v14 = vld [vmem:[#allocation3 + $0x290] sm:$0xff]  ;;  %2929 = vrot.lane.b32.xlu1 %v2864_v45, %s5927_s23 }
 0x244   : > { %1429 = vst.msk [vmem:[#allocation3 + $0x2e0] sm:$0xff] %vm898_vm6, %v1352_v1  ;;  %1686 = vst.msk [vmem:[#allocation3 + $0x2e8] sm:$0xff] %vm898_vm6, %v1609_v54  ;;  %2461 = vmatprep.mubr.f32.mxu1 %v1847_v11 }
 0x246   : > { %2462 = vmatmul.mubr.f32.gmra.mrb[32].mxu1 %v1846_v14 }
 0x247   : > { %v1354_v13 = vpop.permute.xlu1 %1353  ;;  %v1611_v48 = vpop.permute.xlu0 %1610  ;;  %v1852_v27 = vld [vmem:[#allocation3 + $0x2c0] sm:$0xff]  ;;  %v1851_v43 = vld [vmem:[#allocation3 + $0x2b8] sm:$0xff] }
 0x248   : > { %1430 = vst.msk [vmem:[#allocation3 + $0x308] sm:$0xff] %vm898_vm6, %v1354_v13  ;;  %1687 = vst.msk [vmem:[#allocation3 + $0x310] sm:$0xff] %vm898_vm6, %v1611_v48  ;;  %2466 = vmatprep.mubr.f32.mxu1 %v1852_v27 }
 0x24a   : > { %2467 = vmatmul.mubr.f32.gmra.mrb[34].mxu1 %v1851_v43 }
 0x24b   : > { %v1356_v39 = vpop.permute.xlu1 %1355  ;;  %v1613_v34 = vpop.permute.xlu0 %1612  ;;  %v1857_v5 = vld [vmem:[#allocation3 + $0x2e8] sm:$0xff]  ;;  %v1856_v10 = vld [vmem:[#allocation3 + $0x2e0] sm:$0xff] }
 0x24c   : > { %1431 = vst.msk [vmem:[#allocation3 + $0x330] sm:$0xff] %vm898_vm6, %v1356_v39  ;;  %1688 = vst.msk [vmem:[#allocation3 + $0x338] sm:$0xff] %vm898_vm6, %v1613_v34  ;;  %2471 = vmatprep.mubr.f32.mxu1 %v1857_v5 }
 0x24e   : > { %2472 = vmatmul.mubr.f32.gmra.mrb[36].mxu1 %v1856_v10 }
 0x24f   : > { %v1358_v8 = vpop.permute.xlu1 %1357  ;;  %v1615_v60 = vpop.permute.xlu0 %1614  ;;  %v1862_v21 = vld [vmem:[#allocation3 + $0x310] sm:$0xff]  ;;  %v1861_v36 = vld [vmem:[#allocation3 + $0x308] sm:$0xff] }
 0x250   : > { %1432 = vst.msk [vmem:[#allocation3 + $0x358] sm:$0xff] %vm898_vm6, %v1358_v8  ;;  %1689 = vst.msk [vmem:[#allocation3 + $0x360] sm:$0xff] %vm898_vm6, %v1615_v60  ;;  %2476 = vmatprep.mubr.f32.mxu1 %v1862_v21  ;;  %v4111_v8 = vld [vmem:[%s8437_s3 + $0x200] sm:$0xff]  ;;  %v4112_v60 = vld [vmem:[%s8437_s3 + $0x208] sm:$0xff] }
 0x252   : > { %2477 = vmatmul.mubr.f32.gmra.mrb[38].mxu1 %v1861_v36  ;;  %v5635_v36 = vpack.c.bf16 %v4112_v60, %v4111_v8  ;;  %v4050_v8 = vld [vmem:[%s8437_s3 + $0x18] sm:$0xff] }
 0x253   : > { %v1360_v3 = vpop.permute.xlu1 %1359  ;;  %v1617_v61 = vpop.permute.xlu0 %1616  ;;  %v1867_v25 = vld [vmem:[#allocation3 + $0x338] sm:$0xff]  ;;  %v1866_v20 = vld [vmem:[#allocation3 + $0x330] sm:$0xff] }
 0x254   : > { %1433 = vst.msk [vmem:[#allocation3 + $0x380] sm:$0xff] %vm898_vm6, %v1360_v3  ;;  %1690 = vst.msk [vmem:[#allocation3 + $0x388] sm:$0xff] %vm898_vm6, %v1617_v61  ;;  %2481 = vmatprep.mubr.f32.mxu1 %v1867_v25  ;;  %5636 = vmatprep.subr.bf16.mxu1 %v5635_v36 }
 0x255   : > { %5638 = vmatpush3.bf16.msra.mxu1 %v5635_v36  ;;  %v4052_v36 = vld [vmem:[%s8437_s3 + $0x28] sm:$0xff] }
 0x256   : > { %2482 = vmatmul.mubr.f32.gmra.mrb[40].mxu1 %v1866_v20  ;;  %v4113_v20 = vld [vmem:[%s8437_s3 + $0x210] sm:$0xff] }
 0x257   : > { %v1362_v47 = vpop.permute.xlu1 %1361  ;;  %v1619_v7 = vpop.permute.xlu0 %1618  ;;  %v1872_v51 = vld [vmem:[#allocation3 + $0x360] sm:$0xff]  ;;  %v1871_v33 = vld [vmem:[#allocation3 + $0x358] sm:$0xff] }
 0x258   : > { %1434 = vst.msk [vmem:[#allocation3 + $0x3a8] sm:$0xff] %vm898_vm6, %v1362_v47  ;;  %1691 = vst.msk [vmem:[#allocation3 + $0x3b0] sm:$0xff] %vm898_vm6, %v1619_v7  ;;  %2486 = vmatprep.mubr.f32.mxu1 %v1872_v51  ;;  %v4114_v47 = vld [vmem:[%s8437_s3 + $0x218] sm:$0xff] }
 0x259   : > { %v5639_v51 = vpack.c.bf16 %v4114_v47, %v4113_v20  ;;  %v4055_v47 = vld [vmem:[%s8437_s3 + $0x40] sm:$0xff] }
 0x25a   : > { %2487 = vmatmul.mubr.f32.gmra.mrb[42].mxu1 %v1871_v33 }
 0x25b   : > { %v1364_v15 = vpop.permute.xlu1 %1363  ;;  %v1621_v63 = vpop.permute.xlu0 %1620  ;;  %v1877_v40 = vld [vmem:[#allocation3 + $0x388] sm:$0xff]  ;;  %v1876_v29 = vld [vmem:[#allocation3 + $0x380] sm:$0xff]  ;;  %5640 = vmatprep.subr.bf16.mxu1 %v5639_v51 }
 0x25c   : > { %1435 = vst.msk [vmem:[#allocation3 + $0x3d0] sm:$0xff] %vm898_vm6, %v1364_v15  ;;  %1692 = vst.msk [vmem:[#allocation3 + $0x3d8] sm:$0xff] %vm898_vm6, %v1621_v63  ;;  %2491 = vmatprep.mubr.f32.mxu1 %v1877_v40  ;;  %5642 = vmatpush3.bf16.msra.mxu1 %v5639_v51  ;;  %v4115_v40 = vld [vmem:[%s8437_s3 + $0x220] sm:$0xff] }
 0x25e   : > { %2492 = vmatmul.mubr.f32.gmra.mrb[44].mxu1 %v1876_v29 }
 0x25f   : > { %v1366_v35 = vpop.permute.xlu1 %1365  ;;  %v1623_v56 = vpop.permute.xlu0 %1622  ;;  %v1882_v32 = vld [vmem:[#allocation3 + $0x3b0] sm:$0xff]  ;;  %v1881_v1 = vld [vmem:[#allocation3 + $0x3a8] sm:$0xff] }
 0x260   : > { %1436 = vst.msk [vmem:[#allocation3 + $0x3f8] sm:$0xff] %vm898_vm6, %v1366_v35  ;;  %1693 = vst.msk [vmem:[#allocation3 + $0x400] sm:$0xff] %vm898_vm6, %v1623_v56  ;;  %2496 = vmatprep.mubr.f32.mxu1 %v1882_v32  ;;  %v5643_v35 = vpack.c.bf16 %v4116_v18, %v4115_v40  ;;  %v4059_v40 = vld [vmem:[%s8437_s3 + $0x60] sm:$0xff]  ;;  %v4060_v18 = vld [vmem:[%s8437_s3 + $0x68] sm:$0xff] }
 0x262   : > { %2497 = vmatmul.mubr.f32.gmra.mrb[46].mxu1 %v1881_v1  ;;  %5644 = vmatprep.subr.bf16.mxu1 %v5643_v35  ;;  %v4117_v1 = vld [vmem:[%s8437_s3 + $0x230] sm:$0xff] }
 0x263   : > { %v1368_v54 = vpop.permute.xlu1 %1367  ;;  %v1625_v11 = vpop.permute.xlu0 %1624  ;;  %v1887_v14 = vld [vmem:[#allocation3 + $0x3d8] sm:$0xff]  ;;  %v1886_v13 = vld [vmem:[#allocation3 + $0x3d0] sm:$0xff]  ;;  %5646 = vmatpush3.bf16.msra.mxu1 %v5643_v35  ;;  %v4061_v35 = vld [vmem:[%s8437_s3 + $0x70] sm:$0xff] }
 0x264   : > { %1437 = vst.msk [vmem:[#allocation3 + $0x420] sm:$0xff] %vm898_vm6, %v1368_v54  ;;  %1694 = vst.msk [vmem:[#allocation3 + $0x428] sm:$0xff] %vm898_vm6, %v1625_v11  ;;  %2501 = vmatprep.mubr.f32.mxu1 %v1887_v14  ;;  %v4118_v54 = vld [vmem:[%s8437_s3 + $0x238] sm:$0xff] }
 0x265   : > { %v5647_v14 = vpack.c.bf16 %v4118_v54, %v4117_v1  ;;  %v4064_v1 = vld [vmem:[%s8437_s3 + $0x88] sm:$0xff] }
 0x266   : > { %2502 = vmatmul.mubr.f32.gmra.mrb[48].mxu1 %v1886_v13 }
 0x267   : > { %v1370_v48 = vpop.permute.xlu1 %1369  ;;  %v1627_v27 = vpop.permute.xlu0 %1626  ;;  %v1892_v43 = vld [vmem:[#allocation3 + $0x400] sm:$0xff]  ;;  %v1891_v39 = vld [vmem:[#allocation3 + $0x3f8] sm:$0xff]  ;;  %5648 = vmatprep.subr.bf16.mxu1 %v5647_v14 }
 0x268   : > { %1438 = vst.msk [vmem:[#allocation3 + $0x448] sm:$0xff] %vm898_vm6, %v1370_v48  ;;  %1695 = vst.msk [vmem:[#allocation3 + $0x450] sm:$0xff] %vm898_vm6, %v1627_v27  ;;  %2506 = vmatprep.mubr.f32.mxu1 %v1892_v43  ;;  %5650 = vmatpush3.bf16.msra.mxu1 %v5647_v14  ;;  %v4066_v14 = vld [vmem:[%s8437_s3 + $0x98] sm:$0xff] }
 0x26a   : > { %2507 = vmatmul.mubr.f32.gmra.mrb[50].mxu1 %v1891_v39  ;;  %v4047_v39 = vld [vmem:[%s8437_s3] sm:$0xff] }
 0x26b   : > { %v1372_v34 = vpop.permute.xlu1 %1371  ;;  %v1629_v5 = vpop.permute.xlu0 %1628  ;;  %v1897_v10 = vld [vmem:[#allocation3 + $0x428] sm:$0xff]  ;;  %v1896_v21 = vld [vmem:[#allocation3 + $0x420] sm:$0xff] }
 0x26c   : > { %1439 = vst.msk [vmem:[#allocation3 + $0x470] sm:$0xff] %vm898_vm6, %v1372_v34  ;;  %1696 = vst.msk [vmem:[#allocation3 + $0x478] sm:$0xff] %vm898_vm6, %v1629_v5  ;;  %2511 = vmatprep.mubr.f32.mxu1 %v1897_v10  ;;  %v4048_v34 = vld [vmem:[%s8437_s3 + $0x8] sm:$0xff]  ;;  %v4049_v10 = vld [vmem:[%s8437_s3 + $0x10] sm:$0xff] }
 0x26d   : > { %v5540_v5 = vpack.c.bf16 %v4048_v34, %v4047_v39  ;;  %v5543_v60 = vpack.c.bf16 %v4050_v8, %v4049_v10  ;;  %v4069_v39 = vld [vmem:[%s8437_s3 + $0xb0] sm:$0xff]  ;;  %v4070_v34 = vld [vmem:[%s8437_s3 + $0xb8] sm:$0xff]  ;;  %v2799_v10 = vld [vmem:[#allocation2] sm:$0xff] }
 0x26e   : > { %2512 = vmatmul.mubr.f32.gmra.mrb[52].mxu1 %v1896_v21  ;;  %v4051_v21 = vld [vmem:[%s8437_s3 + $0x20] sm:$0xff]  ;;  %2831 = vst.msk [vmem:[#allocation3] sm:$0xff] %vm223_vm1, %v2799_v10 }
 0x26f   : > { %v1374_v3 = vpop.permute.xlu1 %1373  ;;  %v1631_v61 = vpop.permute.xlu0 %1630  ;;  %v1902_v25 = vld [vmem:[#allocation3 + $0x450] sm:$0xff]  ;;  %v1901_v7 = vld [vmem:[#allocation3 + $0x448] sm:$0xff]  ;;  %5541 = vmatpush1.bf16.msra.mxu0 %v5540_v5  ;;  %v5573_v5 = vpack.c.bf16 %v4070_v34, %v4069_v39 }
 0x270   : > { %1440 = vst.msk [vmem:[#allocation3 + $0x498] sm:$0xff] %vm898_vm6, %v1374_v3  ;;  %1697 = vst.msk [vmem:[#allocation3 + $0x4a0] sm:$0xff] %vm898_vm6, %v1631_v61  ;;  %2516 = vmatprep.mubr.f32.mxu1 %v1902_v25  ;;  %5542 = vmatprep.subr.bf16.mxu0 %v8458_v49  ;;  %v5546_v3 = vpack.c.bf16 %v4052_v36, %v4051_v21  ;;  %v4053_v61 = vld [vmem:[%s8437_s3 + $0x30] sm:$0xff]  ;;  %v4054_v25 = vld [vmem:[%s8437_s3 + $0x38] sm:$0xff] }
 0x271   : > { %v5549_v20 = vpack.c.bf16 %v4054_v25, %v4053_v61  ;;  %v4072_v21 = vld [vmem:[%s8437_s3 + $0xc8] sm:$0xff]  ;;  %v4073_v61 = vld [vmem:[%s8437_s3 + $0xd0] sm:$0xff]  ;;  %v4074_v25 = vld [vmem:[%s8437_s3 + $0xd8] sm:$0xff] }
 0x272   : > { %2517 = vmatmul.mubr.f32.gmra.mrb[54].mxu1 %v1901_v7  ;;  %v4056_v7 = vld [vmem:[%s8437_s3 + $0x48] sm:$0xff] }
 0x273   : > { %v1376_v33 = vpop.permute.xlu1 %1375  ;;  %v1907_v15 = vld [vmem:[#allocation3 + $0x478] sm:$0xff]  ;;  %v1633_v63 = vpop.permute.xlu0 %1632  ;;  %v1906_v29 = vld [vmem:[#allocation3 + $0x470] sm:$0xff]  ;;  %5544 = vmatpush1.bf16.msra.mxu0 %v5543_v60  ;;  %v5552_v51 = vpack.c.bf16 %v4056_v7, %v4055_v47  ;;  %v5579_v47 = vpack.c.bf16 %v4074_v25, %v4073_v61 }
 0x274   : > { %1441 = vst.msk [vmem:[#allocation3 + $0x4c0] sm:$0xff] %vm898_vm6, %v1376_v33  ;;  %2521 = vmatprep.mubr.f32.mxu1 %v1907_v15  ;;  %1698 = vst.msk [vmem:[#allocation3 + $0x4c8] sm:$0xff] %vm898_vm6, %v1633_v63  ;;  %5545 = vmatprep.subr.bf16.mxu0 %v8458_v49  ;;  %v4057_v33 = vld [vmem:[%s8437_s3 + $0x50] sm:$0xff]  ;;  %v4058_v15 = vld [vmem:[%s8437_s3 + $0x58] sm:$0xff] }
 0x275   : > { %v5555_v63 = vpack.c.bf16 %v4058_v15, %v4057_v33  ;;  %v4071_v60 = vld [vmem:[%s8437_s3 + $0xc0] sm:$0xff]  ;;  %v4076_v15 = vld [vmem:[%s8437_s3 + $0xe8] sm:$0xff] }
 0x276   : > { %2522 = vmatmul.mubr.f32.gmra.mrb[56].mxu1 %v1906_v29  ;;  %v5558_v29 = vpack.c.bf16 %v4060_v18, %v4059_v40  ;;  %v5576_v36 = vpack.c.bf16 %v4072_v21, %v4071_v60  ;;  %v4075_v33 = vld [vmem:[%s8437_s3 + $0xe0] sm:$0xff] }
 0x277   : > { %v1378_v56 = vpop.permute.xlu1 %1377  ;;  %v1912_v32 = vld [vmem:[#allocation3 + $0x4a0] sm:$0xff]  ;;  %v1635_v45 = vpop.permute.xlu0 %1634  ;;  %v1911_v11 = vld [vmem:[#allocation3 + $0x498] sm:$0xff]  ;;  %5547 = vmatpush1.bf16.msra.mxu0 %v5546_v3  ;;  %v5582_v18 = vpack.c.bf16 %v4076_v15, %v4075_v33 }
 0x278   : > { %1442 = vst.msk [vmem:[#allocation3 + $0x4e8] sm:$0xff] %vm898_vm6, %v1378_v56  ;;  %2526 = vmatprep.mubr.f32.mxu1 %v1912_v32  ;;  %1699 = vst.msk [vmem:[#allocation3 + $0x4f0] sm:$0xff] %vm898_vm6, %v1635_v45  ;;  %5548 = vmatprep.subr.bf16.mxu0 %v8458_v49  ;;  %v4062_v56 = vld [vmem:[%s8437_s3 + $0x78] sm:$0xff]  ;;  %v4063_v45 = vld [vmem:[%s8437_s3 + $0x80] sm:$0xff] }
 0x279   : > { %v5561_v32 = vpack.c.bf16 %v4062_v56, %v4061_v35  ;;  %v5564_v54 = vpack.c.bf16 %v4064_v1, %v4063_v45  ;;  %v2800_v3 = vld [vmem:[#allocation2 + $0x8] sm:$0xff]  ;;  %v4078_v45 = vld [vmem:[%s8437_s3 + $0xf8] sm:$0xff] }
 0x27a   : > { %2527 = vmatmul.mubr.f32.gmra.mrb[58].mxu1 %v1911_v11  ;;  %v4065_v11 = vld [vmem:[%s8437_s3 + $0x90] sm:$0xff]  ;;  %2832 = vst.msk [vmem:[#allocation3 + $0x28] sm:$0xff] %vm223_vm1, %v2800_v3 }
 0x27b   : > { %v1917_v13 = vld [vmem:[#allocation3 + $0x4c8] sm:$0xff]  ;;  %v1916_v48 = vld [vmem:[#allocation3 + $0x4c0] sm:$0xff]  ;;  %5550 = vmatpush1.bf16.msra.mxu0 %v5549_v20 }
 0x27c   : > { %2531 = vmatprep.mubr.f32.mxu1 %v1917_v13  ;;  %5551 = vmatprep.subr.bf16.mxu0 %v8458_v49  ;;  %v5567_v13 = vpack.c.bf16 %v4066_v14, %v4065_v11  ;;  %v3056_v56 = vld [vmem:[#allocation2 + $0xa] sm:$0xff] }
 0x27d   : > { %3088 = vst.msk [vmem:[#allocation3 + $0x30] sm:$0xff] %vm223_vm1, %v3056_v56 }
 0x27e   : > { %2532 = vmatmul.mubr.f32.gmra.mrb[60].mxu1 %v1916_v48  ;;  %v4067_v48 = vld [vmem:[%s8437_s3 + $0xa0] sm:$0xff] }
 0x27f   : > { %v1922_v27 = vld [vmem:[#allocation3 + $0x4f0] sm:$0xff]  ;;  %v1921_v43 = vld [vmem:[#allocation3 + $0x4e8] sm:$0xff]  ;;  %5553 = vmatpush1.bf16.msra.mxu0 %v5552_v51 }
 0x280   : > { %2536 = vmatprep.mubr.f32.mxu1 %v1922_v27  ;;  %5554 = vmatprep.subr.bf16.mxu0 %v8458_v49  ;;  %v4068_v27 = vld [vmem:[%s8437_s3 + $0xa8] sm:$0xff] }
 0x281   : > { %v3055_v51 = vld [vmem:[#allocation2 + $0x2] sm:$0xff] }
 0x282   : > { %2537 = vmatmul.mubr.f32.gmra.mrb[62].mxu1 %v1921_v43  ;;  %v5570_v43 = vpack.c.bf16 %v4068_v27, %v4067_v48  ;;  %3087 = vst.msk [vmem:[#allocation3 + $0x8] sm:$0xff] %vm223_vm1, %v3055_v51 }
 0x283   : > { %5556 = vmatpush1.bf16.msra.mxu0 %v5555_v63 }
 0x284   : > { %5557 = vmatprep.subr.bf16.mxu0 %v8458_v49 }
 0x287   : > { %5559 = vmatpush1.bf16.msra.mxu0 %v5558_v29 }
 0x288   : > { %5560 = vmatprep.subr.bf16.mxu0 %v8458_v49 }
 0x28b   : > { %5562 = vmatpush1.bf16.msra.mxu0 %v5561_v32  ;;  %v4077_v32 = vld [vmem:[%s8437_s3 + $0xf0] sm:$0xff] }
 0x28c   : > { %5563 = vmatprep.subr.bf16.mxu0 %v8458_v49 }
 0x28f   : > { %5565 = vmatpush1.bf16.msra.mxu0 %v5564_v54  ;;  %v5585_v54 = vpack.c.bf16 %v4078_v45, %v4077_v32 }
 0x290   : > { %5566 = vmatprep.subr.bf16.mxu0 %v8458_v49 }
 0x293   : > { %5568 = vmatpush1.bf16.msra.mxu0 %v5567_v13 }
 0x294   : > { %5569 = vmatprep.subr.bf16.mxu0 %v8458_v49 }
 0x297   : > { %5571 = vmatpush1.bf16.msra.mxu0 %v5570_v43 }
 0x298   : > { %5572 = vmatprep.subr.bf16.mxu0 %v8458_v49 }
 0x29b   : > { %5574 = vmatpush1.bf16.msra.mxu0 %v5573_v5 }
 0x29c   : > { %5575 = vmatprep.subr.bf16.mxu0 %v8458_v49 }
 0x29f   : > { %5577 = vmatpush1.bf16.msra.mxu0 %v5576_v36 }
 0x2a0   : > { %5578 = vmatprep.subr.bf16.mxu0 %v8458_v49 }
 0x2a3   : > { %5580 = vmatpush1.bf16.msra.mxu0 %v5579_v47 }
 0x2a4   : > { %5581 = vmatprep.subr.bf16.mxu0 %v8458_v49 }
 0x2a7   : > { %5583 = vmatpush1.bf16.msra.mxu0 %v5582_v18 }
 0x2a8   : > { %5584 = vmatprep.subr.bf16.mxu0 %v8458_v49 }
 0x2ab   : > { %5586 = vmatpush1.bf16.msra.mxu0 %v5585_v54 }
 0x2ac   : > { %5587 = vmatprep.subr.bf16.mxu0 %v8458_v49 }
 0x2af   : > { %v2928_v8 = vpop.permute.xlu1 %2927 }
 0x2b0   : > { %3023 = vst.msk [vmem:[#allocation3] sm:$0xff] %vm898_vm6, %v2928_v8 }
 0x2b5   : > { %v2930_v20 = vpop.permute.xlu1 %2929 }
 0x2b6   : > { %3024 = vst.msk [vmem:[#allocation3 + $0x28] sm:$0xff] %vm898_vm6, %v2930_v20 }
 0x2b9   : > { %v7347_v7 = vpop.f32.mrb[62].mxu0 }
 0x2ba   : > { %v7356_v40 = vpop.f32.mrb[63].mxu0 }
 0x2d9   : > { %v2383_v63 = vpop.f32.mrb[0].mxu1 }
 0x2da   : > { %v2609_v29 = vadd.f32 %v7060_v55, %v2383_v63  ;;  %v2385_v35 = vpop.f32.mrb[1].mxu1 }
 0x2dc   : > { %2767 = vst.msk [vmem:[#allocation2 + $0x19] sm:$0xff] %vm223_vm1, %v2609_v29 }
 0x2dd   : > { %v2388_v1 = vpop.f32.mrb[2].mxu1 }
 0x2de   : > { %v2614_v55 = vadd.f32 %v7056_v41, %v2388_v1  ;;  %v2390_v11 = vpop.f32.mrb[3].mxu1 }
 0x2e0   : > { %2768 = vst.msk [vmem:[#allocation2 + $0x21] sm:$0xff] %vm223_vm1, %v2614_v55 }
 0x2e1   : > { %v2393_v14 = vpop.f32.mrb[4].mxu1 }
 0x2e2   : > { %v2619_v13 = vadd.f32 %v7070_v52, %v2393_v14  ;;  %v2395_v48 = vpop.f32.mrb[5].mxu1 }
 0x2e3   : > { %v3119_v27 = vld [vmem:[#allocation2 + $0x18] sm:$0xff] }
 0x2e4   : > { %v2865_v43 = vld [vmem:[#allocation2 + $0x19] sm:$0xff]  ;;  %2769 = vst.msk [vmem:[#allocation2 + $0x31] sm:$0xff] %vm223_vm1, %v2619_v13  ;;  %3183 = vrot.lane.b32.xlu0 %v3119_v27, %s5927_s23  ;;  %2833 = vst.msk [vmem:[#allocation3 + $0x50] sm:$0xff] %vm223_vm1, %v3119_v27 }
 0x2e5   : > { %v3311_v39 = vld [vmem:[#allocation2 + $0x19] sm:$0xff]  ;;  %2931 = vrot.lane.b32.xlu1 %v2865_v43, %s5927_s23  ;;  %v2398_v41 = vpop.f32.mrb[6].mxu1 }
 0x2e6   : > { %3343 = vst.msk [vmem:[#allocation3 + $0x10] sm:$0xff] %vm223_vm1, %v3311_v39  ;;  %v2624_v34 = vadd.f32 %v7066_v2, %v2398_v41  ;;  %v2400_v5 = vpop.f32.mrb[7].mxu1 }
 0x2e7   : > { %v3120_v10 = vld [vmem:[#allocation2 + $0x20] sm:$0xff] }
 0x2e8   : > { %v2866_v52 = vld [vmem:[#allocation2 + $0x21] sm:$0xff]  ;;  %2770 = vst.msk [vmem:[#allocation2 + $0x39] sm:$0xff] %vm223_vm1, %v2624_v34  ;;  %3185 = vrot.lane.b32.xlu0 %v3120_v10, %s5927_s23  ;;  %2834 = vst.msk [vmem:[#allocation3 + $0x78] sm:$0xff] %vm223_vm1, %v3120_v10 }
 0x2e9   : > { %v7379_v8 = vld [vmem:[#allocation2 + $0x1a] sm:$0xff]  ;;  %2933 = vrot.lane.b32.xlu1 %v2866_v52, %s5927_s23  ;;  %v7387_v60 = vld [vmem:[#allocation2 + $0x22] sm:$0xff]  ;;  %v2403_v2 = vpop.f32.mrb[8].mxu1 }
 0x2ea   : > { %3089 = vst.msk [vmem:[#allocation3 + $0x58] sm:$0xff] %vm223_vm1, %v7379_v8  ;;  %v3312_v21 = vld [vmem:[#allocation2 + $0x21] sm:$0xff]  ;;  %3090 = vst.msk [vmem:[#allocation3 + $0x80] sm:$0xff] %vm223_vm1, %v7387_v60  ;;  %v2629_v36 = vadd.f32 %v7080_v59, %v2403_v2  ;;  %v2405_v3 = vpop.f32.mrb[9].mxu1 }
 0x2eb   : > { %3344 = vst.msk [vmem:[#allocation3 + $0x38] sm:$0xff] %vm223_vm1, %v3312_v21  ;;  %v3121_v61 = vld [vmem:[#allocation2 + $0x30] sm:$0xff] }
 0x2ec   : > { %v2867_v25 = vld [vmem:[#allocation2 + $0x31] sm:$0xff]  ;;  %2771 = vst.msk [vmem:[#allocation2 + $0x49] sm:$0xff] %vm223_vm1, %v2629_v36  ;;  %3187 = vrot.lane.b32.xlu0 %v3121_v61, %s5927_s23  ;;  %2835 = vst.msk [vmem:[#allocation3 + $0xa0] sm:$0xff] %vm223_vm1, %v3121_v61 }
 0x2ed   : > { %v3313_v20 = vld [vmem:[#allocation2 + $0x31] sm:$0xff]  ;;  %2935 = vrot.lane.b32.xlu1 %v2867_v25, %s5927_s23  ;;  %v2408_v51 = vpop.f32.mrb[10].mxu1 }
 0x2ee   : > { %3345 = vst.msk [vmem:[#allocation3 + $0x60] sm:$0xff] %vm223_vm1, %v3313_v20  ;;  %v3567_v47 = vld [vmem:[#allocation2 + $0x30] sm:$0xff]  ;;  %v2634_v59 = vadd.f32 %v7076_v6, %v2408_v51  ;;  %v2410_v33 = vpop.f32.mrb[11].mxu1 }
 0x2ef   : > { %3599 = vst.msk [vmem:[#allocation3 + $0x18] sm:$0xff] %vm223_vm1, %v3567_v47  ;;  %v3122_v15 = vld [vmem:[#allocation2 + $0x38] sm:$0xff] }
 0x2f0   : > { %v2868_v63 = vld [vmem:[#allocation2 + $0x39] sm:$0xff]  ;;  %2772 = vst.msk [vmem:[#allocation2 + $0x51] sm:$0xff] %vm223_vm1, %v2634_v59  ;;  %3189 = vrot.lane.b32.xlu0 %v3122_v15, %s5927_s23  ;;  %2836 = vst.msk [vmem:[#allocation3 + $0xc8] sm:$0xff] %vm223_vm1, %v3122_v15 }
 0x2f1   : > { %v7400_v18 = vld [vmem:[#allocation2 + $0x32] sm:$0xff]  ;;  %2937 = vrot.lane.b32.xlu1 %v2868_v63, %s5927_s23  ;;  %v7407_v29 = vld [vmem:[#allocation2 + $0x3a] sm:$0xff]  ;;  %v2413_v56 = vpop.f32.mrb[12].mxu1 }
 0x2f2   : > { %3855 = vst.msk [vmem:[#allocation3 + $0x20] sm:$0xff] %vm223_vm1, %v7400_v18  ;;  %3091 = vst.msk [vmem:[#allocation3 + $0xa8] sm:$0xff] %vm223_vm1, %v7400_v18  ;;  %v3314_v6 = vld [vmem:[#allocation2 + $0x39] sm:$0xff]  ;;  %v2639_v32 = vadd.f32 %v7091_v50, %v2413_v56  ;;  %v2415_v45 = vpop.f32.mrb[13].mxu1 }
 0x2f3   : > { %v3568_v35 = vld [vmem:[#allocation2 + $0x38] sm:$0xff]  ;;  %3856 = vst.msk [vmem:[#allocation3 + $0x48] sm:$0xff] %vm223_vm1, %v7407_v29  ;;  %3092 = vst.msk [vmem:[#allocation3 + $0xd0] sm:$0xff] %vm223_vm1, %v7407_v29  ;;  %v3123_v1 = vld [vmem:[#allocation2 + $0x48] sm:$0xff] }
 0x2f4   : > { %3346 = vst.msk [vmem:[#allocation3 + $0x88] sm:$0xff] %vm223_vm1, %v3314_v6  ;;  %3600 = vst.msk [vmem:[#allocation3 + $0x40] sm:$0xff] %vm223_vm1, %v3568_v35  ;;  %v2869_v54 = vld [vmem:[#allocation2 + $0x49] sm:$0xff]  ;;  %3191 = vrot.lane.b32.xlu0 %v3123_v1, %s5927_s23 }
 0x2f5   : > { %v3315_v55 = vld [vmem:[#allocation2 + $0x49] sm:$0xff]  ;;  %2773 = vst.msk [vmem:[#allocation2 + $0x61] sm:$0xff] %vm223_vm1, %v2639_v32  ;;  %2939 = vrot.lane.b32.xlu1 %v2869_v54, %s5927_s23  ;;  %2837 = vst.msk [vmem:[#allocation3 + $0xf0] sm:$0xff] %vm223_vm1, %v3123_v1  ;;  %v2418_v14 = vpop.f32.mrb[14].mxu1 }
 0x2f6   : > { %3347 = vst.msk [vmem:[#allocation3 + $0xb0] sm:$0xff] %vm223_vm1, %v3315_v55  ;;  %v3569_v11 = vld [vmem:[#allocation2 + $0x48] sm:$0xff]  ;;  %v2644_v50 = vadd.f32 %v7086_v12, %v2418_v14  ;;  %v2420_v13 = vpop.f32.mrb[15].mxu1 }
 0x2f7   : > { %3601 = vst.msk [vmem:[#allocation3 + $0x68] sm:$0xff] %vm223_vm1, %v3569_v11  ;;  %v3124_v48 = vld [vmem:[#allocation2 + $0x50] sm:$0xff] }
 0x2f8   : > { %v2870_v27 = vld [vmem:[#allocation2 + $0x51] sm:$0xff]  ;;  %2774 = vst.msk [vmem:[#allocation2 + $0x69] sm:$0xff] %vm223_vm1, %v2644_v50  ;;  %3193 = vrot.lane.b32.xlu0 %v3124_v48, %s5927_s23  ;;  %2838 = vst.msk [vmem:[#allocation3 + $0x118] sm:$0xff] %vm223_vm1, %v3124_v48 }
 0x2f9   : > { %v3891_v43 = vld [vmem:[#allocation3 + $0x20] sm:$0xff]  ;;  %2941 = vrot.lane.b32.xlu1 %v2870_v27, %s5927_s23  ;;  %v2423_v12 = vpop.f32.mrb[16].mxu1 }
 0x2fa   : > { %v3896_v39 = vld [vmem:[#allocation3 + $0x48] sm:$0xff]  ;;  %v7429_v41 = vld [vmem:[#allocation2 + $0x4a] sm:$0xff]  ;;  %5369 = vmatprep.mubr.msk.f32.mxu1 %vm223_vm1, %v3891_v43  ;;  %v2649_v52 = vadd.f32 %v7100_v9, %v2423_v12  ;;  %v2425_v21 = vpop.f32.mrb[17].mxu1 }
 0x2fb   : > { %v7431_v34 = vld [vmem:[#allocation2 + $0x52] sm:$0xff]  ;;  %3857 = vst.msk [vmem:[#allocation3 + $0x70] sm:$0xff] %vm223_vm1, %v7429_v41  ;;  %3093 = vst.msk [vmem:[#allocation3 + $0xf8] sm:$0xff] %vm223_vm1, %v7429_v41  ;;  %5370 = vmatmul.mubr.msk.f32.vlgmr.msra.gmra.mrb[64].mxu1 %vm223_vm1, %v3896_v39 }
 0x2fc   : > { %3858 = vst.msk [vmem:[#allocation3 + $0x98] sm:$0xff] %vm223_vm1, %v7431_v34  ;;  %3094 = vst.msk [vmem:[#allocation3 + $0x120] sm:$0xff] %vm223_vm1, %v7431_v34  ;;  %v3316_v5 = vld [vmem:[#allocation2 + $0x51] sm:$0xff]  ;;  %v3125_v2 = vld [vmem:[#allocation2 + $0x60] sm:$0xff] }
 0x2fd   : > { %v3570_v10 = vld [vmem:[#allocation2 + $0x50] sm:$0xff]  ;;  %3348 = vst.msk [vmem:[#allocation3 + $0xd8] sm:$0xff] %vm223_vm1, %v3316_v5  ;;  %v2871_v36 = vld [vmem:[#allocation2 + $0x61] sm:$0xff]  ;;  %2775 = vst.msk [vmem:[#allocation2 + $0x79] sm:$0xff] %vm223_vm1, %v2649_v52  ;;  %3195 = vrot.lane.b32.xlu0 %v3125_v2, %s5927_s23  ;;  %v2428_v9 = vpop.f32.mrb[18].mxu1 }
 0x2fe   : > { %3602 = vst.msk [vmem:[#allocation3 + $0x90] sm:$0xff] %vm223_vm1, %v3570_v10  ;;  %2943 = vrot.lane.b32.xlu1 %v2871_v36, %s5927_s23  ;;  %2839 = vst.msk [vmem:[#allocation3 + $0x140] sm:$0xff] %vm223_vm1, %v3125_v2  ;;  %v3317_v3 = vld [vmem:[#allocation2 + $0x61] sm:$0xff]  ;;  %v2654_v25 = vadd.f32 %v7097_v26, %v2428_v9  ;;  %v2430_v20 = vpop.f32.mrb[19].mxu1 }
 0x2ff   : > { %v3571_v61 = vld [vmem:[#allocation2 + $0x60] sm:$0xff]  ;;  %3349 = vst.msk [vmem:[#allocation3 + $0x100] sm:$0xff] %vm223_vm1, %v3317_v3  ;;  %v3126_v47 = vld [vmem:[#allocation2 + $0x68] sm:$0xff] }
 0x300   : > { %3603 = vst.msk [vmem:[#allocation3 + $0xb8] sm:$0xff] %vm223_vm1, %v3571_v61  ;;  %v2872_v51 = vld [vmem:[#allocation2 + $0x69] sm:$0xff]  ;;  %2776 = vst.msk [vmem:[#allocation2 + $0x81] sm:$0xff] %vm223_vm1, %v2654_v25 }
 0x301   : > { %v7454_v59 = vld [vmem:[#allocation2 + $0x62] sm:$0xff]  ;;  %3197 = vrot.lane.b32.xlu0 %v3126_v47, %s5927_s23  ;;  %v7461_v63 = vld [vmem:[#allocation2 + $0x6a] sm:$0xff]  ;;  %2840 = vst.msk [vmem:[#allocation3 + $0x168] sm:$0xff] %vm223_vm1, %v3126_v47  ;;  %v2433_v26 = vpop.f32.mrb[20].mxu1 }
 0x302   : > { %2945 = vrot.lane.b32.xlu1 %v2872_v51, %s5927_s23  ;;  %v3901_v33 = vld [vmem:[#allocation3 + $0x70] sm:$0xff]  ;;  %3859 = vst.msk [vmem:[#allocation3 + $0xc0] sm:$0xff] %vm223_vm1, %v7454_v59  ;;  %3095 = vst.msk [vmem:[#allocation3 + $0x148] sm:$0xff] %vm223_vm1, %v7454_v59  ;;  %v7469_v6 = vld [vmem:[#allocation2 + $0x69] sm:$0xff]  ;;  %v2659_v56 = vadd.f32 %v7112_v4, %v2433_v26  ;;  %v2435_v32 = vpop.f32.mrb[21].mxu1 }
 0x303   : > { %v3906_v15 = vld [vmem:[#allocation3 + $0x98] sm:$0xff]  ;;  %5372 = vmatprep.mubr.msk.f32.mxu1 %vm223_vm1, %v3901_v33  ;;  %3860 = vst.msk [vmem:[#allocation3 + $0xe8] sm:$0xff] %vm223_vm1, %v7461_v63  ;;  %3096 = vst.msk [vmem:[#allocation3 + $0x170] sm:$0xff] %vm223_vm1, %v7461_v63 }
 0x304   : > { %v3572_v35 = vld [vmem:[#allocation2 + $0x68] sm:$0xff]  ;;  %5373 = vmatmul.mubr.msk.f32.gmra.mrb[66].mxu1 %vm223_vm1, %v3906_v15  ;;  %3350 = vst.msk [vmem:[#allocation3 + $0x128] sm:$0xff] %vm223_vm1, %v7469_v6  ;;  %v3127_v45 = vld [vmem:[#allocation2 + $0x78] sm:$0xff]  ;;  %2777 = vst.msk [vmem:[#allocation2 + $0x91] sm:$0xff] %vm223_vm1, %v2659_v56 }
 0x305   : > { %3604 = vst.msk [vmem:[#allocation3 + $0xe0] sm:$0xff] %vm223_vm1, %v3572_v35  ;;  %v2873_v1 = vld [vmem:[#allocation2 + $0x79] sm:$0xff]  ;;  %3199 = vrot.lane.b32.xlu0 %v3127_v45, %s5927_s23  ;;  %2841 = vst.msk [vmem:[#allocation3 + $0x190] sm:$0xff] %vm223_vm1, %v3127_v45  ;;  %v2438_v55 = vpop.f32.mrb[22].mxu1 }
 0x306   : > { %v7478_v54 = vld [vmem:[#allocation2 + $0x79] sm:$0xff]  ;;  %2947 = vrot.lane.b32.xlu1 %v2873_v1, %s5927_s23  ;;  %v2664_v11 = vadd.f32 %v7110_v53, %v2438_v55  ;;  %v2440_v14 = vpop.f32.mrb[23].mxu1 }
 0x307   : > { %3351 = vst.msk [vmem:[#allocation3 + $0x150] sm:$0xff] %vm223_vm1, %v7478_v54  ;;  %v3573_v4 = vld [vmem:[#allocation2 + $0x78] sm:$0xff]  ;;  %v3128_v50 = vld [vmem:[#allocation2 + $0x80] sm:$0xff] }
 0x308   : > { %3605 = vst.msk [vmem:[#allocation3 + $0x108] sm:$0xff] %vm223_vm1, %v3573_v4  ;;  %v2874_v13 = vld [vmem:[#allocation2 + $0x81] sm:$0xff]  ;;  %2778 = vst.msk [vmem:[#allocation2 + $0x99] sm:$0xff] %vm223_vm1, %v2664_v11 }
 0x309   : > { %v3911_v48 = vld [vmem:[#allocation3 + $0xc0] sm:$0xff]  ;;  %3201 = vrot.lane.b32.xlu0 %v3128_v50, %s5927_s23  ;;  %v7491_v43 = vld [vmem:[#allocation2 + $0x7a] sm:$0xff]  ;;  %v7493_v39 = vld [vmem:[#allocation2 + $0x82] sm:$0xff]  ;;  %2842 = vst.msk [vmem:[#allocation3 + $0x1b8] sm:$0xff] %vm223_vm1, %v3128_v50  ;;  %v2443_v53 = vpop.f32.mrb[24].mxu1 }
 0x30a   : > { %2949 = vrot.lane.b32.xlu1 %v2874_v13, %s5927_s23  ;;  %v3916_v27 = vld [vmem:[#allocation3 + $0xe8] sm:$0xff]  ;;  %5375 = vmatprep.mubr.msk.f32.mxu1 %vm223_vm1, %v3911_v48  ;;  %3861 = vst.msk [vmem:[#allocation3 + $0x110] sm:$0xff] %vm223_vm1, %v7491_v43  ;;  %3862 = vst.msk [vmem:[#allocation3 + $0x138] sm:$0xff] %vm223_vm1, %v7493_v39  ;;  %v7503_v12 = vld [vmem:[#allocation2 + $0x81] sm:$0xff]  ;;  %v2669_v52 = vadd.f32 %v7120_v22, %v2443_v53  ;;  %v2445_v21 = vpop.f32.mrb[25].mxu1 }
 0x30b   : > { %3097 = vst.msk [vmem:[#allocation3 + $0x198] sm:$0xff] %vm223_vm1, %v7491_v43  ;;  %v3066_v5 = vld [vmem:[#allocation2 + $0x82] sm:$0xff]  ;;  %5376 = vmatmul.mubr.msk.f32.gmra.mrb[68].mxu1 %vm223_vm1, %v3916_v27  ;;  %3352 = vst.msk [vmem:[#allocation3 + $0x178] sm:$0xff] %vm223_vm1, %v7503_v12  ;;  %v3129_v2 = vld [vmem:[#allocation2 + $0x90] sm:$0xff] }
 0x30c   : > { %v3574_v10 = vld [vmem:[#allocation2 + $0x80] sm:$0xff]  ;;  %3098 = vst.msk [vmem:[#allocation3 + $0x1c0] sm:$0xff] %vm223_vm1, %v3066_v5  ;;  %v2875_v36 = vld [vmem:[#allocation2 + $0x91] sm:$0xff]  ;;  %2779 = vst.msk [vmem:[#allocation2 + $0xa9] sm:$0xff] %vm223_vm1, %v2669_v52 }
 0x30d   : > { %3606 = vst.msk [vmem:[#allocation3 + $0x130] sm:$0xff] %vm223_vm1, %v3574_v10  ;;  %v7511_v3 = vld [vmem:[#allocation2 + $0x91] sm:$0xff]  ;;  %3203 = vrot.lane.b32.xlu0 %v3129_v2, %s5927_s23  ;;  %2843 = vst.msk [vmem:[#allocation3 + $0x1e0] sm:$0xff] %vm223_vm1, %v3129_v2  ;;  %v2448_v61 = vpop.f32.mrb[26].mxu1 }
 0x30e   : > { %2951 = vrot.lane.b32.xlu1 %v2875_v36, %s5927_s23  ;;  %3353 = vst.msk [vmem:[#allocation3 + $0x1a0] sm:$0xff] %vm223_vm1, %v7511_v3  ;;  %v3575_v22 = vld [vmem:[#allocation2 + $0x90] sm:$0xff]  ;;  %v2674_v9 = vadd.f32 %v7118_v37, %v2448_v61  ;;  %v2450_v25 = vpop.f32.mrb[27].mxu1 }
 0x30f   : > { %3607 = vst.msk [vmem:[#allocation3 + $0x158] sm:$0xff] %vm223_vm1, %v3575_v22  ;;  %v3130_v20 = vld [vmem:[#allocation2 + $0x98] sm:$0xff] }
 0x310   : > { %v2876_v47 = vld [vmem:[#allocation2 + $0x99] sm:$0xff]  ;;  %2780 = vst.msk [vmem:[#allocation2 + $0xb1] sm:$0xff] %vm223_vm1, %v2674_v9 }
 0x311   : > { %v7521_v51 = vld [vmem:[#allocation2 + $0x92] sm:$0xff]  ;;  %3205 = vrot.lane.b32.xlu0 %v3130_v20, %s5927_s23  ;;  %v3921_v33 = vld [vmem:[#allocation3 + $0x110] sm:$0xff]  ;;  %v3926_v15 = vld [vmem:[#allocation3 + $0x138] sm:$0xff]  ;;  %v2453_v37 = vpop.f32.mrb[28].mxu1 }
 0x312   : > { %2953 = vrot.lane.b32.xlu1 %v2876_v47, %s5927_s23  ;;  %3863 = vst.msk [vmem:[#allocation3 + $0x160] sm:$0xff] %vm223_vm1, %v7521_v51  ;;  %v3832_v26 = vld [vmem:[#allocation2 + $0x9a] sm:$0xff]  ;;  %5378 = vmatprep.mubr.msk.f32.mxu1 %vm223_vm1, %v3921_v33  ;;  %v3067_v56 = vld [vmem:[#allocation2 + $0x92] sm:$0xff]  ;;  %v2679_v45 = vadd.f32 %v7131_v28, %v2453_v37  ;;  %v2455_v1 = vpop.f32.mrb[29].mxu1 }
 0x313   : > { %3864 = vst.msk [vmem:[#allocation3 + $0x188] sm:$0xff] %vm223_vm1, %v3832_v26  ;;  %v2812_v35 = vld [vmem:[#allocation2 + $0x98] sm:$0xff]  ;;  %5379 = vmatmul.mubr.msk.f32.gmra.mrb[70].mxu1 %vm223_vm1, %v3926_v15  ;;  %3099 = vst.msk [vmem:[#allocation3 + $0x1e8] sm:$0xff] %vm223_vm1, %v3067_v56  ;;  %v3131_v55 = vld [vmem:[#allocation2 + $0xa8] sm:$0xff] }
 0x314   : > { %v7530_v32 = vld [vmem:[#allocation2 + $0x9a] sm:$0xff]  ;;  %2844 = vst.msk [vmem:[#allocation3 + $0x208] sm:$0xff] %vm223_vm1, %v2812_v35  ;;  %v2877_v11 = vld [vmem:[#allocation2 + $0xa9] sm:$0xff]  ;;  %2781 = vst.msk [vmem:[#allocation2 + $0xc1] sm:$0xff] %vm223_vm1, %v2679_v45 }
 0x315   : > { %v7536_v4 = vld [vmem:[#allocation2 + $0x99] sm:$0xff]  ;;  %3100 = vst.msk [vmem:[#allocation3 + $0x210] sm:$0xff] %vm223_vm1, %v7530_v32  ;;  %v2813_v14 = vld [vmem:[#allocation2 + $0xa8] sm:$0xff]  ;;  %3207 = vrot.lane.b32.xlu0 %v3131_v55, %s5927_s23  ;;  %v2458_v48 = vpop.f32.mrb[30].mxu1 }
 0x316   : > { %3354 = vst.msk [vmem:[#allocation3 + $0x1c8] sm:$0xff] %vm223_vm1, %v7536_v4  ;;  %2955 = vrot.lane.b32.xlu1 %v2877_v11, %s5927_s23  ;;  %2845 = vst.msk [vmem:[#allocation3 + $0x230] sm:$0xff] %vm223_vm1, %v2813_v14  ;;  %v7546_v28 = vld [vmem:[#allocation2 + $0xa9] sm:$0xff]  ;;  %v3576_v50 = vld [vmem:[#allocation2 + $0x98] sm:$0xff]  ;;  %v2684_v27 = vadd.f32 %v7128_v46, %v2458_v48  ;;  %v2460_v53 = vpop.f32.mrb[31].mxu1 }
 0x317   : > { %v3577_v13 = vld [vmem:[#allocation2 + $0xa8] sm:$0xff]  ;;  %3608 = vst.msk [vmem:[#allocation3 + $0x180] sm:$0xff] %vm223_vm1, %v3576_v50  ;;  %3355 = vst.msk [vmem:[#allocation3 + $0x1f0] sm:$0xff] %vm223_vm1, %v7546_v28  ;;  %v3132_v5 = vld [vmem:[#allocation2 + $0xb0] sm:$0xff] }
 0x318   : > { %3609 = vst.msk [vmem:[#allocation3 + $0x1a8] sm:$0xff] %vm223_vm1, %v3577_v13  ;;  %v2878_v10 = vld [vmem:[#allocation2 + $0xb1] sm:$0xff]  ;;  %2782 = vst.msk [vmem:[#allocation2 + $0xc9] sm:$0xff] %vm223_vm1, %v2684_v27 }
 0x319   : > { %v3931_v52 = vld [vmem:[#allocation3 + $0x160] sm:$0xff]  ;;  %3209 = vrot.lane.b32.xlu0 %v3132_v5, %s5927_s23  ;;  %v2463_v22 = vpop.f32.mrb[32].mxu1 }
 0x31a   : > { %2957 = vrot.lane.b32.xlu1 %v2878_v10, %s5927_s23  ;;  %v3936_v21 = vld [vmem:[#allocation3 + $0x188] sm:$0xff]  ;;  %v3833_v2 = vld [vmem:[#allocation2 + $0xaa] sm:$0xff]  ;;  %5381 = vmatprep.mubr.msk.f32.mxu1 %vm223_vm1, %v3931_v52  ;;  %v2689_v25 = vadd.f32 %v7138_v42, %v2463_v22  ;;  %v2465_v20 = vpop.f32.mrb[33].mxu1 }
 0x31b   : > { %v3834_v36 = vld [vmem:[#allocation2 + $0xb2] sm:$0xff]  ;;  %3865 = vst.msk [vmem:[#allocation3 + $0x1b0] sm:$0xff] %vm223_vm1, %v3833_v2  ;;  %v7559_v61 = vld [vmem:[#allocation2 + $0xaa] sm:$0xff]  ;;  %5382 = vmatmul.mubr.msk.f32.gmra.mrb[72].mxu1 %vm223_vm1, %v3936_v21  ;;  %v3133_v33 = vld [vmem:[#allocation2 + $0xc0] sm:$0xff] }
 0x31c   : > { %3866 = vst.msk [vmem:[#allocation3 + $0x1d8] sm:$0xff] %vm223_vm1, %v3834_v36  ;;  %v2814_v46 = vld [vmem:[#allocation2 + $0xb0] sm:$0xff]  ;;  %3101 = vst.msk [vmem:[#allocation3 + $0x238] sm:$0xff] %vm223_vm1, %v7559_v61  ;;  %v2879_v15 = vld [vmem:[#allocation2 + $0xc1] sm:$0xff] }
 0x31d   : > { %v7561_v9 = vld [vmem:[#allocation2 + $0xb2] sm:$0xff]  ;;  %2846 = vst.msk [vmem:[#allocation3 + $0x258] sm:$0xff] %vm223_vm1, %v2814_v46  ;;  %3610 = vst.msk [vmem:[#allocation3 + $0x1d0] sm:$0xff] %vm223_vm1, %v2814_v46  ;;  %v2815_v26 = vld [vmem:[#allocation2 + $0xc0] sm:$0xff]  ;;  %3211 = vrot.lane.b32.xlu0 %v3133_v33, %s5927_s23  ;;  %v2468_v37 = vpop.f32.mrb[34].mxu1 }
 0x31e   : > { %v7568_v47 = vld [vmem:[#allocation2 + $0xb1] sm:$0xff]  ;;  %3102 = vst.msk [vmem:[#allocation3 + $0x260] sm:$0xff] %vm223_vm1, %v7561_v9  ;;  %2783 = vst.msk [vmem:[#allocation2 + $0xd9] sm:$0xff] %vm223_vm1, %v2689_v25  ;;  %2959 = vrot.lane.b32.xlu1 %v2879_v15, %s5927_s23  ;;  %v7579_v42 = vld [vmem:[#allocation2 + $0xc1] sm:$0xff]  ;;  %v2694_v35 = vadd.f32 %v7136_v44, %v2468_v37  ;;  %v2470_v56 = vpop.f32.mrb[35].mxu1 }
 0x31f   : > { %3356 = vst.msk [vmem:[#allocation3 + $0x218] sm:$0xff] %vm223_vm1, %v7568_v47  ;;  %2847 = vst.msk [vmem:[#allocation3 + $0x280] sm:$0xff] %vm223_vm1, %v2815_v26  ;;  %v3134_v45 = vld [vmem:[#allocation2 + $0xc8] sm:$0xff] }
 0x320   : > { %3611 = vst.msk [vmem:[#allocation3 + $0x1f8] sm:$0xff] %vm223_vm1, %v2815_v26  ;;  %3357 = vst.msk [vmem:[#allocation3 + $0x240] sm:$0xff] %vm223_vm1, %v7579_v42  ;;  %v2880_v1 = vld [vmem:[#allocation2 + $0xc9] sm:$0xff] }
 0x321   : > { %v3835_v55 = vld [vmem:[#allocation2 + $0xc2] sm:$0xff]  ;;  %2784 = vst.msk [vmem:[#allocation2 + $0xe1] sm:$0xff] %vm223_vm1, %v2694_v35  ;;  %3213 = vrot.lane.b32.xlu0 %v3134_v45, %s5927_s23  ;;  %v3836_v50 = vld [vmem:[#allocation2 + $0xca] sm:$0xff]  ;;  %v2473_v13 = vpop.f32.mrb[36].mxu1 }
 0x322   : > { %2961 = vrot.lane.b32.xlu1 %v2880_v1, %s5927_s23  ;;  %v3941_v11 = vld [vmem:[#allocation3 + $0x1b0] sm:$0xff]  ;;  %3867 = vst.msk [vmem:[#allocation3 + $0x200] sm:$0xff] %vm223_vm1, %v3835_v55  ;;  %3868 = vst.msk [vmem:[#allocation3 + $0x228] sm:$0xff] %vm223_vm1, %v3836_v50  ;;  %v2816_v44 = vld [vmem:[#allocation2 + $0xc8] sm:$0xff]  ;;  %v2699_v53 = vadd.f32 %v7144_v17, %v2473_v13  ;;  %v2475_v5 = vpop.f32.mrb[37].mxu1 }
 0x323   : > { %v3946_v14 = vld [vmem:[#allocation3 + $0x1d8] sm:$0xff]  ;;  %5384 = vmatprep.mubr.msk.f32.mxu1 %vm223_vm1, %v3941_v11  ;;  %2848 = vst.msk [vmem:[#allocation3 + $0x2a8] sm:$0xff] %vm223_vm1, %v2816_v44  ;;  %3612 = vst.msk [vmem:[#allocation3 + $0x220] sm:$0xff] %vm223_vm1, %v2816_v44 }
 0x324   : > { %v7591_v48 = vld [vmem:[#allocation2 + $0xc2] sm:$0xff]  ;;  %v7593_v27 = vld [vmem:[#allocation2 + $0xca] sm:$0xff]  ;;  %5385 = vmatmul.mubr.msk.f32.gmra.mrb[74].mxu1 %vm223_vm1, %v3946_v14  ;;  %2785 = vst.msk [vmem:[#allocation2 + $0xf1] sm:$0xff] %vm223_vm1, %v2699_v53 }
 0x325   : > { %3103 = vst.msk [vmem:[#allocation3 + $0x288] sm:$0xff] %vm223_vm1, %v7591_v48  ;;  %v7600_v10 = vld [vmem:[#allocation2 + $0xc9] sm:$0xff]  ;;  %3104 = vst.msk [vmem:[#allocation3 + $0x2b0] sm:$0xff] %vm223_vm1, %v7593_v27  ;;  %v3135_v52 = vld [vmem:[#allocation2 + $0xd8] sm:$0xff]  ;;  %v2478_v36 = vpop.f32.mrb[38].mxu1 }
 0x326   : > { %v2881_v21 = vld [vmem:[#allocation2 + $0xd9] sm:$0xff]  ;;  %3358 = vst.msk [vmem:[#allocation3 + $0x268] sm:$0xff] %vm223_vm1, %v7600_v10  ;;  %3215 = vrot.lane.b32.xlu0 %v3135_v52, %s5927_s23  ;;  %v2704_v22 = vadd.f32 %v7142_v58, %v2478_v36  ;;  %v2480_v46 = vpop.f32.mrb[39].mxu1 }
 0x327   : > { %v2817_v2 = vld [vmem:[#allocation2 + $0xd8] sm:$0xff]  ;;  %2963 = vrot.lane.b32.xlu1 %v2881_v21, %s5927_s23 }
 0x328   : > { %2849 = vst.msk [vmem:[#allocation3 + $0x2d0] sm:$0xff] %vm223_vm1, %v2817_v2  ;;  %v7611_v17 = vld [vmem:[#allocation2 + $0xd9] sm:$0xff]  ;;  %3613 = vst.msk [vmem:[#allocation3 + $0x248] sm:$0xff] %vm223_vm1, %v2817_v2  ;;  %v2882_v20 = vld [vmem:[#allocation2 + $0xe1] sm:$0xff] }
 0x329   : > { %3359 = vst.msk [vmem:[#allocation3 + $0x290] sm:$0xff] %vm223_vm1, %v7611_v17  ;;  %v3136_v25 = vld [vmem:[#allocation2 + $0xe0] sm:$0xff]  ;;  %v3951_v33 = vld [vmem:[#allocation3 + $0x200] sm:$0xff]  ;;  %2786 = vst.msk [vmem:[#allocation2 + $0xf9] sm:$0xff] %vm223_vm1, %v2704_v22  ;;  %v2483_v35 = vpop.f32.mrb[40].mxu1 }
 0x32a   : > { %3217 = vrot.lane.b32.xlu0 %v3136_v25, %s5927_s23  ;;  %v3956_v15 = vld [vmem:[#allocation3 + $0x228] sm:$0xff]  ;;  %v3838_v37 = vld [vmem:[#allocation2 + $0xe2] sm:$0xff]  ;;  %5387 = vmatprep.mubr.msk.f32.mxu1 %vm223_vm1, %v3951_v33  ;;  %v2709_v1 = vadd.f32 %v7150_v30, %v2483_v35  ;;  %v2485_v55 = vpop.f32.mrb[41].mxu1 }
 0x32b   : > { %2965 = vrot.lane.b32.xlu1 %v2882_v20, %s5927_s23  ;;  %v3837_v26 = vld [vmem:[#allocation2 + $0xda] sm:$0xff]  ;;  %3870 = vst.msk [vmem:[#allocation3 + $0x278] sm:$0xff] %vm223_vm1, %v3838_v37  ;;  %v7625_v45 = vld [vmem:[#allocation2 + $0xe2] sm:$0xff]  ;;  %5388 = vmatmul.mubr.msk.f32.gmra.mrb[76].mxu1 %vm223_vm1, %v3956_v15  ;;  %v3137_v14 = vld [vmem:[#allocation2 + $0xf0] sm:$0xff] }
 0x32c   : > { %3869 = vst.msk [vmem:[#allocation3 + $0x250] sm:$0xff] %vm223_vm1, %v3837_v26  ;;  %v2818_v58 = vld [vmem:[#allocation2 + $0xe0] sm:$0xff]  ;;  %3106 = vst.msk [vmem:[#allocation3 + $0x300] sm:$0xff] %vm223_vm1, %v7625_v45  ;;  %v2883_v50 = vld [vmem:[#allocation2 + $0xf1] sm:$0xff] }
 0x32d   : > { %v7623_v56 = vld [vmem:[#allocation2 + $0xda] sm:$0xff]  ;;  %2850 = vst.msk [vmem:[#allocation3 + $0x2f8] sm:$0xff] %vm223_vm1, %v2818_v58  ;;  %3614 = vst.msk [vmem:[#allocation3 + $0x270] sm:$0xff] %vm223_vm1, %v2818_v58  ;;  %v2819_v13 = vld [vmem:[#allocation2 + $0xf0] sm:$0xff]  ;;  %v2488_v44 = vpop.f32.mrb[42].mxu1 }
 0x32e   : > { %3105 = vst.msk [vmem:[#allocation3 + $0x2d8] sm:$0xff] %vm223_vm1, %v7623_v56  ;;  %v7632_v11 = vld [vmem:[#allocation2 + $0xe1] sm:$0xff]  ;;  %2787 = vst.msk [vmem:[#allocation2 + $0x109] sm:$0xff] %vm223_vm1, %v2709_v1  ;;  %3219 = vrot.lane.b32.xlu0 %v3137_v14, %s5927_s23  ;;  %v7643_v30 = vld [vmem:[#allocation2 + $0xf1] sm:$0xff]  ;;  %v2714_v53 = vadd.f32 %v7148_v57, %v2488_v44  ;;  %v2490_v5 = vpop.f32.mrb[43].mxu1 }
 0x32f   : > { %3360 = vst.msk [vmem:[#allocation3 + $0x2b8] sm:$0xff] %vm223_vm1, %v7632_v11  ;;  %2967 = vrot.lane.b32.xlu1 %v2883_v50, %s5927_s23  ;;  %2851 = vst.msk [vmem:[#allocation3 + $0x320] sm:$0xff] %vm223_vm1, %v2819_v13 }
 0x330   : > { %3615 = vst.msk [vmem:[#allocation3 + $0x298] sm:$0xff] %vm223_vm1, %v2819_v13  ;;  %3361 = vst.msk [vmem:[#allocation3 + $0x2e0] sm:$0xff] %vm223_vm1, %v7643_v30  ;;  %v3138_v52 = vld [vmem:[#allocation2 + $0xf8] sm:$0xff] }
 0x331   : > { %v2884_v21 = vld [vmem:[#allocation2 + $0xf9] sm:$0xff]  ;;  %2788 = vst.msk [vmem:[#allocation2 + $0x111] sm:$0xff] %vm223_vm1, %v2714_v53  ;;  %v2493_v25 = vpop.f32.mrb[44].mxu1 }
 0x332   : > { %v3839_v2 = vld [vmem:[#allocation2 + $0xf2] sm:$0xff]  ;;  %3221 = vrot.lane.b32.xlu0 %v3138_v52, %s5927_s23  ;;  %v3966_v22 = vld [vmem:[#allocation3 + $0x278] sm:$0xff]  ;;  %v3840_v46 = vld [vmem:[#allocation2 + $0xfa] sm:$0xff]  ;;  %v2719_v15 = vadd.f32 %v7156_v38, %v2493_v25  ;;  %v2495_v26 = vpop.f32.mrb[45].mxu1 }
 0x333   : > { %2969 = vrot.lane.b32.xlu1 %v2884_v21, %s5927_s23  ;;  %v3961_v36 = vld [vmem:[#allocation3 + $0x250] sm:$0xff]  ;;  %3871 = vst.msk [vmem:[#allocation3 + $0x2a0] sm:$0xff] %vm223_vm1, %v3839_v2  ;;  %3872 = vst.msk [vmem:[#allocation3 + $0x2c8] sm:$0xff] %vm223_vm1, %v3840_v46  ;;  %v2820_v57 = vld [vmem:[#allocation2 + $0xf8] sm:$0xff] }
 0x334   : > { %5390 = vmatprep.mubr.msk.f32.mxu1 %vm223_vm1, %v3961_v36  ;;  %v7655_v20 = vld [vmem:[#allocation2 + $0xf2] sm:$0xff]  ;;  %v7657_v33 = vld [vmem:[#allocation2 + $0xfa] sm:$0xff]  ;;  %2852 = vst.msk [vmem:[#allocation3 + $0x348] sm:$0xff] %vm223_vm1, %v2820_v57  ;;  %3616 = vst.msk [vmem:[#allocation3 + $0x2c0] sm:$0xff] %vm223_vm1, %v2820_v57 }
 0x335   : > { %5391 = vmatmul.mubr.msk.f32.gmra.mrb[78].mxu1 %vm223_vm1, %v3966_v22  ;;  %3107 = vst.msk [vmem:[#allocation3 + $0x328] sm:$0xff] %vm223_vm1, %v7655_v20  ;;  %v7664_v37 = vld [vmem:[#allocation2 + $0xf9] sm:$0xff]  ;;  %3108 = vst.msk [vmem:[#allocation3 + $0x350] sm:$0xff] %vm223_vm1, %v7657_v33  ;;  %v3139_v35 = vld [vmem:[#allocation2 + $0x108] sm:$0xff]  ;;  %v2498_v55 = vpop.f32.mrb[46].mxu1 }
 0x336   : > { %v2885_v58 = vld [vmem:[#allocation2 + $0x109] sm:$0xff]  ;;  %3362 = vst.msk [vmem:[#allocation3 + $0x308] sm:$0xff] %vm223_vm1, %v7664_v37  ;;  %2789 = vst.msk [vmem:[#allocation2 + $0x121] sm:$0xff] %vm223_vm1, %v2719_v15  ;;  %3223 = vrot.lane.b32.xlu0 %v3139_v35, %s5927_s23  ;;  %v2724_v14 = vadd.f32 %v7154_v23, %v2498_v55  ;;  %v2500_v50 = vpop.f32.mrb[47].mxu1 }
 0x337   : > { %v2821_v1 = vld [vmem:[#allocation2 + $0x108] sm:$0xff]  ;;  %2971 = vrot.lane.b32.xlu1 %v2885_v58, %s5927_s23 }
 0x338   : > { %2853 = vst.msk [vmem:[#allocation3 + $0x370] sm:$0xff] %vm223_vm1, %v2821_v1  ;;  %v7675_v38 = vld [vmem:[#allocation2 + $0x109] sm:$0xff]  ;;  %3617 = vst.msk [vmem:[#allocation3 + $0x2e8] sm:$0xff] %vm223_vm1, %v2821_v1  ;;  %v2886_v44 = vld [vmem:[#allocation2 + $0x111] sm:$0xff] }
 0x339   : > { %3363 = vst.msk [vmem:[#allocation3 + $0x330] sm:$0xff] %vm223_vm1, %v7675_v38  ;;  %v3140_v13 = vld [vmem:[#allocation2 + $0x110] sm:$0xff]  ;;  %2790 = vst.msk [vmem:[#allocation2 + $0x129] sm:$0xff] %vm223_vm1, %v2724_v14  ;;  %v2503_v2 = vpop.f32.mrb[48].mxu1 }
 0x33a   : > { %v3971_v53 = vld [vmem:[#allocation3 + $0x2a0] sm:$0xff]  ;;  %3225 = vrot.lane.b32.xlu0 %v3140_v13, %s5927_s23  ;;  %v3976_v5 = vld [vmem:[#allocation3 + $0x2c8] sm:$0xff]  ;;  %v2729_v46 = vadd.f32 %v7162_v19, %v2503_v2  ;;  %v2505_v25 = vpop.f32.mrb[49].mxu1 }
 0x33b   : > { %2973 = vrot.lane.b32.xlu1 %v2886_v44, %s5927_s23  ;;  %v3841_v52 = vld [vmem:[#allocation2 + $0x10a] sm:$0xff]  ;;  %v3842_v21 = vld [vmem:[#allocation2 + $0x112] sm:$0xff]  ;;  %5393 = vmatprep.mubr.msk.f32.mxu1 %vm223_vm1, %v3971_v53 }
 0x33c   : > { %3873 = vst.msk [vmem:[#allocation3 + $0x2f0] sm:$0xff] %vm223_vm1, %v3841_v52  ;;  %3874 = vst.msk [vmem:[#allocation3 + $0x318] sm:$0xff] %vm223_vm1, %v3842_v21  ;;  %v2822_v23 = vld [vmem:[#allocation2 + $0x110] sm:$0xff]  ;;  %5394 = vmatmul.mubr.msk.f32.gmra.mrb[80].mxu1 %vm223_vm1, %v3976_v5 }
 0x33d   : > { %v7687_v36 = vld [vmem:[#allocation2 + $0x10a] sm:$0xff]  ;;  %v7689_v22 = vld [vmem:[#allocation2 + $0x112] sm:$0xff]  ;;  %2854 = vst.msk [vmem:[#allocation3 + $0x398] sm:$0xff] %vm223_vm1, %v2822_v23  ;;  %3618 = vst.msk [vmem:[#allocation3 + $0x310] sm:$0xff] %vm223_vm1, %v2822_v23  ;;  %v2508_v58 = vpop.f32.mrb[50].mxu1 }
 0x33e   : > { %3109 = vst.msk [vmem:[#allocation3 + $0x378] sm:$0xff] %vm223_vm1, %v7687_v36  ;;  %v7696_v57 = vld [vmem:[#allocation2 + $0x111] sm:$0xff]  ;;  %3110 = vst.msk [vmem:[#allocation3 + $0x3a0] sm:$0xff] %vm223_vm1, %v7689_v22  ;;  %v3141_v15 = vld [vmem:[#allocation2 + $0x120] sm:$0xff]  ;;  %v2734_v1 = vadd.f32 %v7160_v24, %v2508_v58  ;;  %v2510_v55 = vpop.f32.mrb[51].mxu1 }
 0x33f   : > { %v2887_v26 = vld [vmem:[#allocation2 + $0x121] sm:$0xff]  ;;  %3364 = vst.msk [vmem:[#allocation3 + $0x358] sm:$0xff] %vm223_vm1, %v7696_v57  ;;  %2791 = vst.msk [vmem:[#allocation2 + $0x139] sm:$0xff] %vm223_vm1, %v2729_v46  ;;  %3227 = vrot.lane.b32.xlu0 %v3141_v15, %s5927_s23 }
 0x340   : > { %v2823_v35 = vld [vmem:[#allocation2 + $0x120] sm:$0xff]  ;;  %2975 = vrot.lane.b32.xlu1 %v2887_v26, %s5927_s23  ;;  %v3142_v14 = vld [vmem:[#allocation2 + $0x128] sm:$0xff]  ;;  %2792 = vst.msk [vmem:[#allocation2 + $0x141] sm:$0xff] %vm223_vm1, %v2734_v1 }
 0x341   : > { %2855 = vst.msk [vmem:[#allocation3 + $0x3c0] sm:$0xff] %vm223_vm1, %v2823_v35  ;;  %v7707_v19 = vld [vmem:[#allocation2 + $0x121] sm:$0xff]  ;;  %3619 = vst.msk [vmem:[#allocation3 + $0x338] sm:$0xff] %vm223_vm1, %v2823_v35  ;;  %v2888_v50 = vld [vmem:[#allocation2 + $0x129] sm:$0xff]  ;;  %v2513_v52 = vpop.f32.mrb[52].mxu1 }
 0x342   : > { %3365 = vst.msk [vmem:[#allocation3 + $0x380] sm:$0xff] %vm223_vm1, %v7707_v19  ;;  %v3843_v13 = vld [vmem:[#allocation2 + $0x122] sm:$0xff]  ;;  %v3844_v5 = vld [vmem:[#allocation2 + $0x12a] sm:$0xff]  ;;  %v2739_v23 = vadd.f32 %v7168_v31, %v2513_v52  ;;  %v2515_v46 = vpop.f32.mrb[53].mxu1 }
 0x343   : > { %3229 = vrot.lane.b32.xlu0 %v3142_v14, %s5927_s23  ;;  %v3981_v44 = vld [vmem:[#allocation3 + $0x2f0] sm:$0xff]  ;;  %v3986_v53 = vld [vmem:[#allocation3 + $0x318] sm:$0xff]  ;;  %3875 = vst.msk [vmem:[#allocation3 + $0x340] sm:$0xff] %vm223_vm1, %v3843_v13  ;;  %3876 = vst.msk [vmem:[#allocation3 + $0x368] sm:$0xff] %vm223_vm1, %v3844_v5 }
 0x344   : > { %2977 = vrot.lane.b32.xlu1 %v2888_v50, %s5927_s23  ;;  %5396 = vmatprep.mubr.msk.f32.mxu1 %vm223_vm1, %v3981_v44  ;;  %v2824_v24 = vld [vmem:[#allocation2 + $0x128] sm:$0xff]  ;;  %2793 = vst.msk [vmem:[#allocation2 + $0x151] sm:$0xff] %vm223_vm1, %v2739_v23 }
 0x345   : > { %v7719_v21 = vld [vmem:[#allocation2 + $0x122] sm:$0xff]  ;;  %v7721_v2 = vld [vmem:[#allocation2 + $0x12a] sm:$0xff]  ;;  %5397 = vmatmul.mubr.msk.f32.gmra.mrb[82].mxu1 %vm223_vm1, %v3986_v53  ;;  %2856 = vst.msk [vmem:[#allocation3 + $0x3e8] sm:$0xff] %vm223_vm1, %v2824_v24  ;;  %3620 = vst.msk [vmem:[#allocation3 + $0x360] sm:$0xff] %vm223_vm1, %v2824_v24  ;;  %v2518_v58 = vpop.f32.mrb[54].mxu1 }
 0x346   : > { %3111 = vst.msk [vmem:[#allocation3 + $0x3c8] sm:$0xff] %vm223_vm1, %v7719_v21  ;;  %v7728_v25 = vld [vmem:[#allocation2 + $0x129] sm:$0xff]  ;;  %3112 = vst.msk [vmem:[#allocation3 + $0x3f0] sm:$0xff] %vm223_vm1, %v7721_v2  ;;  %v3143_v15 = vld [vmem:[#allocation2 + $0x138] sm:$0xff]  ;;  %v2744_v1 = vadd.f32 %v7166_v16, %v2518_v58  ;;  %v2520_v55 = vpop.f32.mrb[55].mxu1 }
 0x347   : > { %v2889_v26 = vld [vmem:[#allocation2 + $0x139] sm:$0xff]  ;;  %3366 = vst.msk [vmem:[#allocation3 + $0x3a8] sm:$0xff] %vm223_vm1, %v7728_v25  ;;  %3231 = vrot.lane.b32.xlu0 %v3143_v15, %s5927_s23  ;;  %v2890_v50 = vld [vmem:[#allocation2 + $0x141] sm:$0xff] }
 0x348   : > { %v2825_v35 = vld [vmem:[#allocation2 + $0x138] sm:$0xff]  ;;  %2979 = vrot.lane.b32.xlu1 %v2889_v26, %s5927_s23  ;;  %v3144_v14 = vld [vmem:[#allocation2 + $0x140] sm:$0xff]  ;;  %2794 = vst.msk [vmem:[#allocation2 + $0x159] sm:$0xff] %vm223_vm1, %v2744_v1 }
 0x349   : > { %2857 = vst.msk [vmem:[#allocation3 + $0x410] sm:$0xff] %vm223_vm1, %v2825_v35  ;;  %v7739_v31 = vld [vmem:[#allocation2 + $0x139] sm:$0xff]  ;;  %3621 = vst.msk [vmem:[#allocation3 + $0x388] sm:$0xff] %vm223_vm1, %v2825_v35  ;;  %v3846_v5 = vld [vmem:[#allocation2 + $0x142] sm:$0xff]  ;;  %v2523_v52 = vpop.f32.mrb[56].mxu1 }
 0x34a   : > { %3367 = vst.msk [vmem:[#allocation3 + $0x3d0] sm:$0xff] %vm223_vm1, %v7739_v31  ;;  %v3991_v13 = vld [vmem:[#allocation3 + $0x340] sm:$0xff]  ;;  %v3996_v44 = vld [vmem:[#allocation3 + $0x368] sm:$0xff]  ;;  %3878 = vst.msk [vmem:[#allocation3 + $0x3b8] sm:$0xff] %vm223_vm1, %v3846_v5  ;;  %v2749_v46 = vadd.f32 %v7174_v0, %v2523_v52  ;;  %v2525_v15 = vpop.f32.mrb[57].mxu1 }
 0x34b   : > { %3233 = vrot.lane.b32.xlu0 %v3144_v14, %s5927_s23  ;;  %v3845_v53 = vld [vmem:[#allocation2 + $0x13a] sm:$0xff]  ;;  %5399 = vmatprep.mubr.msk.f32.mxu1 %vm223_vm1, %v3991_v13  ;;  %v7753_v23 = vld [vmem:[#allocation2 + $0x142] sm:$0xff]  ;;  %v3145_v35 = vld [vmem:[#allocation2 + $0x150] sm:$0xff] }
 0x34c   : > { %2981 = vrot.lane.b32.xlu1 %v2890_v50, %s5927_s23  ;;  %3877 = vst.msk [vmem:[#allocation3 + $0x390] sm:$0xff] %vm223_vm1, %v3845_v53  ;;  %v2826_v16 = vld [vmem:[#allocation2 + $0x140] sm:$0xff]  ;;  %5400 = vmatmul.mubr.msk.f32.gmra.mrb[84].mxu1 %vm223_vm1, %v3996_v44  ;;  %3114 = vst.msk [vmem:[#allocation3 + $0x440] sm:$0xff] %vm223_vm1, %v7753_v23  ;;  %v2891_v58 = vld [vmem:[#allocation2 + $0x151] sm:$0xff] }
 0x34d   : > { %v7751_v24 = vld [vmem:[#allocation2 + $0x13a] sm:$0xff]  ;;  %2858 = vst.msk [vmem:[#allocation3 + $0x438] sm:$0xff] %vm223_vm1, %v2826_v16  ;;  %3622 = vst.msk [vmem:[#allocation3 + $0x3b0] sm:$0xff] %vm223_vm1, %v2826_v16  ;;  %v2827_v1 = vld [vmem:[#allocation2 + $0x150] sm:$0xff]  ;;  %v2528_v55 = vpop.f32.mrb[58].mxu1 }
 0x34e   : > { %3113 = vst.msk [vmem:[#allocation3 + $0x418] sm:$0xff] %vm223_vm1, %v7751_v24  ;;  %v7760_v26 = vld [vmem:[#allocation2 + $0x141] sm:$0xff]  ;;  %2795 = vst.msk [vmem:[#allocation2 + $0x169] sm:$0xff] %vm223_vm1, %v2749_v46  ;;  %v7771_v0 = vld [vmem:[#allocation2 + $0x151] sm:$0xff]  ;;  %v2754_v14 = vadd.f32 %v7172_v62, %v2528_v55  ;;  %v2530_v50 = vpop.f32.mrb[59].mxu1 }
 0x34f   : > { %3368 = vst.msk [vmem:[#allocation3 + $0x3f8] sm:$0xff] %vm223_vm1, %v7760_v26  ;;  %3235 = vrot.lane.b32.xlu0 %v3145_v35, %s5927_s23  ;;  %2859 = vst.msk [vmem:[#allocation3 + $0x460] sm:$0xff] %vm223_vm1, %v2827_v1  ;;  %v3146_v13 = vld [vmem:[#allocation2 + $0x158] sm:$0xff] }
 0x350   : > { %2983 = vrot.lane.b32.xlu1 %v2891_v58, %s5927_s23  ;;  %3623 = vst.msk [vmem:[#allocation3 + $0x3d8] sm:$0xff] %vm223_vm1, %v2827_v1  ;;  %3369 = vst.msk [vmem:[#allocation3 + $0x420] sm:$0xff] %vm223_vm1, %v7771_v0  ;;  %v2892_v44 = vld [vmem:[#allocation2 + $0x159] sm:$0xff] }
 0x351   : > { %v3847_v53 = vld [vmem:[#allocation2 + $0x152] sm:$0xff]  ;;  %2796 = vst.msk [vmem:[#allocation2 + $0x171] sm:$0xff] %vm223_vm1, %v2754_v14  ;;  %v4006_v52 = vld [vmem:[#allocation3 + $0x3b8] sm:$0xff]  ;;  %v3848_v16 = vld [vmem:[#allocation2 + $0x15a] sm:$0xff]  ;;  %v2533_v46 = vpop.f32.mrb[60].mxu1 }
 0x352   : > { %3879 = vst.msk [vmem:[#allocation3 + $0x3e0] sm:$0xff] %vm223_vm1, %v3847_v53  ;;  %3880 = vst.msk [vmem:[#allocation3 + $0x408] sm:$0xff] %vm223_vm1, %v3848_v16  ;;  %v2828_v62 = vld [vmem:[#allocation2 + $0x158] sm:$0xff]  ;;  %v2759_v58 = vadd.f32 %v7356_v40, %v2533_v46  ;;  %v2535_v1 = vpop.f32.mrb[61].mxu1 }
 0x353   : > { %3237 = vrot.lane.b32.xlu0 %v3146_v13, %s5927_s23  ;;  %v4001_v5 = vld [vmem:[#allocation3 + $0x390] sm:$0xff]  ;;  %v7783_v15 = vld [vmem:[#allocation2 + $0x152] sm:$0xff]  ;;  %2860 = vst.msk [vmem:[#allocation3 + $0x488] sm:$0xff] %vm223_vm1, %v2828_v62  ;;  %3624 = vst.msk [vmem:[#allocation3 + $0x400] sm:$0xff] %vm223_vm1, %v2828_v62 }
 0x354   : > { %2985 = vrot.lane.b32.xlu1 %v2892_v44, %s5927_s23  ;;  %5402 = vmatprep.mubr.msk.f32.mxu1 %vm223_vm1, %v4001_v5  ;;  %v7785_v35 = vld [vmem:[#allocation2 + $0x15a] sm:$0xff]  ;;  %3115 = vst.msk [vmem:[#allocation3 + $0x468] sm:$0xff] %vm223_vm1, %v7783_v15  ;;  %2797 = vst.msk [vmem:[#allocation2 + $0x181] sm:$0xff] %vm223_vm1, %v2759_v58 }
 0x355   : > { %5403 = vmatmul.mubr.msk.f32.gmra.mrb[86].mxu1 %vm223_vm1, %v4006_v52  ;;  %v7792_v55 = vld [vmem:[#allocation2 + $0x159] sm:$0xff]  ;;  %3116 = vst.msk [vmem:[#allocation3 + $0x490] sm:$0xff] %vm223_vm1, %v7785_v35  ;;  %v3147_v14 = vld [vmem:[#allocation2 + $0x168] sm:$0xff]  ;;  %v2538_v44 = vpop.f32.mrb[62].mxu1 }
 0x356   : > { %v2893_v50 = vld [vmem:[#allocation2 + $0x169] sm:$0xff]  ;;  %3370 = vst.msk [vmem:[#allocation3 + $0x448] sm:$0xff] %vm223_vm1, %v7792_v55  ;;  %v2764_v53 = vadd.f32 %v7347_v7, %v2538_v44  ;;  %v2540_v52 = vpop.f32.mrb[63].mxu1  ;;  %v3184_v16 = vpop.permute.xlu0 %3183 }
 0x357   : > { %v2829_v13 = vld [vmem:[#allocation2 + $0x168] sm:$0xff]  ;;  %3239 = vrot.lane.b32.xlu0 %v3147_v14, %s5927_s23  ;;  %v2932_v5 = vpop.permute.xlu1 %2931  ;;  %3279 = vst.msk [vmem:[#allocation3 + $0x8] sm:$0xff] %vm898_vm6, %v3184_v16 }
 0x358   : > { %2987 = vrot.lane.b32.xlu1 %v2893_v50, %s5927_s23  ;;  %2861 = vst.msk [vmem:[#allocation3 + $0x4b0] sm:$0xff] %vm223_vm1, %v2829_v13  ;;  %v7803_v40 = vld [vmem:[#allocation2 + $0x169] sm:$0xff]  ;;  %3625 = vst.msk [vmem:[#allocation3 + $0x428] sm:$0xff] %vm223_vm1, %v2829_v13  ;;  %v2894_v62 = vld [vmem:[#allocation2 + $0x171] sm:$0xff] }
 0x359   : > { %8463 = vst [vmem:[#allocation7_spill] sm:$0xff] %v7803_v40  ;;  %3371 = vst.msk [vmem:[#allocation3 + $0x470] sm:$0xff] %vm223_vm1, %v7803_v40  ;;  %v3148_v46 = vld [vmem:[#allocation2 + $0x170] sm:$0xff]  ;;  %v4016_v1 = vld [vmem:[#allocation3 + $0x408] sm:$0xff] }
 0x35a   : > { %3025 = vst.msk [vmem:[#allocation3 + $0x50] sm:$0xff] %vm898_vm6, %v2932_v5  ;;  %v4011_v58 = vld [vmem:[#allocation3 + $0x3e0] sm:$0xff]  ;;  %v3186_v52 = vpop.permute.xlu0 %3185 }
 0x35b   : > { %2798 = vst.msk [vmem:[#allocation2 + $0x189] sm:$0xff] %vm223_vm1, %v2764_v53  ;;  %3241 = vrot.lane.b32.xlu0 %v3148_v46, %s5927_s23  ;;  %v3849_v14 = vld [vmem:[#allocation2 + $0x16a] sm:$0xff]  ;;  %v3850_v50 = vld [vmem:[#allocation2 + $0x172] sm:$0xff]  ;;  %5405 = vmatprep.mubr.msk.f32.mxu1 %vm223_vm1, %v4011_v58  ;;  %v2934_v53 = vpop.permute.xlu1 %2933  ;;  %v3149_v16 = vld [vmem:[#allocation2 + $0x180] sm:$0xff] }
 0x35c   : > { %2989 = vrot.lane.b32.xlu1 %v2894_v62, %s5927_s23  ;;  %3881 = vst.msk [vmem:[#allocation3 + $0x430] sm:$0xff] %vm223_vm1, %v3849_v14  ;;  %3882 = vst.msk [vmem:[#allocation3 + $0x458] sm:$0xff] %vm223_vm1, %v3850_v50  ;;  %v2830_v7 = vld [vmem:[#allocation2 + $0x170] sm:$0xff]  ;;  %5406 = vmatmul.mubr.msk.f32.gmra.mrb[88].mxu1 %vm223_vm1, %v4016_v1  ;;  %v7831_v46 = vld [vmem:[#allocation2 + $0x181] sm:$0xff] }
 0x35d   : > { %v7817_v13 = vld [vmem:[#allocation2 + $0x16a] sm:$0xff]  ;;  %v7819_v44 = vld [vmem:[#allocation2 + $0x172] sm:$0xff]  ;;  %2862 = vst.msk [vmem:[#allocation3 + $0x4d8] sm:$0xff] %vm223_vm1, %v2830_v7  ;;  %3626 = vst.msk [vmem:[#allocation3 + $0x450] sm:$0xff] %vm223_vm1, %v2830_v7 }
 0x35e   : > { %8464 = vst [vmem:[#allocation9_spill] sm:$0xff] %v7819_v44  ;;  %3117 = vst.msk [vmem:[#allocation3 + $0x4b8] sm:$0xff] %vm223_vm1, %v7817_v13  ;;  %v7825_v5 = vld [vmem:[#allocation2 + $0x171] sm:$0xff]  ;;  %v3595_v62 = vld [vmem:[#allocation2 + $0x180] sm:$0xff] }
 0x35f   : > { %8465 = vst [vmem:[#allocation8_spill] sm:$0xff] %v7825_v5  ;;  %3118 = vst.msk [vmem:[#allocation3 + $0x4e0] sm:$0xff] %vm223_vm1, %v7819_v44  ;;  %3243 = vrot.lane.b32.xlu0 %v3149_v16, %s5927_s23  ;;  %v4079_v58 = vld [vmem:[%s8437_s3 + $0x100] sm:$0xff]  ;;  %v4080_v1 = vld [vmem:[%s8437_s3 + $0x108] sm:$0xff]  ;;  %v2936_v14 = vpop.permute.xlu1 %2935 }
 0x360   : > { %3026 = vst.msk [vmem:[#allocation3 + $0x78] sm:$0xff] %vm898_vm6, %v2934_v53  ;;  %8466 = vst [vmem:[#allocation10_spill] sm:$0xff] %v7831_v46  ;;  %3439 = vrot.lane.b32.xlu1 %v7379_v8, %s5927_s23  ;;  %v3887_v50 = vld [vmem:[#allocation3] sm:$0xff]  ;;  %v4082_v7 = vld [vmem:[%s8437_s3 + $0x118] sm:$0xff]  ;;  %v3188_v53 = vpop.permute.xlu0 %3187 }
 0x361   : > { %3372 = vst.msk [vmem:[#allocation3 + $0x498] sm:$0xff] %vm223_vm1, %v7825_v5  ;;  %3373 = vst.msk [vmem:[#allocation3 + $0x4c0] sm:$0xff] %vm223_vm1, %v7831_v46  ;;  %v4081_v8 = vld [vmem:[%s8437_s3 + $0x110] sm:$0xff]  ;;  %v5588_v5 = vpack.c.bf16 %v4080_v1, %v4079_v58 }
 0x362   : > { %3280 = vst.msk [vmem:[#allocation3 + $0x30] sm:$0xff] %vm898_vm6, %v3186_v52  ;;  %3027 = vst.msk [vmem:[#allocation3 + $0xa0] sm:$0xff] %vm898_vm6, %v2936_v14  ;;  %v3888_v52 = vld [vmem:[#allocation3 + $0x8] sm:$0xff]  ;;  %v3150_v16 = vld [vmem:[#allocation2 + $0x188] sm:$0xff] }
 0x363   : > { %3627 = vst.msk [vmem:[#allocation3 + $0x478] sm:$0xff] %vm223_vm1, %v3595_v62  ;;  %v7855_v44 = vld [vmem:[#allocation2 + $0x182] sm:$0xff]  ;;  %4286 = vmatprep.mubr.f32.mxu0 %v3888_v52  ;;  %v3852_v40 = vld [vmem:[#allocation2 + $0x18a] sm:$0xff]  ;;  %3245 = vrot.lane.b32.xlu0 %v3150_v16, %s5927_s23  ;;  %v2938_v1 = vpop.permute.xlu1 %2937  ;;  %v3892_v52 = vld [vmem:[#allocation3 + $0x28] sm:$0xff] }
 0x364   : > { %3281 = vst.msk [vmem:[#allocation3 + $0x58] sm:$0xff] %vm898_vm6, %v3188_v53  ;;  %3441 = vrot.lane.b32.xlu1 %v7387_v60, %s5927_s23  ;;  %v4021_v62 = vld [vmem:[#allocation3 + $0x430] sm:$0xff]  ;;  %v4026_v46 = vld [vmem:[#allocation3 + $0x458] sm:$0xff]  ;;  %4287 = vmatmul.mubr.f32.vlgmr.msra.gmra.mrb[64].mxu0 %v3887_v50  ;;  %3028 = vst.msk [vmem:[#allocation3 + $0xc8] sm:$0xff] %vm898_vm6, %v2938_v1  ;;  %v3190_v14 = vpop.permute.xlu0 %3189 }
 0x365   : > { %3883 = vst.msk [vmem:[#allocation3 + $0x480] sm:$0xff] %vm223_vm1, %v7855_v44  ;;  %5408 = vmatprep.mubr.msk.f32.mxu1 %vm223_vm1, %v4021_v62  ;;  %3884 = vst.msk [vmem:[#allocation3 + $0x4a8] sm:$0xff] %vm223_vm1, %v3852_v40  ;;  %v7865_v58 = vld [vmem:[#allocation2 + $0x189] sm:$0xff]  ;;  %5589 = vmatpush1.bf16.msra.mxu0 %v5588_v5  ;;  %v5591_v62 = vpack.c.bf16 %v4082_v7, %v4081_v8  ;;  %v5856_v40 = vld [vmem:[#allocation2 + $0x31] sm:$0xff] }
 0x366   : > { %5409 = vmatmul.mubr.msk.f32.gmra.mrb[90].mxu1 %vm223_vm1, %v4026_v46  ;;  %3374 = vst.msk [vmem:[#allocation3 + $0x4e8] sm:$0xff] %vm223_vm1, %v7865_v58  ;;  %v3596_v60 = vld [vmem:[#allocation2 + $0x188] sm:$0xff]  ;;  %5590 = vmatprep.subr.bf16.mxu0 %v8458_v49  ;;  %v4083_v46 = vld [vmem:[%s8437_s3 + $0x120] sm:$0xff] }
 0x367   : > { %3628 = vst.msk [vmem:[#allocation3 + $0x4a0] sm:$0xff] %vm223_vm1, %v3596_v60  ;;  %3695 = vrot.lane.b32.xlu0 %v5856_v40, %s5927_s23  ;;  %v2940_v5 = vpop.permute.xlu1 %2939  ;;  %v4084_v50 = vld [vmem:[%s8437_s3 + $0x128] sm:$0xff]  ;;  %v5857_v1 = vld [vmem:[#allocation2 + $0x39] sm:$0xff] }
 0x368   : > { %3282 = vst.msk [vmem:[#allocation3 + $0x80] sm:$0xff] %vm898_vm6, %v3190_v14  ;;  %3443 = vrot.lane.b32.xlu1 %v7400_v18, %s5927_s23  ;;  %3029 = vst.msk [vmem:[#allocation3 + $0xf0] sm:$0xff] %vm898_vm6, %v2940_v5  ;;  %v3192_v8 = vpop.permute.xlu0 %3191  ;;  %v3897_v60 = vld [vmem:[#allocation3 + $0x50] sm:$0xff]  ;;  %v5594_v14 = vpack.c.bf16 %v4084_v50, %v4083_v46  ;;  %v5858_v5 = vld [vmem:[#allocation2 + $0x49] sm:$0xff] }
 0x369   : > { %v3893_v53 = vld [vmem:[#allocation3 + $0x30] sm:$0xff]  ;;  %5592 = vmatpush1.bf16.msra.mxu0 %v5591_v62  ;;  %3283 = vst.msk [vmem:[#allocation3 + $0xa8] sm:$0xff] %vm898_vm6, %v3192_v8  ;;  %v3902_v46 = vld [vmem:[#allocation3 + $0x78] sm:$0xff] }
 0x36a   : > { %4291 = vmatprep.mubr.f32.mxu0 %v3893_v53  ;;  %5593 = vmatprep.subr.bf16.mxu0 %v8458_v49 }
 0x36b   : > { %4292 = vmatmul.mubr.f32.gmra.mrb[66].mxu0 %v3892_v52  ;;  %v3898_v7 = vld [vmem:[#allocation3 + $0x58] sm:$0xff]  ;;  %3697 = vrot.lane.b32.xlu0 %v5857_v1, %s5927_s23  ;;  %v2942_v53 = vpop.permute.xlu1 %2941  ;;  %v4085_v52 = vld [vmem:[%s8437_s3 + $0x130] sm:$0xff] }
 0x36c   : > { %v4031_v18 = vld [vmem:[#allocation3 + $0x480] sm:$0xff]  ;;  %4296 = vmatprep.mubr.f32.mxu0 %v3898_v7  ;;  %3445 = vrot.lane.b32.xlu1 %v7407_v29, %s5927_s23  ;;  %v4036_v16 = vld [vmem:[#allocation3 + $0x4a8] sm:$0xff]  ;;  %3030 = vst.msk [vmem:[#allocation3 + $0x118] sm:$0xff] %vm898_vm6, %v2942_v53  ;;  %v3194_v62 = vpop.permute.xlu0 %3193  ;;  %v4087_v7 = vld [vmem:[%s8437_s3 + $0x140] sm:$0xff] }
 0x36d   : > { %5411 = vmatprep.mubr.msk.f32.mxu1 %vm223_vm1, %v4031_v18  ;;  %v4086_v29 = vld [vmem:[%s8437_s3 + $0x138] sm:$0xff]  ;;  %3284 = vst.msk [vmem:[#allocation3 + $0xd0] sm:$0xff] %vm898_vm6, %v3194_v62  ;;  %5595 = vmatpush1.bf16.msra.mxu0 %v5594_v14  ;;  %v4088_v18 = vld [vmem:[%s8437_s3 + $0x148] sm:$0xff] }
 0x36e   : > { %5412 = vmatmul.mubr.msk.f32.gmra.mrb[92].mxu1 %vm223_vm1, %v4036_v16  ;;  %v5597_v50 = vpack.c.bf16 %v4086_v29, %v4085_v52  ;;  %5596 = vmatprep.subr.bf16.mxu0 %v8458_v49  ;;  %v5859_v1 = vld [vmem:[#allocation2 + $0x51] sm:$0xff]  ;;  %v5600_v14 = vpack.c.bf16 %v4088_v18, %v4087_v7  ;;  %v4092_v7 = vld [vmem:[%s8437_s3 + $0x168] sm:$0xff] }
 0x36f   : > { %4297 = vmatmul.mubr.f32.gmra.mrb[68].mxu0 %v3897_v60  ;;  %v3903_v40 = vld [vmem:[#allocation3 + $0x80] sm:$0xff]  ;;  %3699 = vrot.lane.b32.xlu0 %v5858_v5, %s5927_s23  ;;  %v4090_v29 = vld [vmem:[%s8437_s3 + $0x158] sm:$0xff] }
 0x370   : > { %4301 = vmatprep.mubr.f32.mxu0 %v3903_v40  ;;  %3447 = vrot.lane.b32.xlu1 %v7429_v41, %s5927_s23  ;;  %v2944_v8 = vpop.permute.xlu1 %2943  ;;  %v3196_v41 = vpop.permute.xlu0 %3195  ;;  %v3908_v16 = vld [vmem:[#allocation3 + $0xa8] sm:$0xff]  ;;  %v3907_v60 = vld [vmem:[#allocation3 + $0xa0] sm:$0xff]  ;;  %v3635_v40 = vld [vmem:[#allocation2 + $0x61] sm:$0xff] }
 0x371   : > { %3031 = vst.msk [vmem:[#allocation3 + $0x140] sm:$0xff] %vm898_vm6, %v2944_v8  ;;  %3285 = vst.msk [vmem:[#allocation3 + $0xf8] sm:$0xff] %vm898_vm6, %v3196_v41  ;;  %5598 = vmatpush1.bf16.msra.mxu0 %v5597_v50  ;;  %v4089_v52 = vld [vmem:[%s8437_s3 + $0x150] sm:$0xff]  ;;  %v3912_v5 = vld [vmem:[#allocation3 + $0xc8] sm:$0xff] }
 0x372   : > { %5599 = vmatprep.subr.bf16.mxu0 %v8458_v49  ;;  %v4091_v8 = vld [vmem:[%s8437_s3 + $0x160] sm:$0xff] }
 0x373   : > { %4302 = vmatmul.mubr.f32.gmra.mrb[70].mxu0 %v3902_v46  ;;  %3701 = vrot.lane.b32.xlu0 %v5859_v1, %s5927_s23  ;;  %v5603_v46 = vpack.c.bf16 %v4090_v29, %v4089_v52  ;;  %v3917_v41 = vld [vmem:[#allocation3 + $0xf0] sm:$0xff] }
 0x374   : > { %4306 = vmatprep.mubr.f32.mxu0 %v3908_v16  ;;  %3449 = vrot.lane.b32.xlu1 %v7431_v34, %s5927_s23  ;;  %v2946_v53 = vpop.permute.xlu1 %2945  ;;  %v3198_v34 = vpop.permute.xlu0 %3197  ;;  %v3913_v62 = vld [vmem:[#allocation3 + $0xd0] sm:$0xff]  ;;  %v5606_v16 = vpack.c.bf16 %v4092_v7, %v4091_v8  ;;  %v4098_v8 = vld [vmem:[%s8437_s3 + $0x198] sm:$0xff] }
 0x375   : > { %3032 = vst.msk [vmem:[#allocation3 + $0x168] sm:$0xff] %vm898_vm6, %v2946_v53  ;;  %3286 = vst.msk [vmem:[#allocation3 + $0x120] sm:$0xff] %vm898_vm6, %v3198_v34  ;;  %5601 = vmatpush1.bf16.msra.mxu0 %v5600_v14  ;;  %v4094_v14 = vld [vmem:[%s8437_s3 + $0x178] sm:$0xff]  ;;  %v4095_v34 = vld [vmem:[%s8437_s3 + $0x180] sm:$0xff] }
 0x376   : > { %5602 = vmatprep.subr.bf16.mxu0 %v8458_v49 }
 0x377   : > { %4307 = vmatmul.mubr.f32.gmra.mrb[72].mxu0 %v3907_v60  ;;  %3703 = vrot.lane.b32.xlu0 %v3635_v40, %s5927_s23  ;;  %v4093_v60 = vld [vmem:[%s8437_s3 + $0x170] sm:$0xff] }
 0x378   : > { %4311 = vmatprep.mubr.f32.mxu0 %v3913_v62  ;;  %3451 = vrot.lane.b32.xlu1 %v7454_v59, %s5927_s23  ;;  %v2948_v50 = vpop.permute.xlu1 %2947  ;;  %v3200_v59 = vpop.permute.xlu0 %3199  ;;  %v3918_v18 = vld [vmem:[#allocation3 + $0xf8] sm:$0xff]  ;;  %v5609_v52 = vpack.c.bf16 %v4094_v14, %v4093_v60 }
 0x379   : > { %3033 = vst.msk [vmem:[#allocation3 + $0x190] sm:$0xff] %vm898_vm6, %v2948_v50  ;;  %3287 = vst.msk [vmem:[#allocation3 + $0x148] sm:$0xff] %vm898_vm6, %v3200_v59  ;;  %5604 = vmatpush1.bf16.msra.mxu0 %v5603_v46  ;;  %v4096_v62 = vld [vmem:[%s8437_s3 + $0x188] sm:$0xff]  ;;  %v4097_v50 = vld [vmem:[%s8437_s3 + $0x190] sm:$0xff] }
 0x37a   : > { %5605 = vmatprep.subr.bf16.mxu0 %v8458_v49  ;;  %v5615_v59 = vpack.c.bf16 %v4098_v8, %v4097_v50 }
 0x37b   : > { %4312 = vmatmul.mubr.f32.gmra.mrb[74].mxu0 %v3912_v5  ;;  %3705 = vrot.lane.b32.xlu0 %v7469_v6, %s5927_s23  ;;  %v3922_v6 = vld [vmem:[#allocation3 + $0x118] sm:$0xff]  ;;  %v5612_v5 = vpack.c.bf16 %v4096_v62, %v4095_v34  ;;  %v4103_v34 = vld [vmem:[%s8437_s3 + $0x1c0] sm:$0xff] }
 0x37c   : > { %4316 = vmatprep.mubr.f32.mxu0 %v3918_v18  ;;  %3453 = vrot.lane.b32.xlu1 %v7461_v63, %s5927_s23  ;;  %v2950_v1 = vpop.permute.xlu1 %2949  ;;  %v3202_v63 = vpop.permute.xlu0 %3201  ;;  %v3923_v53 = vld [vmem:[#allocation3 + $0x120] sm:$0xff]  ;;  %v4104_v62 = vld [vmem:[%s8437_s3 + $0x1c8] sm:$0xff] }
 0x37d   : > { %3034 = vst.msk [vmem:[#allocation3 + $0x1b8] sm:$0xff] %vm898_vm6, %v2950_v1  ;;  %3288 = vst.msk [vmem:[#allocation3 + $0x170] sm:$0xff] %vm898_vm6, %v3202_v63  ;;  %5607 = vmatpush1.bf16.msra.mxu0 %v5606_v16  ;;  %v4100_v16 = vld [vmem:[%s8437_s3 + $0x1a8] sm:$0xff]  ;;  %v4101_v63 = vld [vmem:[%s8437_s3 + $0x1b0] sm:$0xff] }
 0x37e   : > { %5608 = vmatprep.subr.bf16.mxu0 %v8458_v49 }
 0x37f   : > { %4317 = vmatmul.mubr.f32.gmra.mrb[76].mxu0 %v3917_v41  ;;  %3707 = vrot.lane.b32.xlu0 %v7478_v54, %s5927_s23  ;;  %v3927_v54 = vld [vmem:[#allocation3 + $0x140] sm:$0xff]  ;;  %v4099_v41 = vld [vmem:[%s8437_s3 + $0x1a0] sm:$0xff] }
 0x380   : > { %4321 = vmatprep.mubr.f32.mxu0 %v3923_v53  ;;  %3455 = vrot.lane.b32.xlu1 %v7491_v43, %s5927_s23  ;;  %v2952_v29 = vpop.permute.xlu1 %2951  ;;  %v3204_v43 = vpop.permute.xlu0 %3203  ;;  %v3928_v40 = vld [vmem:[#allocation3 + $0x148] sm:$0xff]  ;;  %v5618_v60 = vpack.c.bf16 %v4100_v16, %v4099_v41  ;;  %v4109_v16 = vld [vmem:[%s8437_s3 + $0x1f0] sm:$0xff] }
 0x381   : > { %3035 = vst.msk [vmem:[#allocation3 + $0x1e0] sm:$0xff] %vm898_vm6, %v2952_v29  ;;  %3289 = vst.msk [vmem:[#allocation3 + $0x198] sm:$0xff] %vm898_vm6, %v3204_v43  ;;  %5610 = vmatpush1.bf16.msra.mxu0 %v5609_v52  ;;  %v4102_v53 = vld [vmem:[%s8437_s3 + $0x1b8] sm:$0xff] }
 0x382   : > { %5611 = vmatprep.subr.bf16.mxu0 %v8458_v49  ;;  %v5621_v52 = vpack.c.bf16 %v4102_v53, %v4101_v63 }
 0x383   : > { %4322 = vmatmul.mubr.f32.gmra.mrb[78].mxu0 %v3922_v6  ;;  %3709 = vrot.lane.b32.xlu0 %v7503_v12, %s5927_s23  ;;  %v3932_v12 = vld [vmem:[#allocation3 + $0x168] sm:$0xff] }
 0x384   : > { %4326 = vmatprep.mubr.f32.mxu0 %v3928_v40  ;;  %3457 = vrot.lane.b32.xlu1 %v7493_v39, %s5927_s23  ;;  %v2954_v46 = vpop.permute.xlu1 %2953  ;;  %v3206_v39 = vpop.permute.xlu0 %3205  ;;  %v3933_v7 = vld [vmem:[#allocation3 + $0x170] sm:$0xff]  ;;  %v5624_v40 = vpack.c.bf16 %v4104_v62, %v4103_v34 }
 0x385   : > { %3036 = vst.msk [vmem:[#allocation3 + $0x208] sm:$0xff] %vm898_vm6, %v2954_v46  ;;  %3290 = vst.msk [vmem:[#allocation3 + $0x1c0] sm:$0xff] %vm898_vm6, %v3206_v39  ;;  %5613 = vmatpush1.bf16.msra.mxu0 %v5612_v5  ;;  %v4105_v5 = vld [vmem:[%s8437_s3 + $0x1d0] sm:$0xff]  ;;  %v4106_v46 = vld [vmem:[%s8437_s3 + $0x1d8] sm:$0xff] }
 0x386   : > { %5614 = vmatprep.subr.bf16.mxu0 %v8458_v49  ;;  %v5627_v8 = vpack.c.bf16 %v4106_v46, %v4105_v5 }
 0x387   : > { %4327 = vmatmul.mubr.f32.gmra.mrb[80].mxu0 %v3927_v54  ;;  %3711 = vrot.lane.b32.xlu0 %v7511_v3, %s5927_s23  ;;  %v3937_v3 = vld [vmem:[#allocation3 + $0x190] sm:$0xff] }
 0x388   : > { %4331 = vmatprep.mubr.f32.mxu0 %v3933_v7  ;;  %3459 = vrot.lane.b32.xlu1 %v7521_v51, %s5927_s23  ;;  %v2956_v18 = vpop.permute.xlu1 %2955  ;;  %v3208_v51 = vpop.permute.xlu0 %3207  ;;  %v3938_v1 = vld [vmem:[#allocation3 + $0x198] sm:$0xff]  ;;  %v4107_v7 = vld [vmem:[%s8437_s3 + $0x1e0] sm:$0xff] }
 0x389   : > { %3037 = vst.msk [vmem:[#allocation3 + $0x230] sm:$0xff] %vm898_vm6, %v2956_v18  ;;  %3291 = vst.msk [vmem:[#allocation3 + $0x1e8] sm:$0xff] %vm898_vm6, %v3208_v51  ;;  %5616 = vmatpush1.bf16.msra.mxu0 %v5615_v59  ;;  %v4110_v51 = vld [vmem:[%s8437_s3 + $0x1f8] sm:$0xff] }
 0x38a   : > { %5617 = vmatprep.subr.bf16.mxu0 %v8458_v49 }
 0x38b   : > { %4332 = vmatmul.mubr.f32.gmra.mrb[82].mxu0 %v3932_v12  ;;  %3713 = vrot.lane.b32.xlu0 %v7536_v4, %s5927_s23  ;;  %v3942_v4 = vld [vmem:[#allocation3 + $0x1b8] sm:$0xff] }
 0x38c   : > { %4336 = vmatprep.mubr.f32.mxu0 %v3938_v1  ;;  %3461 = vrot.lane.b32.xlu1 %v7530_v32, %s5927_s23  ;;  %v2958_v14 = vpop.permute.xlu1 %2957  ;;  %v3210_v32 = vpop.permute.xlu0 %3209  ;;  %v3943_v6 = vld [vmem:[#allocation3 + $0x1c0] sm:$0xff]  ;;  %v4108_v12 = vld [vmem:[%s8437_s3 + $0x1e8] sm:$0xff] }
 0x38d   : > { %3038 = vst.msk [vmem:[#allocation3 + $0x258] sm:$0xff] %vm898_vm6, %v2958_v14  ;;  %3292 = vst.msk [vmem:[#allocation3 + $0x210] sm:$0xff] %vm898_vm6, %v3210_v32  ;;  %5619 = vmatpush1.bf16.msra.mxu0 %v5618_v60  ;;  %v5630_v18 = vpack.c.bf16 %v4108_v12, %v4107_v7 }
 0x38e   : > { %5620 = vmatprep.subr.bf16.mxu0 %v8458_v49 }
 0x38f   : > { %4337 = vmatmul.mubr.f32.gmra.mrb[84].mxu0 %v3937_v3  ;;  %3715 = vrot.lane.b32.xlu0 %v7546_v28, %s5927_s23  ;;  %v3947_v28 = vld [vmem:[#allocation3 + $0x1e0] sm:$0xff]  ;;  %v5633_v3 = vpack.c.bf16 %v4110_v51, %v4109_v16  ;;  %v8469_v16 = vld [vmem:[#allocation8_spill] sm:$0xff] }
 0x390   : > { %4341 = vmatprep.mubr.f32.mxu0 %v3943_v6  ;;  %3463 = vrot.lane.b32.xlu1 %v7559_v61, %s5927_s23  ;;  %v2960_v29 = vpop.permute.xlu1 %2959  ;;  %v3212_v61 = vpop.permute.xlu0 %3211  ;;  %v3948_v43 = vld [vmem:[#allocation3 + $0x1e8] sm:$0xff] }
 0x391   : > { %3039 = vst.msk [vmem:[#allocation3 + $0x280] sm:$0xff] %vm898_vm6, %v2960_v29  ;;  %3293 = vst.msk [vmem:[#allocation3 + $0x238] sm:$0xff] %vm898_vm6, %v3212_v61  ;;  %5622 = vmatpush1.bf16.msra.mxu0 %v5621_v52 }
 0x392   : > { %5623 = vmatprep.subr.bf16.mxu0 %v8458_v49 }
 0x393   : > { %4342 = vmatmul.mubr.f32.gmra.mrb[86].mxu0 %v3942_v4  ;;  %3717 = vrot.lane.b32.xlu0 %v7568_v47, %s5927_s23  ;;  %v3952_v47 = vld [vmem:[#allocation3 + $0x208] sm:$0xff] }
 0x394   : > { %4346 = vmatprep.mubr.f32.mxu0 %v3948_v43  ;;  %3465 = vrot.lane.b32.xlu1 %v7561_v9, %s5927_s23  ;;  %v2962_v54 = vpop.permute.xlu1 %2961  ;;  %v3214_v9 = vpop.permute.xlu0 %3213  ;;  %v3953_v50 = vld [vmem:[#allocation3 + $0x210] sm:$0xff] }
 0x395   : > { %3040 = vst.msk [vmem:[#allocation3 + $0x2a8] sm:$0xff] %vm898_vm6, %v2962_v54  ;;  %3294 = vst.msk [vmem:[#allocation3 + $0x260] sm:$0xff] %vm898_vm6, %v3214_v9  ;;  %5625 = vmatpush1.bf16.msra.mxu0 %v5624_v40 }
 0x396   : > { %5626 = vmatprep.subr.bf16.mxu0 %v8458_v49 }
 0x397   : > { %4347 = vmatmul.mubr.f32.gmra.mrb[88].mxu0 %v3947_v28  ;;  %3719 = vrot.lane.b32.xlu0 %v7579_v42, %s5927_s23  ;;  %v3957_v42 = vld [vmem:[#allocation3 + $0x230] sm:$0xff] }
 0x398   : > { %4351 = vmatprep.mubr.f32.mxu0 %v3953_v50  ;;  %3467 = vrot.lane.b32.xlu1 %v7591_v48, %s5927_s23  ;;  %v3216_v48 = vpop.permute.xlu0 %3215  ;;  %v3958_v59 = vld [vmem:[#allocation3 + $0x238] sm:$0xff] }
 0x399   : > { %v2964_v39 = vpop.permute.xlu1 %2963  ;;  %3295 = vst.msk [vmem:[#allocation3 + $0x288] sm:$0xff] %vm898_vm6, %v3216_v48  ;;  %5628 = vmatpush1.bf16.msra.mxu0 %v5627_v8 }
 0x39a   : > { %3041 = vst.msk [vmem:[#allocation3 + $0x2d0] sm:$0xff] %vm898_vm6, %v2964_v39  ;;  %5629 = vmatprep.subr.bf16.mxu0 %v8458_v49 }
 0x39b   : > { %4352 = vmatmul.mubr.f32.gmra.mrb[90].mxu0 %v3952_v47  ;;  %3721 = vrot.lane.b32.xlu0 %v7600_v10, %s5927_s23  ;;  %v3962_v10 = vld [vmem:[#allocation3 + $0x258] sm:$0xff] }
 0x39c   : > { %4356 = vmatprep.mubr.f32.mxu0 %v3958_v59  ;;  %3469 = vrot.lane.b32.xlu1 %v7593_v27, %s5927_s23  ;;  %v3218_v27 = vpop.permute.xlu0 %3217  ;;  %v3963_v1 = vld [vmem:[#allocation3 + $0x260] sm:$0xff] }
 0x39d   : > { %v2966_v41 = vpop.permute.xlu1 %2965  ;;  %3296 = vst.msk [vmem:[#allocation3 + $0x2b0] sm:$0xff] %vm898_vm6, %v3218_v27  ;;  %5631 = vmatpush1.bf16.msra.mxu0 %v5630_v18 }
 0x39e   : > { %3042 = vst.msk [vmem:[#allocation3 + $0x2f8] sm:$0xff] %vm898_vm6, %v2966_v41  ;;  %5632 = vmatprep.subr.bf16.mxu0 %v8458_v49 }
 0x39f   : > { %4357 = vmatmul.mubr.f32.gmra.mrb[92].mxu0 %v3957_v42  ;;  %3723 = vrot.lane.b32.xlu0 %v7611_v17, %s5927_s23  ;;  %v3967_v17 = vld [vmem:[#allocation3 + $0x280] sm:$0xff]  ;;  %v3597_v42 = vld [vmem:[#allocation2 + $0x198] sm:$0xff] }
 0x3a0   : > { %4361 = vmatprep.mubr.f32.mxu0 %v3963_v1  ;;  %3471 = vrot.lane.b32.xlu1 %v7623_v56, %s5927_s23  ;;  %v3220_v14 = vpop.permute.xlu0 %3219  ;;  %v3968_v63 = vld [vmem:[#allocation3 + $0x288] sm:$0xff]  ;;  %3629 = vst.msk [vmem:[#allocation3 + $0x4c8] sm:$0xff] %vm223_vm1, %v3597_v42  ;;  %v3598_v1 = vld [vmem:[#allocation2 + $0x1a0] sm:$0xff] }
 0x3a1   : > { %v2968_v60 = vpop.permute.xlu1 %2967  ;;  %3297 = vst.msk [vmem:[#allocation3 + $0x2d8] sm:$0xff] %vm898_vm6, %v3220_v14  ;;  %5634 = vmatpush1.bf16.msra.mxu0 %v5633_v3  ;;  %v8470_v14 = vld [vmem:[#allocation10_spill] sm:$0xff] }
 0x3a2   : > { %3043 = vst.msk [vmem:[#allocation3 + $0x320] sm:$0xff] %vm898_vm6, %v2968_v60 }
 0x3a3   : > { %4362 = vmatmul.mubr.f32.gmra.mrb[94].mxu0 %v3962_v10  ;;  %3725 = vrot.lane.b32.xlu0 %v7632_v11, %s5927_s23  ;;  %3630 = vst.msk [vmem:[#allocation3 + $0x4f0] sm:$0xff] %vm223_vm1, %v3598_v1 }
 0x3a4   : > { %4366 = vmatprep.mubr.f32.mxu0 %v3968_v63  ;;  %3473 = vrot.lane.b32.xlu1 %v7625_v45, %s5927_s23  ;;  %v3222_v49 = vpop.permute.xlu0 %3221  ;;  %v3973_v53 = vld [vmem:[#allocation3 + $0x2b0] sm:$0xff]  ;;  %v3972_v45 = vld [vmem:[#allocation3 + $0x2a8] sm:$0xff] }
 0x3a5   : > { %v2970_v56 = vpop.permute.xlu1 %2969  ;;  %3298 = vst.msk [vmem:[#allocation3 + $0x300] sm:$0xff] %vm898_vm6, %v3222_v49 }
 0x3a6   : > { %3044 = vst.msk [vmem:[#allocation3 + $0x348] sm:$0xff] %vm898_vm6, %v2970_v56 }
 0x3a7   : > { %4367 = vmatmul.mubr.f32.gmra.mrb[96].mxu0 %v3967_v17  ;;  %3727 = vrot.lane.b32.xlu0 %v7643_v30, %s5927_s23 }
 0x3a8   : > { %4371 = vmatprep.mubr.f32.mxu0 %v3973_v53  ;;  %3475 = vrot.lane.b32.xlu1 %v7655_v20, %s5927_s23  ;;  %v3224_v32 = vpop.permute.xlu0 %3223  ;;  %v3978_v6 = vld [vmem:[#allocation3 + $0x2d8] sm:$0xff]  ;;  %v3977_v20 = vld [vmem:[#allocation3 + $0x2d0] sm:$0xff] }
 0x3a9   : > { %v2972_v11 = vpop.permute.xlu1 %2971  ;;  %3299 = vst.msk [vmem:[#allocation3 + $0x328] sm:$0xff] %vm898_vm6, %v3224_v32  ;;  %v3661_v32 = vld [vmem:[#allocation2 + $0x199] sm:$0xff] }
 0x3aa   : > { %3045 = vst.msk [vmem:[#allocation3 + $0x370] sm:$0xff] %vm898_vm6, %v2972_v11 }
 0x3ab   : > { %4372 = vmatmul.mubr.f32.gmra.mrb[98].mxu0 %v3972_v45  ;;  %3729 = vrot.lane.b32.xlu0 %v7664_v37, %s5927_s23  ;;  %v3406_v45 = vld [vmem:[#allocation2 + $0x18a] sm:$0xff] }
 0x3ac   : > { %4376 = vmatprep.mubr.f32.mxu0 %v3978_v6  ;;  %3477 = vrot.lane.b32.xlu1 %v7657_v33, %s5927_s23  ;;  %v3226_v30 = vpop.permute.xlu0 %3225  ;;  %v3983_v52 = vld [vmem:[#allocation3 + $0x300] sm:$0xff]  ;;  %v3982_v33 = vld [vmem:[#allocation3 + $0x2f8] sm:$0xff]  ;;  %v4041_v6 = vld [vmem:[#allocation3 + $0x4d0] sm:$0xff] }
 0x3ad   : > { %v2974_v4 = vpop.permute.xlu1 %2973  ;;  %3300 = vst.msk [vmem:[#allocation3 + $0x350] sm:$0xff] %vm898_vm6, %v3226_v30  ;;  %5414 = vmatprep.mubr.msk.f32.mxu1 %vm223_vm1, %v4041_v6 }
 0x3ae   : > { %3046 = vst.msk [vmem:[#allocation3 + $0x398] sm:$0xff] %vm898_vm6, %v2974_v4 }
 0x3af   : > { %4377 = vmatmul.mubr.f32.gmra.mrb[100].mxu0 %v3977_v20  ;;  %3731 = vrot.lane.b32.xlu0 %v7675_v38, %s5927_s23  ;;  %v4046_v20 = vld [vmem:[#allocation3 + $0x4f8] sm:$0xff] }
 0x3b0   : > { %4381 = vmatprep.mubr.f32.mxu0 %v3983_v52  ;;  %3479 = vrot.lane.b32.xlu1 %v7687_v36, %s5927_s23  ;;  %v3988_v34 = vld [vmem:[#allocation3 + $0x328] sm:$0xff]  ;;  %v3987_v36 = vld [vmem:[#allocation3 + $0x320] sm:$0xff] }
 0x3b1   : > { %v3228_v37 = vpop.permute.xlu0 %3227  ;;  %5415 = vmatmul.mubr.msk.f32.gmra.mrb[94].mxu1 %vm223_vm1, %v4046_v20 }
 0x3b2   : > { %v2976_v29 = vpop.permute.xlu1 %2975  ;;  %3301 = vst.msk [vmem:[#allocation3 + $0x378] sm:$0xff] %vm898_vm6, %v3228_v37  ;;  %v3662_v37 = vld [vmem:[#allocation2 + $0x1a1] sm:$0xff] }
 0x3b3   : > { %4382 = vmatmul.mubr.f32.gmra.mrb[102].mxu0 %v3982_v33  ;;  %3047 = vst.msk [vmem:[#allocation3 + $0x3c0] sm:$0xff] %vm898_vm6, %v2976_v29  ;;  %3733 = vrot.lane.b32.xlu0 %v7696_v57, %s5927_s23 }
 0x3b4   : > { %4386 = vmatprep.mubr.f32.mxu0 %v3988_v34  ;;  %3481 = vrot.lane.b32.xlu1 %v7689_v22, %s5927_s23  ;;  %v3993_v61 = vld [vmem:[#allocation3 + $0x350] sm:$0xff]  ;;  %v3992_v22 = vld [vmem:[#allocation3 + $0x348] sm:$0xff] }
 0x3b5   : > { %v3230_v38 = vpop.permute.xlu0 %3229 }
 0x3b6   : > { %v2978_v62 = vpop.permute.xlu1 %2977  ;;  %3302 = vst.msk [vmem:[#allocation3 + $0x3a0] sm:$0xff] %vm898_vm6, %v3230_v38 }
 0x3b7   : > { %4387 = vmatmul.mubr.f32.gmra.mrb[104].mxu0 %v3987_v36  ;;  %3048 = vst.msk [vmem:[#allocation3 + $0x3e8] sm:$0xff] %vm898_vm6, %v2978_v62  ;;  %3735 = vrot.lane.b32.xlu0 %v7707_v19, %s5927_s23 }
 0x3b8   : > { %4391 = vmatprep.mubr.f32.mxu0 %v3993_v61  ;;  %3483 = vrot.lane.b32.xlu1 %v7719_v21, %s5927_s23  ;;  %v3997_v21 = vld [vmem:[#allocation3 + $0x370] sm:$0xff] }
 0x3b9   : > { %v3232_v57 = vpop.permute.xlu0 %3231  ;;  %v3998_v28 = vld [vmem:[#allocation3 + $0x378] sm:$0xff] }
 0x3ba   : > { %v2980_v43 = vpop.permute.xlu1 %2979  ;;  %3303 = vst.msk [vmem:[#allocation3 + $0x3c8] sm:$0xff] %vm898_vm6, %v3232_v57 }
 0x3bb   : > { %4392 = vmatmul.mubr.f32.gmra.mrb[106].mxu0 %v3992_v22  ;;  %3049 = vst.msk [vmem:[#allocation3 + $0x410] sm:$0xff] %vm898_vm6, %v2980_v43  ;;  %3737 = vrot.lane.b32.xlu0 %v7728_v25, %s5927_s23 }
 0x3bc   : > { %4396 = vmatprep.mubr.f32.mxu0 %v3998_v28  ;;  %3485 = vrot.lane.b32.xlu1 %v7721_v2, %s5927_s23  ;;  %v4002_v2 = vld [vmem:[#allocation3 + $0x398] sm:$0xff] }
 0x3bd   : > { %v3234_v19 = vpop.permute.xlu0 %3233  ;;  %v4003_v54 = vld [vmem:[#allocation3 + $0x3a0] sm:$0xff] }
 0x3be   : > { %v2982_v40 = vpop.permute.xlu1 %2981  ;;  %3304 = vst.msk [vmem:[#allocation3 + $0x3f0] sm:$0xff] %vm898_vm6, %v3234_v19 }
 0x3bf   : > { %4397 = vmatmul.mubr.f32.gmra.mrb[108].mxu0 %v3997_v21  ;;  %3050 = vst.msk [vmem:[#allocation3 + $0x438] sm:$0xff] %vm898_vm6, %v2982_v40  ;;  %3739 = vrot.lane.b32.xlu0 %v7739_v31, %s5927_s23 }
 0x3c0   : > { %4401 = vmatprep.mubr.f32.mxu0 %v4003_v54  ;;  %3487 = vrot.lane.b32.xlu1 %v7751_v24, %s5927_s23  ;;  %v4007_v24 = vld [vmem:[#allocation3 + $0x3c0] sm:$0xff] }
 0x3c1   : > { %v3236_v25 = vpop.permute.xlu0 %3235  ;;  %v4008_v46 = vld [vmem:[#allocation3 + $0x3c8] sm:$0xff] }
 0x3c2   : > { %v2984_v5 = vpop.permute.xlu1 %2983  ;;  %3305 = vst.msk [vmem:[#allocation3 + $0x418] sm:$0xff] %vm898_vm6, %v3236_v25 }
 0x3c3   : > { %4402 = vmatmul.mubr.f32.gmra.mrb[110].mxu0 %v4002_v2  ;;  %3051 = vst.msk [vmem:[#allocation3 + $0x460] sm:$0xff] %vm898_vm6, %v2984_v5  ;;  %3741 = vrot.lane.b32.xlu0 %v7760_v26, %s5927_s23 }
 0x3c4   : > { %4406 = vmatprep.mubr.f32.mxu0 %v4008_v46  ;;  %3489 = vrot.lane.b32.xlu1 %v7753_v23, %s5927_s23  ;;  %v4012_v23 = vld [vmem:[#allocation3 + $0x3e8] sm:$0xff] }
 0x3c5   : > { %v3238_v31 = vpop.permute.xlu0 %3237  ;;  %v4013_v50 = vld [vmem:[#allocation3 + $0x3f0] sm:$0xff] }
 0x3c6   : > { %v2986_v9 = vpop.permute.xlu1 %2985  ;;  %3306 = vst.msk [vmem:[#allocation3 + $0x440] sm:$0xff] %vm898_vm6, %v3238_v31  ;;  %v4022_v48 = vld [vmem:[#allocation3 + $0x438] sm:$0xff] }
 0x3c7   : > { %4407 = vmatmul.mubr.f32.gmra.mrb[112].mxu0 %v4007_v24  ;;  %3052 = vst.msk [vmem:[#allocation3 + $0x488] sm:$0xff] %vm898_vm6, %v2986_v9  ;;  %3743 = vrot.lane.b32.xlu0 %v7771_v0, %s5927_s23 }
 0x3c8   : > { %4411 = vmatprep.mubr.f32.mxu0 %v4013_v50  ;;  %3491 = vrot.lane.b32.xlu1 %v7783_v15, %s5927_s23  ;;  %v4017_v15 = vld [vmem:[#allocation3 + $0x410] sm:$0xff] }
 0x3c9   : > { %v3240_v26 = vpop.permute.xlu0 %3239  ;;  %v4018_v8 = vld [vmem:[#allocation3 + $0x418] sm:$0xff] }
 0x3ca   : > { %v2988_v47 = vpop.permute.xlu1 %2987  ;;  %3307 = vst.msk [vmem:[#allocation3 + $0x468] sm:$0xff] %vm898_vm6, %v3240_v26  ;;  %v4027_v51 = vld [vmem:[#allocation3 + $0x460] sm:$0xff] }
 0x3cb   : > { %4412 = vmatmul.mubr.f32.gmra.mrb[114].mxu0 %v4012_v23  ;;  %3053 = vst.msk [vmem:[#allocation3 + $0x4b0] sm:$0xff] %vm898_vm6, %v2988_v47  ;;  %3745 = vrot.lane.b32.xlu0 %v7792_v55, %s5927_s23 }
 0x3cc   : > { %4416 = vmatprep.mubr.f32.mxu0 %v4018_v8  ;;  %3493 = vrot.lane.b32.xlu1 %v7785_v35, %s5927_s23  ;;  %v8467_v35 = vld [vmem:[#allocation7_spill] sm:$0xff] }
 0x3cd   : > { %v3242_v0 = vpop.permute.xlu0 %3241  ;;  %v4023_v7 = vld [vmem:[#allocation3 + $0x440] sm:$0xff] }
 0x3ce   : > { %v2990_v39 = vpop.permute.xlu1 %2989  ;;  %3308 = vst.msk [vmem:[#allocation3 + $0x490] sm:$0xff] %vm898_vm6, %v3242_v0  ;;  %v8127_v12 = vpop.f32.mrb[64].mxu1  ;;  %v4032_v63 = vld [vmem:[#allocation3 + $0x488] sm:$0xff] }
 0x3cf   : > { %4417 = vmatmul.mubr.f32.gmra.mrb[116].mxu0 %v4017_v15  ;;  %3054 = vst.msk [vmem:[#allocation3 + $0x4d8] sm:$0xff] %vm898_vm6, %v2990_v39  ;;  %3747 = vrot.lane.b32.xlu0 %v8467_v35, %s5927_s23  ;;  %v8131_v55 = vpop.f32.mrb[65].mxu1 }
 0x3d0   : > { %4421 = vmatprep.mubr.f32.mxu0 %v4023_v7  ;;  %3495 = vrot.lane.b32.xlu1 %v7817_v13, %s5927_s23  ;;  %v8468_v13 = vld [vmem:[#allocation9_spill] sm:$0xff] }
 0x3d1   : > { %v3244_v18 = vpop.permute.xlu0 %3243  ;;  %v4028_v41 = vld [vmem:[#allocation3 + $0x468] sm:$0xff] }
 0x3d2   : > { %v3440_v59 = vpop.permute.xlu1 %3439  ;;  %3309 = vst.msk [vmem:[#allocation3 + $0x4b8] sm:$0xff] %vm898_vm6, %v3244_v18 }
 0x3d3   : > { %4422 = vmatmul.mubr.f32.gmra.mrb[118].mxu0 %v4022_v48  ;;  %3535 = vst.msk [vmem:[#allocation3 + $0x10] sm:$0xff] %vm898_vm6, %v3440_v59  ;;  %3749 = vrot.lane.b32.xlu0 %v8469_v16, %s5927_s23 }
 0x3d4   : > { %4426 = vmatprep.mubr.f32.mxu0 %v4028_v41  ;;  %3497 = vrot.lane.b32.xlu1 %v8468_v13, %s5927_s23 }
 0x3d5   : > { %v3246_v10 = vpop.permute.xlu0 %3245  ;;  %v4033_v3 = vld [vmem:[#allocation3 + $0x490] sm:$0xff] }
 0x3d6   : > { %v3442_v27 = vpop.permute.xlu1 %3441  ;;  %3310 = vst.msk [vmem:[#allocation3 + $0x4e0] sm:$0xff] %vm898_vm6, %v3246_v10 }
 0x3d7   : > { %4427 = vmatmul.mubr.f32.gmra.mrb[120].mxu0 %v4027_v51  ;;  %3536 = vst.msk [vmem:[#allocation3 + $0x38] sm:$0xff] %vm898_vm6, %v3442_v27  ;;  %v8145_v60 = vpop.f32.mrb[66].mxu1  ;;  %3751 = vrot.lane.b32.xlu0 %v8470_v14, %s5927_s23 }
 0x3d8   : > { %4431 = vmatprep.mubr.f32.mxu0 %v4033_v3  ;;  %3499 = vrot.lane.b32.xlu1 %v7855_v44, %s5927_s23  ;;  %v8149_v17 = vpop.f32.mrb[67].mxu1  ;;  %v4037_v44 = vld [vmem:[#allocation3 + $0x4b0] sm:$0xff] }
 0x3d9   : > { %v3696_v49 = vpop.permute.xlu0 %3695  ;;  %v4038_v53 = vld [vmem:[#allocation3 + $0x4b8] sm:$0xff] }
 0x3da   : > { %v3444_v56 = vpop.permute.xlu1 %3443  ;;  %3791 = vst.msk [vmem:[#allocation3 + $0x18] sm:$0xff] %vm898_vm6, %v3696_v49  ;;  %v3889_v62 = vld [vmem:[#allocation3 + $0x10] sm:$0xff] }
 0x3db   : > { %4432 = vmatmul.mubr.f32.gmra.mrb[122].mxu0 %v4032_v63  ;;  %3537 = vst.msk [vmem:[#allocation3 + $0x60] sm:$0xff] %vm898_vm6, %v3444_v56  ;;  %3753 = vrot.lane.b32.xlu0 %v7865_v58, %s5927_s23  ;;  %v4042_v58 = vld [vmem:[#allocation3 + $0x4d8] sm:$0xff] }
 0x3dc   : > { %4436 = vmatprep.mubr.f32.mxu0 %v4038_v53  ;;  %3501 = vrot.lane.b32.xlu1 %v3406_v45, %s5927_s23 }
 0x3dd   : > { %v3698_v4 = vpop.permute.xlu0 %3697  ;;  %v4043_v30 = vld [vmem:[#allocation3 + $0x4e0] sm:$0xff] }
 0x3de   : > { %v3446_v11 = vpop.permute.xlu1 %3445  ;;  %3792 = vst.msk [vmem:[#allocation3 + $0x40] sm:$0xff] %vm898_vm6, %v3698_v4  ;;  %v8160_v52 = vpop.f32.mrb[68].mxu1  ;;  %v3894_v43 = vld [vmem:[#allocation3 + $0x38] sm:$0xff] }
 0x3df   : > { %4437 = vmatmul.mubr.f32.gmra.mrb[124].mxu0 %v4037_v44  ;;  %3538 = vst.msk [vmem:[#allocation3 + $0x88] sm:$0xff] %vm898_vm6, %v3446_v11  ;;  %3755 = vrot.lane.b32.xlu0 %v3661_v32, %s5927_s23  ;;  %v8163_v33 = vpop.f32.mrb[69].mxu1 }
 0x3e0   : > { %4441 = vmatprep.mubr.f32.mxu0 %v4043_v30 }
 0x3e1   : > { %v3700_v34 = vpop.permute.xlu0 %3699  ;;  %v3890_v36 = vld [vmem:[#allocation3 + $0x18] sm:$0xff] }
 0x3e2   : > { %v3448_v29 = vpop.permute.xlu1 %3447  ;;  %3793 = vst.msk [vmem:[#allocation3 + $0x68] sm:$0xff] %vm898_vm6, %v3700_v34  ;;  %v3899_v54 = vld [vmem:[#allocation3 + $0x60] sm:$0xff] }
 0x3e3   : > { %4442 = vmatmul.mubr.f32.gmra.mrb[126].mxu0 %v4042_v58  ;;  %3539 = vst.msk [vmem:[#allocation3 + $0xb0] sm:$0xff] %vm898_vm6, %v3448_v29  ;;  %3757 = vrot.lane.b32.xlu0 %v3662_v37, %s5927_s23  ;;  %s215_s23 = sand.u32 1, %s5914_s19  }
 0x3e4   : > { %4511 = vmatprep.mubr.f32.mxu0 %v3890_v36  ;;  %s5009_s25 = sshll.u32 %s215_s23, 8  ;;  %s8393_s22 = scalar_lea.sflag [#allocation5], %s215_s23 }
 0x3e5   : > { %v3702_v61 = vpop.permute.xlu0 %3701  ;;  %v3895_v22 = vld [vmem:[#allocation3 + $0x40] sm:$0xff]  ;;  %s8286_s26 = scalar_lea.vmem [#allocation4], %s5009_s25 }
 0x3e6   : > { %v3450_v38 = vpop.permute.xlu1 %3449  ;;  %3794 = vst.msk [vmem:[#allocation3 + $0x90] sm:$0xff] %vm898_vm6, %v3702_v61  ;;  %v8170_v57 = vpop.f32.mrb[70].mxu1  ;;  %v3904_v46 = vld [vmem:[#allocation3 + $0x88] sm:$0xff]  ;;  %s4943_s6 = sshll.u32 %s8286_s26, 4  ;;  %s8387_s6 = int_to_ptr.vmem [resolvable:$true] %s4943_s6 }
 0x3e7   : > { %4512 = vmatmul.mubr.f32.vlgmr.msra.gmra.mrb[64].mxu0 %v3889_v62  ;;  %3540 = vst.msk [vmem:[#allocation3 + $0xd8] sm:$0xff] %vm898_vm6, %v3450_v38  ;;  %v8172_v28 = vpop.f32.mrb[71].mxu1  ;;  %s5860_s10 = scalar_lea.vmem %s8387_s6, 4096  ;;  %p5867_p0 = scmp.lt.s32.totalorder %s8387_s6, %s5865_s12 }
 0x3e8   : > { %4516 = vmatprep.mubr.f32.mxu0 %v3895_v22  ;;  %p5861_p11 = scmp.ne.s32.totalorder %s8387_s6, %s5860_s10  ;;  %p5868_p1 = scmp.lt.s32.totalorder %s5866_s13, %s5860_s10 }
 0x3e9   : > { %v3704_v40 = vpop.permute.xlu0 %3703  ;;  %v3900_v19 = vld [vmem:[#allocation3 + $0x68] sm:$0xff] }
 0x3ea   : > { %v3452_v21 = vpop.permute.xlu1 %3451  ;;  %3795 = vst.msk [vmem:[#allocation3 + $0xb8] sm:$0xff] %vm898_vm6, %v3704_v40  ;;  %v3909_v47 = vld [vmem:[#allocation3 + $0xb0] sm:$0xff]  ;;  %p5862_p12 = pnand %p5861_p11, %p5999_p5  ;;  %p5869_p2 = por %p5868_p1, %p5867_p0 }
 0x3eb   : > { %4517 = vmatmul.mubr.f32.gmra.mrb[66].mxu0 %v3894_v43  ;;  %3541 = vst.msk [vmem:[#allocation3 + $0x100] sm:$0xff] %vm898_vm6, %v3452_v21 }
 0x3ec   : > { %4521 = vmatprep.mubr.f32.mxu0 %v3900_v19  ;;  %p5863_p13 = pneg %p5862_p12 }
 0x3ed   : > { %v3706_v5 = vpop.permute.xlu0 %3705  ;;  %v3905_v25 = vld [vmem:[#allocation3 + $0x90] sm:$0xff] }
 0x3ee   : > { %v3454_v2 = vpop.permute.xlu1 %3453  ;;  %3796 = vst.msk [vmem:[#allocation3 + $0xe0] sm:$0xff] %vm898_vm6, %v3706_v5  ;;  %v8178_v24 = vpop.f32.mrb[72].mxu1  ;;  %v3914_v39 = vld [vmem:[#allocation3 + $0xd8] sm:$0xff]  ;;  %p5870_p3 = pnand %p5869_p2, %p5863_p13 }
 0x3ef   : > { %4522 = vmatmul.mubr.f32.gmra.mrb[68].mxu0 %v3899_v54  ;;  %3542 = vst.msk [vmem:[#allocation3 + $0x128] sm:$0xff] %vm898_vm6, %v3454_v2  ;;  %v8180_v9 = vpop.f32.mrb[73].mxu1 }
 0x3f0   : > { %4526 = vmatprep.mubr.f32.mxu0 %v3905_v25 }
 0x3f1   : > { %v3708_v50 = vpop.permute.xlu0 %3707  ;;  %v3910_v23 = vld [vmem:[#allocation3 + $0xb8] sm:$0xff] }
 0x3f2   : > { %v3456_v31 = vpop.permute.xlu1 %3455  ;;  %3797 = vst.msk [vmem:[#allocation3 + $0x108] sm:$0xff] %vm898_vm6, %v3708_v50  ;;  %v3919_v42 = vld [vmem:[#allocation3 + $0x100] sm:$0xff] }
 0x3f3   : > { %4527 = vmatmul.mubr.f32.gmra.mrb[70].mxu0 %v3904_v46  ;;  %3543 = vst.msk [vmem:[#allocation3 + $0x150] sm:$0xff] %vm898_vm6, %v3456_v31 }
 0x3f4   : > { %4531 = vmatprep.mubr.f32.mxu0 %v3910_v23 }
 0x3f5   : > { %v3710_v8 = vpop.permute.xlu0 %3709  ;;  %v3915_v15 = vld [vmem:[#allocation3 + $0xe0] sm:$0xff] }
 0x3f6   : > { %v3458_v26 = vpop.permute.xlu1 %3457  ;;  %3798 = vst.msk [vmem:[#allocation3 + $0x130] sm:$0xff] %vm898_vm6, %v3710_v8  ;;  %v3924_v16 = vld [vmem:[#allocation3 + $0x128] sm:$0xff] }
 0x3f7   : > { %4532 = vmatmul.mubr.f32.gmra.mrb[72].mxu0 %v3909_v47  ;;  %3544 = vst.msk [vmem:[#allocation3 + $0x178] sm:$0xff] %vm898_vm6, %v3458_v26  ;;  %v8186_v0 = vpop.f32.mrb[74].mxu1 }
 0x3f8   : > { %4536 = vmatprep.mubr.f32.mxu0 %v3915_v15  ;;  %v8188_v7 = vpop.f32.mrb[75].mxu1 }
 0x3f9   : > { %v3712_v48 = vpop.permute.xlu0 %3711  ;;  %v3920_v59 = vld [vmem:[#allocation3 + $0x108] sm:$0xff] }
 0x3fa   : > { %v3460_v35 = vpop.permute.xlu1 %3459  ;;  %3799 = vst.msk [vmem:[#allocation3 + $0x158] sm:$0xff] %vm898_vm6, %v3712_v48  ;;  %v3929_v14 = vld [vmem:[#allocation3 + $0x150] sm:$0xff] }
 0x3fb   : > { %4537 = vmatmul.mubr.f32.gmra.mrb[74].mxu0 %v3914_v39  ;;  %3545 = vst.msk [vmem:[#allocation3 + $0x1a0] sm:$0xff] %vm898_vm6, %v3460_v35 }
 0x3fc   : > { %4541 = vmatprep.mubr.f32.mxu0 %v3920_v59 }
 0x3fd   : > { %v3714_v41 = vpop.permute.xlu0 %3713  ;;  %v3925_v13 = vld [vmem:[#allocation3 + $0x130] sm:$0xff] }
 0x3fe   : > { %v3462_v18 = vpop.permute.xlu1 %3461  ;;  %3800 = vst.msk [vmem:[#allocation3 + $0x180] sm:$0xff] %vm898_vm6, %v3714_v41  ;;  %v8194_v51 = vpop.f32.mrb[76].mxu1  ;;  %v3934_v53 = vld [vmem:[#allocation3 + $0x178] sm:$0xff] }
 0x3ff   : > { %4542 = vmatmul.mubr.f32.gmra.mrb[76].mxu0 %v3919_v42  ;;  %3546 = vst.msk [vmem:[#allocation3 + $0x1c8] sm:$0xff] %vm898_vm6, %v3462_v18  ;;  %v8196_v27 = vpop.f32.mrb[77].mxu1 }
 0x400   : > { %4546 = vmatprep.mubr.f32.mxu0 %v3925_v13 }
 0x401   : > { %v3716_v10 = vpop.permute.xlu0 %3715  ;;  %v3930_v3 = vld [vmem:[#allocation3 + $0x158] sm:$0xff] }
 0x402   : > { %v3464_v1 = vpop.permute.xlu1 %3463  ;;  %3801 = vst.msk [vmem:[#allocation3 + $0x1a8] sm:$0xff] %vm898_vm6, %v3716_v10  ;;  %v3939_v20 = vld [vmem:[#allocation3 + $0x1a0] sm:$0xff] }
 0x403   : > { %4547 = vmatmul.mubr.f32.gmra.mrb[78].mxu0 %v3924_v16  ;;  %3547 = vst.msk [vmem:[#allocation3 + $0x1f0] sm:$0xff] %vm898_vm6, %v3464_v1 }
 0x404   : > { %4551 = vmatprep.mubr.f32.mxu0 %v3930_v3 }
 0x405   : > { %v3718_v56 = vpop.permute.xlu0 %3717  ;;  %v3935_v49 = vld [vmem:[#allocation3 + $0x180] sm:$0xff] }
 0x406   : > { %v3466_v63 = vpop.permute.xlu1 %3465  ;;  %3802 = vst.msk [vmem:[#allocation3 + $0x1d0] sm:$0xff] %vm898_vm6, %v3718_v56  ;;  %v3944_v29 = vld [vmem:[#allocation3 + $0x1c8] sm:$0xff] }
 0x407   : > { %4552 = vmatmul.mubr.f32.gmra.mrb[80].mxu0 %v3929_v14  ;;  %3548 = vst.msk [vmem:[#allocation3 + $0x218] sm:$0xff] %vm898_vm6, %v3466_v63 }
 0x408   : > { %4556 = vmatprep.mubr.f32.mxu0 %v3935_v49  ;;  %v8202_v45 = vpop.f32.mrb[78].mxu1 }
 0x409   : > { %v8204_v44 = vpop.f32.mrb[79].mxu1  ;;  %v3720_v32 = vpop.permute.xlu0 %3719  ;;  %v3940_v6 = vld [vmem:[#allocation3 + $0x1a8] sm:$0xff] }
 0x40a   : > { %v3468_v11 = vpop.permute.xlu1 %3467  ;;  %3803 = vst.msk [vmem:[#allocation3 + $0x1f8] sm:$0xff] %vm898_vm6, %v3720_v32  ;;  %v3949_v61 = vld [vmem:[#allocation3 + $0x1f0] sm:$0xff] }
 0x40b   : > { %4557 = vmatmul.mubr.f32.gmra.mrb[82].mxu0 %v3934_v53  ;;  %3549 = vst.msk [vmem:[#allocation3 + $0x240] sm:$0xff] %vm898_vm6, %v3468_v11 }
 0x40c   : > { %4561 = vmatprep.mubr.f32.mxu0 %v3940_v6 }
 0x40d   : > { %v3722_v30 = vpop.permute.xlu0 %3721  ;;  %v3945_v58 = vld [vmem:[#allocation3 + $0x1d0] sm:$0xff] }
 0x40e   : > { %v3470_v4 = vpop.permute.xlu1 %3469  ;;  %3804 = vst.msk [vmem:[#allocation3 + $0x220] sm:$0xff] %vm898_vm6, %v3722_v30  ;;  %v3954_v40 = vld [vmem:[#allocation3 + $0x218] sm:$0xff] }
 0x40f   : > { %4562 = vmatmul.mubr.f32.gmra.mrb[84].mxu0 %v3939_v20  ;;  %3550 = vst.msk [vmem:[#allocation3 + $0x268] sm:$0xff] %vm898_vm6, %v3470_v4  ;;  %v8210_v37 = vpop.f32.mrb[80].mxu1 }
 0x410   : > { %4566 = vmatprep.mubr.f32.mxu0 %v3945_v58  ;;  %v8212_v34 = vpop.f32.mrb[81].mxu1 }
 0x411   : > { %v3724_v62 = vpop.permute.xlu0 %3723  ;;  %v3950_v38 = vld [vmem:[#allocation3 + $0x1f8] sm:$0xff] }
 0x412   : > { %v3472_v36 = vpop.permute.xlu1 %3471  ;;  %3805 = vst.msk [vmem:[#allocation3 + $0x248] sm:$0xff] %vm898_vm6, %v3724_v62  ;;  %v3959_v46 = vld [vmem:[#allocation3 + $0x240] sm:$0xff] }
 0x413   : > { %4567 = vmatmul.mubr.f32.gmra.mrb[86].mxu0 %v3944_v29  ;;  %3551 = vst.msk [vmem:[#allocation3 + $0x290] sm:$0xff] %vm898_vm6, %v3472_v36 }
 0x414   : > { %4571 = vmatprep.mubr.f32.mxu0 %v3950_v38 }
 0x415   : > { %v3726_v43 = vpop.permute.xlu0 %3725  ;;  %v3955_v21 = vld [vmem:[#allocation3 + $0x220] sm:$0xff] }
 0x416   : > { %v3474_v22 = vpop.permute.xlu1 %3473  ;;  %3806 = vst.msk [vmem:[#allocation3 + $0x270] sm:$0xff] %vm898_vm6, %v3726_v43  ;;  %v3964_v47 = vld [vmem:[#allocation3 + $0x268] sm:$0xff] }
 0x417   : > { %4572 = vmatmul.mubr.f32.gmra.mrb[88].mxu0 %v3949_v61  ;;  %3552 = vst.msk [vmem:[#allocation3 + $0x2b8] sm:$0xff] %vm898_vm6, %v3474_v22 }
 0x418   : > { %4576 = vmatprep.mubr.f32.mxu0 %v3955_v21  ;;  %v8218_v19 = vpop.f32.mrb[82].mxu1 }
 0x419   : > { %v8220_v54 = vpop.f32.mrb[83].mxu1  ;;  %v3728_v5 = vpop.permute.xlu0 %3727  ;;  %v3960_v25 = vld [vmem:[#allocation3 + $0x248] sm:$0xff] }
 0x41a   : > { %v3476_v2 = vpop.permute.xlu1 %3475  ;;  %3807 = vst.msk [vmem:[#allocation3 + $0x298] sm:$0xff] %vm898_vm6, %v3728_v5  ;;  %v3969_v48 = vld [vmem:[#allocation3 + $0x290] sm:$0xff] }
 0x41b   : > { %4577 = vmatmul.mubr.f32.gmra.mrb[90].mxu0 %v3954_v40  ;;  %3553 = vst.msk [vmem:[#allocation3 + $0x2e0] sm:$0xff] %vm898_vm6, %v3476_v2 }
 0x41c   : > { %4581 = vmatprep.mubr.f32.mxu0 %v3960_v25 }
 0x41d   : > { %v3730_v50 = vpop.permute.xlu0 %3729  ;;  %v3965_v23 = vld [vmem:[#allocation3 + $0x270] sm:$0xff] }
 0x41e   : > { %v3478_v31 = vpop.permute.xlu1 %3477  ;;  %3808 = vst.msk [vmem:[#allocation3 + $0x2c0] sm:$0xff] %vm898_vm6, %v3730_v50  ;;  %v3974_v41 = vld [vmem:[#allocation3 + $0x2b8] sm:$0xff] }
 0x41f   : > { %4582 = vmatmul.mubr.f32.gmra.mrb[92].mxu0 %v3959_v46  ;;  %3554 = vst.msk [vmem:[#allocation3 + $0x308] sm:$0xff] %vm898_vm6, %v3478_v31  ;;  %v8226_v26 = vpop.f32.mrb[84].mxu1 }
 0x420   : > { %4586 = vmatprep.mubr.f32.mxu0 %v3965_v23  ;;  %v8228_v8 = vpop.f32.mrb[85].mxu1 }
 0x421   : > { %v3732_v39 = vpop.permute.xlu0 %3731  ;;  %v3970_v35 = vld [vmem:[#allocation3 + $0x298] sm:$0xff] }
 0x422   : > { %v3480_v15 = vpop.permute.xlu1 %3479  ;;  %3809 = vst.msk [vmem:[#allocation3 + $0x2e8] sm:$0xff] %vm898_vm6, %v3732_v39  ;;  %v3979_v14 = vld [vmem:[#allocation3 + $0x2e0] sm:$0xff] }
 0x423   : > { %4587 = vmatmul.mubr.f32.gmra.mrb[94].mxu0 %v3964_v47  ;;  %3555 = vst.msk [vmem:[#allocation3 + $0x330] sm:$0xff] %vm898_vm6, %v3480_v15 }
 0x424   : > { %4591 = vmatprep.mubr.f32.mxu0 %v3970_v35 }
 0x425   : > { %v3734_v42 = vpop.permute.xlu0 %3733  ;;  %v3975_v18 = vld [vmem:[#allocation3 + $0x2c0] sm:$0xff] }
 0x426   : > { %v3482_v59 = vpop.permute.xlu1 %3481  ;;  %3810 = vst.msk [vmem:[#allocation3 + $0x310] sm:$0xff] %vm898_vm6, %v3734_v42  ;;  %v3984_v53 = vld [vmem:[#allocation3 + $0x308] sm:$0xff] }
 0x427   : > { %4592 = vmatmul.mubr.f32.gmra.mrb[96].mxu0 %v3969_v48  ;;  %3556 = vst.msk [vmem:[#allocation3 + $0x358] sm:$0xff] %vm898_vm6, %v3482_v59 }
 0x428   : > { %4596 = vmatprep.mubr.f32.mxu0 %v3975_v18  ;;  %v8234_v13 = vpop.f32.mrb[86].mxu1 }
 0x429   : > { %v8236_v16 = vpop.f32.mrb[87].mxu1  ;;  %v3736_v10 = vpop.permute.xlu0 %3735  ;;  %v3980_v3 = vld [vmem:[#allocation3 + $0x2e8] sm:$0xff] }
 0x42a   : > { %v3484_v1 = vpop.permute.xlu1 %3483  ;;  %3811 = vst.msk [vmem:[#allocation3 + $0x338] sm:$0xff] %vm898_vm6, %v3736_v10  ;;  %v3989_v30 = vld [vmem:[#allocation3 + $0x330] sm:$0xff] }
 0x42b   : > { %4597 = vmatmul.mubr.f32.gmra.mrb[98].mxu0 %v3974_v41  ;;  %3557 = vst.msk [vmem:[#allocation3 + $0x380] sm:$0xff] %vm898_vm6, %v3484_v1 }
 0x42c   : > { %4601 = vmatprep.mubr.f32.mxu0 %v3980_v3 }
 0x42d   : > { %v3738_v56 = vpop.permute.xlu0 %3737  ;;  %v3985_v49 = vld [vmem:[#allocation3 + $0x310] sm:$0xff] }
 0x42e   : > { %v3486_v63 = vpop.permute.xlu1 %3485  ;;  %3812 = vst.msk [vmem:[#allocation3 + $0x360] sm:$0xff] %vm898_vm6, %v3738_v56  ;;  %v3994_v62 = vld [vmem:[#allocation3 + $0x358] sm:$0xff] }
 0x42f   : > { %4602 = vmatmul.mubr.f32.gmra.mrb[100].mxu0 %v3979_v14  ;;  %3558 = vst.msk [vmem:[#allocation3 + $0x3a8] sm:$0xff] %vm898_vm6, %v3486_v63  ;;  %v8242_v11 = vpop.f32.mrb[88].mxu1 }
 0x430   : > { %4606 = vmatprep.mubr.f32.mxu0 %v3985_v49  ;;  %v8244_v32 = vpop.f32.mrb[89].mxu1 }
 0x431   : > { %v3740_v20 = vpop.permute.xlu0 %3739  ;;  %v3990_v4 = vld [vmem:[#allocation3 + $0x338] sm:$0xff] }
 0x432   : > { %v3488_v6 = vpop.permute.xlu1 %3487  ;;  %3813 = vst.msk [vmem:[#allocation3 + $0x388] sm:$0xff] %vm898_vm6, %v3740_v20  ;;  %v3999_v40 = vld [vmem:[#allocation3 + $0x380] sm:$0xff] }
 0x433   : > { %4607 = vmatmul.mubr.f32.gmra.mrb[102].mxu0 %v3984_v53  ;;  %3559 = vst.msk [vmem:[#allocation3 + $0x3d0] sm:$0xff] %vm898_vm6, %v3488_v6 }
 0x434   : > { %4611 = vmatprep.mubr.f32.mxu0 %v3990_v4 }
 0x435   : > { %v3742_v29 = vpop.permute.xlu0 %3741  ;;  %v3995_v36 = vld [vmem:[#allocation3 + $0x360] sm:$0xff] }
 0x436   : > { %v3490_v58 = vpop.permute.xlu1 %3489  ;;  %3814 = vst.msk [vmem:[#allocation3 + $0x3b0] sm:$0xff] %vm898_vm6, %v3742_v29  ;;  %v4004_v46 = vld [vmem:[#allocation3 + $0x3a8] sm:$0xff] }
 0x437   : > { %4612 = vmatmul.mubr.f32.gmra.mrb[104].mxu0 %v3989_v30  ;;  %3560 = vst.msk [vmem:[#allocation3 + $0x3f8] sm:$0xff] %vm898_vm6, %v3490_v58 }
 0x438   : > { %4616 = vmatprep.mubr.f32.mxu0 %v3995_v36 }
 0x439   : > { %v8250_v38 = vpop.f32.mrb[90].mxu1  ;;  %v3744_v43 = vpop.permute.xlu0 %3743  ;;  %v4000_v21 = vld [vmem:[#allocation3 + $0x388] sm:$0xff] }
 0x43a   : > { %v8252_v61 = vpop.f32.mrb[91].mxu1  ;;  %v3492_v22 = vpop.permute.xlu1 %3491  ;;  %3815 = vst.msk [vmem:[#allocation3 + $0x3d8] sm:$0xff] %vm898_vm6, %v3744_v43  ;;  %v4009_v39 = vld [vmem:[#allocation3 + $0x3d0] sm:$0xff] }
 0x43b   : > { %4617 = vmatmul.mubr.f32.gmra.mrb[106].mxu0 %v3994_v62  ;;  %3561 = vst.msk [vmem:[#allocation3 + $0x420] sm:$0xff] %vm898_vm6, %v3492_v22 }
 0x43c   : > { %4621 = vmatprep.mubr.f32.mxu0 %v4000_v21  ;;  %v8280_v21 = vld [vmem:[%s8438_s4] ss:$0 sm:$0xff] }
 0x43d   : > { %v3746_v5 = vpop.permute.xlu0 %3745  ;;  %v4005_v25 = vld [vmem:[#allocation3 + $0x3b0] sm:$0xff] }
 0x43e   : > { %v3494_v2 = vpop.permute.xlu1 %3493  ;;  %3816 = vst.msk [vmem:[#allocation3 + $0x400] sm:$0xff] %vm898_vm6, %v3746_v5  ;;  %v4014_v42 = vld [vmem:[#allocation3 + $0x3f8] sm:$0xff] }
 0x43f   : > { %4622 = vmatmul.mubr.f32.gmra.mrb[108].mxu0 %v3999_v40  ;;  %3562 = vst.msk [vmem:[#allocation3 + $0x448] sm:$0xff] %vm898_vm6, %v3494_v2 }
 0x440   : > { %4626 = vmatprep.mubr.f32.mxu0 %v4005_v25 }
 0x441   : > { %v8258_v31 = vpop.f32.mrb[92].mxu1  ;;  %v3748_v47 = vpop.permute.xlu0 %3747  ;;  %v4010_v15 = vld [vmem:[#allocation3 + $0x3d8] sm:$0xff] }
 0x442   : > { %v8260_v50 = vpop.f32.mrb[93].mxu1  ;;  %v3496_v23 = vpop.permute.xlu1 %3495  ;;  %3817 = vst.msk [vmem:[#allocation3 + $0x428] sm:$0xff] %vm898_vm6, %v3748_v47  ;;  %v4019_v10 = vld [vmem:[#allocation3 + $0x420] sm:$0xff] }
 0x443   : > { %4627 = vmatmul.mubr.f32.gmra.mrb[110].mxu0 %v4004_v46  ;;  %3563 = vst.msk [vmem:[#allocation3 + $0x470] sm:$0xff] %vm898_vm6, %v3496_v23 }
 0x444   : > { %4631 = vmatprep.mubr.f32.mxu0 %v4010_v15 }
 0x445   : > { %v3750_v48 = vpop.permute.xlu0 %3749  ;;  %v4015_v59 = vld [vmem:[#allocation3 + $0x400] sm:$0xff] }
 0x446   : > { %v3498_v35 = vpop.permute.xlu1 %3497  ;;  %3818 = vst.msk [vmem:[#allocation3 + $0x450] sm:$0xff] %vm898_vm6, %v3750_v48  ;;  %v4024_v56 = vld [vmem:[#allocation3 + $0x448] sm:$0xff] }
 0x447   : > { %4632 = vmatmul.mubr.f32.gmra.mrb[112].mxu0 %v4009_v39  ;;  %3564 = vst.msk [vmem:[#allocation3 + $0x498] sm:$0xff] %vm898_vm6, %v3498_v35 }
 0x448   : > { %4636 = vmatprep.mubr.f32.mxu0 %v4015_v59 }
 0x449   : > { %v3752_v41 = vpop.permute.xlu0 %3751  ;;  %v4020_v1 = vld [vmem:[#allocation3 + $0x428] sm:$0xff] }
 0x44a   : > { %v3500_v18 = vpop.permute.xlu1 %3499  ;;  %3819 = vst.msk [vmem:[#allocation3 + $0x478] sm:$0xff] %vm898_vm6, %v3752_v41  ;;  %v4029_v6 = vld [vmem:[#allocation3 + $0x470] sm:$0xff] }
 0x44b   : > { %4637 = vmatmul.mubr.f32.gmra.mrb[114].mxu0 %v4014_v42  ;;  %3565 = vst.msk [vmem:[#allocation3 + $0x4c0] sm:$0xff] %vm898_vm6, %v3500_v18 }
 0x44c   : > { %4641 = vmatprep.mubr.f32.mxu0 %v4020_v1 }
 0x44d   : > { %v3754_v14 = vpop.permute.xlu0 %3753  ;;  %v4025_v63 = vld [vmem:[#allocation3 + $0x450] sm:$0xff] }
 0x44e   : > { %v3502_v3 = vpop.permute.xlu1 %3501  ;;  %3820 = vst.msk [vmem:[#allocation3 + $0x4a0] sm:$0xff] %vm898_vm6, %v3754_v14  ;;  %v4034_v30 = vld [vmem:[#allocation3 + $0x498] sm:$0xff] }
 0x44f   : > { %4642 = vmatmul.mubr.f32.gmra.mrb[116].mxu0 %v4019_v10  ;;  %3566 = vst.msk [vmem:[#allocation3 + $0x4e8] sm:$0xff] %vm898_vm6, %v3502_v3 }
 0x450   : > { %4646 = vmatprep.mubr.f32.mxu0 %v4025_v63 }
 0x451   : > { %v3756_v49 = vpop.permute.xlu0 %3755  ;;  %v4030_v53 = vld [vmem:[#allocation3 + $0x478] sm:$0xff] }
 0x452   : > { %3821 = vst.msk [vmem:[#allocation3 + $0x4c8] sm:$0xff] %vm898_vm6, %v3756_v49  ;;  %v4039_v29 = vld [vmem:[#allocation3 + $0x4c0] sm:$0xff] }
 0x453   : > { %4647 = vmatmul.mubr.f32.gmra.mrb[118].mxu0 %v4024_v56 }
 0x454   : > { %4651 = vmatprep.mubr.f32.mxu0 %v4030_v53 }
 0x455   : > { %v3758_v20 = vpop.permute.xlu0 %3757  ;;  %v4035_v4 = vld [vmem:[#allocation3 + $0x4a0] sm:$0xff] }
 0x456   : > { %3822 = vst.msk [vmem:[#allocation3 + $0x4f0] sm:$0xff] %vm898_vm6, %v3758_v20  ;;  %v4044_v62 = vld [vmem:[#allocation3 + $0x4e8] sm:$0xff] }
 0x457   : > { %4652 = vmatmul.mubr.f32.gmra.mrb[120].mxu0 %v4029_v6 }
 0x458   : > { %4656 = vmatprep.mubr.f32.mxu0 %v4035_v4 }
 0x459   : > { %v4040_v58 = vld [vmem:[#allocation3 + $0x4c8] sm:$0xff] }
 0x45b   : > { %4657 = vmatmul.mubr.f32.gmra.mrb[122].mxu0 %v4034_v30 }
 0x45c   : > { %4661 = vmatprep.mubr.f32.mxu0 %v4040_v58 }
 0x45d   : > { %v4045_v36 = vld [vmem:[#allocation3 + $0x4f0] sm:$0xff] }
 0x45f   : > { %4662 = vmatmul.mubr.f32.gmra.mrb[124].mxu0 %v4039_v29 }
 0x460   : > { %4666 = vmatprep.mubr.f32.mxu0 %v4045_v36 }
 0x463   : > { %4667 = vmatmul.mubr.f32.gmra.mrb[126].mxu0 %v4044_v62 }
 0x484   : > { %v8272_v22 = vpop.f32.mrb[94].mxu1 }
 0x485   : > { %v8274_v43 = vpop.f32.mrb[95].mxu1 }
 0x4ba   : > { %v4513_v40 = vpop.f32.mrb[64].mxu0 }
 0x4bb   : > { %v5651_v2 = vadd.f32 %v8280_v21, %v4513_v40  ;;  %v4515_v5 = vpop.f32.mrb[65].mxu0 }
 0x4bd   : > { %v4739_v25 = vadd.f32 %v5651_v2, %v8131_v55 }
 0x4be   : > { %v4518_v46 = vpop.f32.mrb[66].mxu0 }
 0x4bf   : > { %4897 = vst [vmem:[%s8286_s26] sm:$0xff] %v4739_v25  ;;  %v5652_v23 = vadd.f32 %v8280_v21, %v4518_v46  ;;  %v4520_v47 = vpop.f32.mrb[67].mxu0 }
 0x4c1   : > { %v4744_v15 = vadd.f32 %v5652_v23, %v8127_v12 }
 0x4c2   : > { %v4523_v39 = vpop.f32.mrb[68].mxu0 }
 0x4c3   : > { %4898 = vst [vmem:[%s8286_s26 + $0x8] sm:$0xff] %v4744_v15  ;;  %v5653_v35 = vadd.f32 %v8280_v21, %v4523_v39  ;;  %v4525_v48 = vpop.f32.mrb[69].mxu0 }
 0x4c5   : > { %v4749_v55 = vadd.f32 %v5653_v35, %v8149_v17 }
 0x4c6   : > { %v4528_v59 = vpop.f32.mrb[70].mxu0 }
 0x4c7   : > { %4899 = vst [vmem:[%s8286_s26 + $0x10] sm:$0xff] %v4749_v55  ;;  %v5654_v42 = vadd.f32 %v8280_v21, %v4528_v59  ;;  %v4530_v18 = vpop.f32.mrb[71].mxu0 }
 0x4c9   : > { %v4754_v41 = vadd.f32 %v5654_v42, %v8145_v60 }
 0x4ca   : > { %v4533_v1 = vpop.f32.mrb[72].mxu0 }
 0x4cb   : > { %4900 = vst [vmem:[%s8286_s26 + $0x18] sm:$0xff] %v4754_v41  ;;  %v5655_v12 = vadd.f32 %v8280_v21, %v4533_v1  ;;  %v4535_v10 = vpop.f32.mrb[73].mxu0 }
 0x4cd   : > { %v4759_v3 = vadd.f32 %v5655_v12, %v8163_v33 }
 0x4ce   : > { %v4538_v14 = vpop.f32.mrb[74].mxu0 }
 0x4cf   : > { %4901 = vst [vmem:[%s8286_s26 + $0x20] sm:$0xff] %v4759_v3  ;;  %v5656_v17 = vadd.f32 %v8280_v21, %v4538_v14  ;;  %v4540_v63 = vpop.f32.mrb[75].mxu0 }
 0x4d1   : > { %v4764_v56 = vadd.f32 %v5656_v17, %v8160_v52 }
 0x4d2   : > { %v4543_v49 = vpop.f32.mrb[76].mxu0 }
 0x4d3   : > { %4902 = vst [vmem:[%s8286_s26 + $0x28] sm:$0xff] %v4764_v56  ;;  %v5657_v60 = vadd.f32 %v8280_v21, %v4543_v49  ;;  %v4545_v53 = vpop.f32.mrb[77].mxu0 }
 0x4d5   : > { %v4769_v6 = vadd.f32 %v5657_v60, %v8172_v28 }
 0x4d6   : > { %v4548_v20 = vpop.f32.mrb[78].mxu0 }
 0x4d7   : > { %4903 = vst [vmem:[%s8286_s26 + $0x30] sm:$0xff] %v4769_v6  ;;  %v5658_v33 = vadd.f32 %v8280_v21, %v4548_v20  ;;  %v4550_v4 = vpop.f32.mrb[79].mxu0 }
 0x4d9   : > { %v4774_v30 = vadd.f32 %v5658_v33, %v8170_v57 }
 0x4da   : > { %v4553_v58 = vpop.f32.mrb[80].mxu0 }
 0x4db   : > { %4904 = vst [vmem:[%s8286_s26 + $0x38] sm:$0xff] %v4774_v30  ;;  %v5659_v52 = vadd.f32 %v8280_v21, %v4553_v58  ;;  %v4555_v29 = vpop.f32.mrb[81].mxu0 }
 0x4dd   : > { %v4779_v36 = vadd.f32 %v5659_v52, %v8180_v9 }
 0x4de   : > { %v4558_v62 = vpop.f32.mrb[82].mxu0 }
 0x4df   : > { %4905 = vst [vmem:[%s8286_s26 + $0x40] sm:$0xff] %v4779_v36  ;;  %v5660_v28 = vadd.f32 %v8280_v21, %v4558_v62  ;;  %v4560_v40 = vpop.f32.mrb[83].mxu0 }
 0x4e1   : > { %v4784_v2 = vadd.f32 %v5660_v28, %v8178_v24 }
 0x4e2   : > { %v4563_v5 = vpop.f32.mrb[84].mxu0 }
 0x4e3   : > { %4906 = vst [vmem:[%s8286_s26 + $0x48] sm:$0xff] %v4784_v2  ;;  %v5661_v57 = vadd.f32 %v8280_v21, %v4563_v5  ;;  %v4565_v25 = vpop.f32.mrb[85].mxu0 }
 0x4e5   : > { %v4789_v46 = vadd.f32 %v5661_v57, %v8188_v7 }
 0x4e6   : > { %v4568_v23 = vpop.f32.mrb[86].mxu0 }
 0x4e7   : > { %4907 = vst [vmem:[%s8286_s26 + $0x50] sm:$0xff] %v4789_v46  ;;  %v5662_v9 = vadd.f32 %v8280_v21, %v4568_v23  ;;  %v4570_v47 = vpop.f32.mrb[87].mxu0 }
 0x4e9   : > { %v4794_v15 = vadd.f32 %v5662_v9, %v8186_v0 }
 0x4ea   : > { %v4573_v39 = vpop.f32.mrb[88].mxu0 }
 0x4eb   : > { %4908 = vst [vmem:[%s8286_s26 + $0x58] sm:$0xff] %v4794_v15  ;;  %v5663_v24 = vadd.f32 %v8280_v21, %v4573_v39  ;;  %v4575_v35 = vpop.f32.mrb[89].mxu0 }
 0x4ed   : > { %v4799_v48 = vadd.f32 %v5663_v24, %v8196_v27 }
 0x4ee   : > { %v4578_v55 = vpop.f32.mrb[90].mxu0 }
 0x4ef   : > { %4909 = vst [vmem:[%s8286_s26 + $0x60] sm:$0xff] %v4799_v48  ;;  %v5664_v7 = vadd.f32 %v8280_v21, %v4578_v55  ;;  %v4580_v59 = vpop.f32.mrb[91].mxu0 }
 0x4f1   : > { %v4804_v42 = vadd.f32 %v5664_v7, %v8194_v51 }
 0x4f2   : > { %v4583_v18 = vpop.f32.mrb[92].mxu0 }
 0x4f3   : > { %4910 = vst [vmem:[%s8286_s26 + $0x68] sm:$0xff] %v4804_v42  ;;  %v5665_v0 = vadd.f32 %v8280_v21, %v4583_v18  ;;  %v4585_v41 = vpop.f32.mrb[93].mxu0 }
 0x4f5   : > { %v4809_v1 = vadd.f32 %v5665_v0, %v8204_v44 }
 0x4f6   : > { %v4588_v12 = vpop.f32.mrb[94].mxu0 }
 0x4f7   : > { %4911 = vst [vmem:[%s8286_s26 + $0x70] sm:$0xff] %v4809_v1  ;;  %v5666_v27 = vadd.f32 %v8280_v21, %v4588_v12  ;;  %v4590_v10 = vpop.f32.mrb[95].mxu0 }
 0x4f9   : > { %v4814_v3 = vadd.f32 %v5666_v27, %v8202_v45 }
 0x4fa   : > { %v4593_v14 = vpop.f32.mrb[96].mxu0 }
 0x4fb   : > { %4912 = vst [vmem:[%s8286_s26 + $0x78] sm:$0xff] %v4814_v3  ;;  %v5667_v51 = vadd.f32 %v8280_v21, %v4593_v14  ;;  %v4595_v17 = vpop.f32.mrb[97].mxu0 }
 0x4fd   : > { %v4819_v63 = vadd.f32 %v5667_v51, %v8212_v34 }
 0x4fe   : > { %v4598_v56 = vpop.f32.mrb[98].mxu0 }
 0x4ff   : > { %4913 = vst [vmem:[%s8286_s26 + $0x80] sm:$0xff] %v4819_v63  ;;  %v5668_v44 = vadd.f32 %v8280_v21, %v4598_v56  ;;  %v4600_v49 = vpop.f32.mrb[99].mxu0 }
 0x501   : > { %v4824_v60 = vadd.f32 %v5668_v44, %v8210_v37 }
 0x502   : > { %v4603_v53 = vpop.f32.mrb[100].mxu0 }
 0x503   : > { %4914 = vst [vmem:[%s8286_s26 + $0x88] sm:$0xff] %v4824_v60  ;;  %v5669_v45 = vadd.f32 %v8280_v21, %v4603_v53  ;;  %v4605_v6 = vpop.f32.mrb[101].mxu0 }
 0x505   : > { %v4829_v20 = vadd.f32 %v5669_v45, %v8220_v54 }
 0x506   : > { %v4608_v33 = vpop.f32.mrb[102].mxu0 }
 0x507   : > { %4915 = vst [vmem:[%s8286_s26 + $0x90] sm:$0xff] %v4829_v20  ;;  %v5670_v34 = vadd.f32 %v8280_v21, %v4608_v33  ;;  %v4610_v4 = vpop.f32.mrb[103].mxu0 }
 0x509   : > { %v4834_v30 = vadd.f32 %v5670_v34, %v8218_v19 }
 0x50a   : > { %v4613_v58 = vpop.f32.mrb[104].mxu0 }
 0x50b   : > { %4916 = vst [vmem:[%s8286_s26 + $0x98] sm:$0xff] %v4834_v30  ;;  %v5671_v37 = vadd.f32 %v8280_v21, %v4613_v58  ;;  %v4615_v52 = vpop.f32.mrb[105].mxu0 }
 0x50d   : > { %v4839_v29 = vadd.f32 %v5671_v37, %v8228_v8 }
 0x50e   : > { %v4618_v36 = vpop.f32.mrb[106].mxu0 }
 0x50f   : > { %4917 = vst [vmem:[%s8286_s26 + $0xa0] sm:$0xff] %v4839_v29  ;;  %v5672_v54 = vadd.f32 %v8280_v21, %v4618_v36  ;;  %v4620_v62 = vpop.f32.mrb[107].mxu0 }
 0x511   : > { %v4844_v28 = vadd.f32 %v5672_v54, %v8226_v26 }
 0x512   : > { %v4623_v40 = vpop.f32.mrb[108].mxu0 }
 0x513   : > { %4918 = vst [vmem:[%s8286_s26 + $0xa8] sm:$0xff] %v4844_v28  ;;  %v5673_v19 = vadd.f32 %v8280_v21, %v4623_v40  ;;  %v4625_v2 = vpop.f32.mrb[109].mxu0 }
 0x515   : > { %v4849_v5 = vadd.f32 %v5673_v19, %v8236_v16 }
 0x516   : > { %v4628_v57 = vpop.f32.mrb[110].mxu0 }
 0x517   : > { %4919 = vst [vmem:[%s8286_s26 + $0xb0] sm:$0xff] %v4849_v5  ;;  %v5674_v8 = vadd.f32 %v8280_v21, %v4628_v57  ;;  %v4630_v25 = vpop.f32.mrb[111].mxu0 }
 0x519   : > { %v4854_v46 = vadd.f32 %v5674_v8, %v8234_v13 }
 0x51a   : > { %v4633_v23 = vpop.f32.mrb[112].mxu0 }
 0x51b   : > { %4920 = vst [vmem:[%s8286_s26 + $0xb8] sm:$0xff] %v4854_v46  ;;  %v5675_v26 = vadd.f32 %v8280_v21, %v4633_v23  ;;  %v4635_v9 = vpop.f32.mrb[113].mxu0 }
 0x51d   : > { %v4859_v47 = vadd.f32 %v5675_v26, %v8244_v32 }
 0x51e   : > { %v4638_v15 = vpop.f32.mrb[114].mxu0 }
 0x51f   : > { %4921 = vst [vmem:[%s8286_s26 + $0xc0] sm:$0xff] %v4859_v47  ;;  %v5676_v16 = vadd.f32 %v8280_v21, %v4638_v15  ;;  %v4640_v39 = vpop.f32.mrb[115].mxu0 }
 0x521   : > { %v4864_v24 = vadd.f32 %v5676_v16, %v8242_v11 }
 0x522   : > { %v4643_v35 = vpop.f32.mrb[116].mxu0 }
 0x523   : > { %4922 = vst [vmem:[%s8286_s26 + $0xc8] sm:$0xff] %v4864_v24  ;;  %v5677_v13 = vadd.f32 %v8280_v21, %v4643_v35  ;;  %v4645_v48 = vpop.f32.mrb[117].mxu0 }
 0x525   : > { %v4869_v55 = vadd.f32 %v5677_v13, %v8252_v61 }
 0x526   : > { %v4648_v7 = vpop.f32.mrb[118].mxu0 }
 0x527   : > { %4923 = vst [vmem:[%s8286_s26 + $0xd0] sm:$0xff] %v4869_v55  ;;  %v5678_v32 = vadd.f32 %v8280_v21, %v4648_v7  ;;  %v4650_v59 = vpop.f32.mrb[119].mxu0 }
 0x529   : > { %v4874_v42 = vadd.f32 %v5678_v32, %v8250_v38 }
 0x52a   : > { %v4653_v18 = vpop.f32.mrb[120].mxu0 }
 0x52b   : > { %4924 = vst [vmem:[%s8286_s26 + $0xd8] sm:$0xff] %v4874_v42  ;;  %v5679_v11 = vadd.f32 %v8280_v21, %v4653_v18  ;;  %v4655_v0 = vpop.f32.mrb[121].mxu0 }
 0x52d   : > { %v4879_v41 = vadd.f32 %v5679_v11, %v8260_v50 }
 0x52e   : > { %v4658_v1 = vpop.f32.mrb[122].mxu0 }
 0x52f   : > { %4925 = vst [vmem:[%s8286_s26 + $0xe0] sm:$0xff] %v4879_v41  ;;  %v5680_v61 = vadd.f32 %v8280_v21, %v4658_v1  ;;  %v4660_v12 = vpop.f32.mrb[123].mxu0 }
 0x531   : > { %v4884_v27 = vadd.f32 %v5680_v61, %v8258_v31 }
 0x532   : > { %v4663_v38 = vpop.f32.mrb[124].mxu0 }
 0x533   : > { %4926 = vst [vmem:[%s8286_s26 + $0xe8] sm:$0xff] %v4884_v27  ;;  %v5681_v10 = vadd.f32 %v8280_v21, %v4663_v38  ;;  %v4665_v3 = vpop.f32.mrb[125].mxu0 }
 0x535   : > { %v4889_v14 = vadd.f32 %v5681_v10, %v8274_v43 }
 0x536   : > { %v4668_v50 = vpop.f32.mrb[126].mxu0 }
 0x537   : > { %4927 = vst [vmem:[%s8286_s26 + $0xf0] sm:$0xff] %v4889_v14  ;;  %v5682_v51 = vadd.f32 %v8280_v21, %v4668_v50  ;;  %v4670_v17 = vpop.f32.mrb[127].mxu0 }
 0x539   : > { %v4894_v31 = vadd.f32 %v5682_v51, %v8272_v22 }
 0x53b   : > { %4928 = vst [vmem:[%s8286_s26 + $0xf8] sm:$0xff] %v4894_v31 }
 0x53c   : > { %5873 = shalt.err (!%p5870_p3)
}
 0x53d   : > { %s5874_s14 = scalar_lea.hbm %s8385_s9, 4096  ;;  %s5878_s16 = scalar_lea.hbm %s8439_s5, 8192 }
 0x53e   : > { %p5875_p4 = scmp.ne.s32.totalorder %s8385_s9, %s5874_s14  ;;  %p5879_p9 = scmp.lt.u32.totalorder %s8385_s9, %s8439_s5 }
 0x53f   : > { %p5880_p10 = scmp.lt.u32.totalorder %s5878_s16, %s5874_s14  ;;  %p5882_p12 = scmp.lt.u32.totalorder %s5874_s14, %s8385_s9 }
 0x540   : > { %p5876_p7 = pnand %p5875_p4, %p5999_p5 }
 0x541   : > { %p5881_p11 = por %p5880_p10, %p5879_p9 }
 0x542   : > { %p5877_p8 = pneg %p5876_p7 }
 0x543   : > { %p5883_p13 = por %p5882_p12, %p5881_p11 }
 0x545   : > { %p5884_p0 = pnand %p5883_p13, %p5877_p8 }
 0x547   : > { %5887 = shalt.err (!%p5884_p0)
}
 0x548   : > { %s5929_s26 = smov 128   ;;  %s5930_s30 = smov 8  }
 0x549   : > { %5811 = dma.vmem_to_hbm [thread:$0]  (%p5999_p5), %s8387_s6, 4096, %s8385_s9, %s8393_s22, %s5929_s26, %s5929_s26, %s5930_s30  }
 0x54a PF: > { %p5817_p1 = scmp.ge.s32.totalorder %s5922_s21, 2  ;;  %s4958_s7 = sand.u32 1, %s5910_s18  }
 0x54b   : > { %s4959_s8 = scalar_lea.sflag [#allocation5], %s4958_s7 }
 0x54c   : > { %p5814_p2 = pnand %p5817_p1, %p6003_p6 }
 0x54e   : > { %5905 = dma.done.wait (!%p5814_p2), %s4959_s8, 4096  }
 0x54f   : > { %5907 = vsyncadd (!%p5814_p2), %s4959_s8, 4294963200  ;;  %p15_p3 = scmp.ge.s32.totalorder %s5986_s24, 4   ;;  %s8471_s18 = smov %s5914_s19 }
 0x550   : > { %s8472_s19 = smov %s5918_s20  ;;  %s8473_s20 = smov %s5997_s27 }
 0x551   : > { %s8474_s21 = smov %s5986_s24  ;;  %17 = sbr.rel (!%p15_p3) target bundleno = 3 (0x3), region = 77 }
 0x558   :  { %4964 = vsyncpa [#allocation5], 1 }
 0x559   :  { %4966 = vsyncpa [#allocation5 + $0x1], 1 }

</bundles_post_ra>
